<compile_context>
chip_gen: v5e
topology: v5e:2x2
jax: 0.10.0
libtpu: 0.0.40
codegen_flags: <defaults>
</compile_context>

<pallas_src>
import math

import jax
import jax.numpy as jnp
from jax.experimental import pallas as pl
from jax.experimental.pallas import tpu as pltpu

# ----------------------------- model config ---------------------------------
D_MODEL  = 32
N_HEADS  = 4
D_HEAD   = D_MODEL // N_HEADS
D_FF     = 64
N_LAYERS = 2
EPS      = 1e-6
NEG_INF  = -1e9
SCALE    = 1.0 / math.sqrt(D_HEAD)

# ------------------------- packed parameter layout ---------------------------
# One f32 slab [N_LAYERS*LAYER_ROWS + 8, PAR_COLS]; every block starts at a
# static row offset (weight blocks 8-aligned), column offset always 0.
PAR_COLS   = max(3 * D_MODEL, 2 * D_MODEL, D_FF)      # 96
R_WQKV     = 0                 # [D, 3D]  fused Q|K|V (self), Q pre-scaled
R_WO_SELF  = 1 * D_MODEL       # [D, D]
R_WQ_SRC   = 2 * D_MODEL       # [D, D]   (pre-scaled)
R_WKV_SRC  = 3 * D_MODEL       # [D, 2D]  fused K|V (cross)
R_WO_SRC   = 4 * D_MODEL       # [D, D]
R_W1       = 5 * D_MODEL       # [D, Dff]
R_W2T      = 6 * D_MODEL       # [D, Dff] (= W2 transposed)
R_BIAS     = 7 * D_MODEL       # 7 bias rows: bqkv, bo_s, bq_c, bkv_c, bo_c, b1, b2
R_LN       = 7 * D_MODEL + 8   # 6 rows: g0,b0,g1,b1,g2,b2
LAYER_ROWS = 7 * D_MODEL + 16  # 240


# --------------------------- fused decoder kernel ----------------------------
def _make_decoder_kernel(B, T, Ts, n_layers):
    D, H, Dh, Dff = D_MODEL, N_HEADS, D_HEAD, D_FF
    BT, BTs = B * T, B * Ts

    def kernel(data_ref, mask_ref, par_ref, o_ref):
        # data_ref: [B*T + B*Ts, D] f32 -- rows [0:B*T] = x, rest = memory
        # mask_ref: [2*B*T, max(T,Ts)] f32 additive masks (0 / -1e9)
        # par_ref : [n_layers*LAYER_ROWS + 8, PAR_COLS] f32 packed parameters
        x   = data_ref[0:BT, :]                         # [B*T, D]
        mem = data_ref[BT:BT + BTs, :]                  # [B*Ts, D]
        tgt_add = mask_ref[0:BT, 0:T].reshape(B, T, T)
        src_add = mask_ref[BT:2 * BT, 0:Ts].reshape(B, T, Ts)

        def ln(v, g, b):
            # Annotated-Transformer LayerNorm: g*(x-mean)/(std+eps)+b, unbiased std
            mean = jnp.mean(v, axis=-1, keepdims=True)
            diff = v - mean
            var = jnp.sum(diff * diff, axis=-1, keepdims=True) * (1.0 / (D - 1))
            inv = pl.reciprocal(jnp.sqrt(var) + EPS)     # EUP, exact mode
            return g * (diff * inv) + b

        def attend(q, k3, v3, mask_add):
            # q: [B*T, D]; k3/v3: [B, Tk, D]; mask_add: [B, T, Tk]
            # SCALE already folded into the Q projection weights.
            q3 = q.reshape(B, T, D)
            heads = []
            for h in range(H):                           # static 4-way loop
                lo = h * Dh
                qh = q3[:, :, lo:lo + Dh]
                kh = k3[:, :, lo:lo + Dh]
                vh = v3[:, :, lo:lo + Dh]
                s = jnp.einsum("bqd,bkd->bqk", qh, kh,
                               preferred_element_type=jnp.float32)
                s = s + mask_add
                s = s - jnp.max(s, axis=-1, keepdims=True)
                p = jnp.exp(s)
                p = p * pl.reciprocal(jnp.sum(p, axis=-1, keepdims=True),
                                      approx=True)
                heads.append(jnp.einsum("bqk,bkd->bqd", p, vh,
                                        preferred_element_type=jnp.float32))
            return jnp.concatenate(heads, axis=-1).reshape(BT, D)

        for l in range(n_layers):                        # unrolled, N small
            off = l * LAYER_ROWS
            wqkv  = par_ref[off + R_WQKV:off + R_WQKV + D, 0:3 * D]
            wo_s  = par_ref[off + R_WO_SELF:off + R_WO_SELF + D, 0:D]
            wq_c  = par_ref[off + R_WQ_SRC:off + R_WQ_SRC + D, 0:D]
            wkv_c = par_ref[off + R_WKV_SRC:off + R_WKV_SRC + D, 0:2 * D]
            wo_c  = par_ref[off + R_WO_SRC:off + R_WO_SRC + D, 0:D]
            w1    = par_ref[off + R_W1:off + R_W1 + D, 0:Dff]
            w2t   = par_ref[off + R_W2T:off + R_W2T + D, 0:Dff]
            rb = off + R_BIAS
            bqkv  = par_ref[rb + 0:rb + 1, 0:3 * D]
            bo_s  = par_ref[rb + 1:rb + 2, 0:D]
            bq_c  = par_ref[rb + 2:rb + 3, 0:D]
            bkv_c = par_ref[rb + 3:rb + 4, 0:2 * D]
            bo_c  = par_ref[rb + 4:rb + 5, 0:D]
            b1    = par_ref[rb + 5:rb + 6, 0:Dff]
            b2    = par_ref[rb + 6:rb + 7, 0:D]
            rl = off + R_LN

            # ---- sublayer 0: pre-LN masked self-attention + residual -------
            xn = ln(x, par_ref[rl + 0:rl + 1, 0:D], par_ref[rl + 1:rl + 2, 0:D])
            qkv = jnp.dot(xn, wqkv, preferred_element_type=jnp.float32) + bqkv
            ctx = attend(qkv[:, 0:D],
                         qkv[:, D:2 * D].reshape(B, T, D),
                         qkv[:, 2 * D:3 * D].reshape(B, T, D),
                         tgt_add)
            x = x + jnp.dot(ctx, wo_s, preferred_element_type=jnp.float32) + bo_s

            # ---- sublayer 1: pre-LN cross-attention over memory + residual --
            xn = ln(x, par_ref[rl + 2:rl + 3, 0:D], par_ref[rl + 3:rl + 4, 0:D])
            q = jnp.dot(xn, wq_c, preferred_element_type=jnp.float32) + bq_c
            kv = jnp.dot(mem, wkv_c, preferred_element_type=jnp.float32) + bkv_c
            ctx = attend(q,
                         kv[:, 0:D].reshape(B, Ts, D),
                         kv[:, D:2 * D].reshape(B, Ts, D),
                         src_add)
            x = x + jnp.dot(ctx, wo_c, preferred_element_type=jnp.float32) + bo_c

            # ---- sublayer 2: pre-LN position-wise FFN + residual ------------
            xn = ln(x, par_ref[rl + 4:rl + 5, 0:D], par_ref[rl + 5:rl + 6, 0:D])
            h1 = jnp.maximum(
                jnp.dot(xn, w1, preferred_element_type=jnp.float32) + b1, 0.0)
            x = x + jax.lax.dot_general(
                h1, w2t, (((1,), (1,)), ((), ())),      # h1 @ w2t.T == h1 @ w2
                preferred_element_type=jnp.float32) + b2

        # ---- final LayerNorm -------------------------------------------------
        fo = n_layers * LAYER_ROWS
        o_ref[...] = ln(x, par_ref[fo:fo + 1, 0:D],
                        par_ref[fo + 1:fo + 2, 0:D]).astype(o_ref.dtype)

    return kernel


# ------------------------------ wrapper --------------------------------------
def decoder_forward(x, memory, src_mask, tgt_mask, packed_params):
    # x: [B,T,D], memory: [B,Ts,D], src_mask: [B,1,Ts], tgt_mask: [1,T,T]
    B, T, D = x.shape
    Ts = memory.shape[1]

    # Activation slab: x rows then memory rows.
    data = jnp.concatenate(
        [x.reshape(B * T, D), memory.reshape(B * Ts, D)], axis=0
    ).astype(jnp.float32)

    # Additive float masks (0 visible / -1e9 masked), packed into one slab.
    tgt_add = jnp.where(jnp.broadcast_to(tgt_mask, (B, T, T)) == 0,
                        NEG_INF, 0.0).astype(jnp.float32).reshape(B * T, T)
    src_add = jnp.where(jnp.broadcast_to(src_mask, (B, T, Ts)) == 0,
                        NEG_INF, 0.0).astype(jnp.float32).reshape(B * T, Ts)
    wm = max(T, Ts)
    masks = jnp.concatenate(
        [jnp.pad(tgt_add, ((0, 0), (0, wm - T))),
         jnp.pad(src_add, ((0, 0), (0, wm - Ts)))], axis=0)     # [2*B*T, wm]

    kernel = _make_decoder_kernel(B, T, Ts, N_LAYERS)
    out2d = pl.pallas_call(
        kernel,
        out_shape=jax.ShapeDtypeStruct((B * T, D), x.dtype),
        in_specs=[pl.BlockSpec(memory_space=pltpu.MemorySpace.VMEM)] * 3,
        out_specs=pl.BlockSpec(memory_space=pltpu.MemorySpace.VMEM),
    )(data, masks, packed_params)
    return out2d.reshape(B, T, D)


# --------------------------- parameter init / packing ------------------------
def init_layer_params(key):
    keys = jax.random.split(key, 10)

    def lin(k, din, dout):
        kw, kb = jax.random.split(k)
        w = jax.random.normal(kw, (din, dout), jnp.float32) * 0.08
        b = jax.random.normal(kb, (dout,), jnp.float32) * 0.02
        return w, b

    p = {}
    p["wq_self"], p["bq_self"] = lin(keys[0], D_MODEL, D_MODEL)
    p["wk_self"], p["bk_self"] = lin(keys[1], D_MODEL, D_MODEL)
    p["wv_self"], p["bv_self"] = lin(keys[2], D_MODEL, D_MODEL)
    p["wo_self"], p["bo_self"] = lin(keys[3], D_MODEL, D_MODEL)
    p["wq_src"],  p["bq_src"]  = lin(keys[4], D_MODEL, D_MODEL)
    p["wk_src"],  p["bk_src"]  = lin(keys[5], D_MODEL, D_MODEL)
    p["wv_src"],  p["bv_src"]  = lin(keys[6], D_MODEL, D_MODEL)
    p["wo_src"],  p["bo_src"]  = lin(keys[7], D_MODEL, D_MODEL)
    p["w1"], p["b1"] = lin(keys[8], D_MODEL, D_FF)
    p["w2"], p["b2"] = lin(keys[9], D_FF, D_MODEL)
    p["ln_g"] = jnp.ones((3, D_MODEL), jnp.float32)
    p["ln_b"] = jnp.zeros((3, D_MODEL), jnp.float32)
    return p


def _row_pad(a):
    a = jnp.asarray(a, jnp.float32)
    if a.ndim == 1:
        a = a[None, :]
    return jnp.pad(a, ((0, 0), (0, PAR_COLS - a.shape[1])))


def pack_params(layers, norm_g, norm_b):
    rows = []
    for p in layers:
        wq_s = p["wq_self"] * SCALE           # fold 1/sqrt(d_head) into Q
        bq_s = p["bq_self"] * SCALE
        wq_c = p["wq_src"] * SCALE
        bq_c = p["bq_src"] * SCALE
        rows += [
            _row_pad(jnp.concatenate([wq_s, p["wk_self"], p["wv_self"]], 1)),
            _row_pad(p["wo_self"]),
            _row_pad(wq_c),
            _row_pad(jnp.concatenate([p["wk_src"], p["wv_src"]], 1)),
            _row_pad(p["wo_src"]),
            _row_pad(p["w1"]),
            _row_pad(p["w2"].T),
            _row_pad(jnp.concatenate([bq_s, p["bk_self"], p["bv_self"]])),
            _row_pad(p["bo_self"]),
            _row_pad(bq_c),
            _row_pad(jnp.concatenate([p["bk_src"], p["bv_src"]])),
            _row_pad(p["bo_src"]),
            _row_pad(p["b1"]),
            _row_pad(p["b2"]),
            jnp.zeros((1, PAR_COLS), jnp.float32),
            _row_pad(p["ln_g"][0]), _row_pad(p["ln_b"][0]),
            _row_pad(p["ln_g"][1]), _row_pad(p["ln_b"][1]),
            _row_pad(p["ln_g"][2]), _row_pad(p["ln_b"][2]),
            jnp.zeros((2, PAR_COLS), jnp.float32),
        ]
    rows += [_row_pad(norm_g), _row_pad(norm_b),
             jnp.zeros((6, PAR_COLS), jnp.float32)]
    packed = jnp.concatenate(rows, axis=0)
    assert packed.shape == (N_LAYERS * LAYER_ROWS + 8, PAR_COLS)
    return packed


# ------------------------- pure-JAX reference (check) ------------------------
def decoder_reference(x, memory, src_mask, tgt_mask, layers, norm_g, norm_b):
    def ln(v, g, b):
        mean = v.mean(-1, keepdims=True)
        diff = v - mean
        var = (diff * diff).sum(-1, keepdims=True) / (v.shape[-1] - 1)
        return g * diff / (jnp.sqrt(var) + EPS) + b

    def mha(q_in, kv_in, mask, wq, bq, wk, bk, wv, bv, wo, bo):
        Bq, Tq, D = q_in.shape
        Tk = kv_in.shape[1]
        q = (q_in @ wq + bq).reshape(Bq, Tq, N_HEADS, D_HEAD).transpose(0, 2, 1, 3)
        k = (kv_in @ wk + bk).reshape(Bq, Tk, N_HEADS, D_HEAD).transpose(0, 2, 1, 3)
        v = (kv_in @ wv + bv).reshape(Bq, Tk, N_HEADS, D_HEAD).transpose(0, 2, 1, 3)
        s = jnp.einsum("bhqd,bhkd->bhqk", q, k) / math.sqrt(D_HEAD)
        s = jnp.where(mask[:, None, :, :] == 0, NEG_INF, s)
        p = jax.nn.softmax(s, axis=-1)
        ctx = jnp.einsum("bhqk,bhkd->bhqd", p, v).transpose(0, 2, 1, 3)
        return ctx.reshape(Bq, Tq, D) @ wo + bo

    for p in layers:
        xn = ln(x, p["ln_g"][0], p["ln_b"][0])
        x = x + mha(xn, xn, tgt_mask, p["wq_self"], p["bq_self"], p["wk_self"],
                    p["bk_self"], p["wv_self"], p["bv_self"],
                    p["wo_self"], p["bo_self"])
        xn = ln(x, p["ln_g"][1], p["ln_b"][1])
        x = x + mha(xn, memory, src_mask, p["wq_src"], p["bq_src"], p["wk_src"],
                    p["bk_src"], p["wv_src"], p["bv_src"],
                    p["wo_src"], p["bo_src"])
        xn = ln(x, p["ln_g"][2], p["ln_b"][2])
        h1 = jnp.maximum(xn @ p["w1"] + p["b1"], 0.0)
        x = x + h1 @ p["w2"] + p["b2"]
    return ln(x, norm_g, norm_b)


# ------------------------------- main ----------------------------------------
@jax.jit
def run(x, memory, src_mask, tgt_mask, packed_params):
    return decoder_forward(x, memory, src_mask, tgt_mask, packed_params)


if __name__ == "__main__":
    B, T_TGT, T_SRC = 2, 8, 10
    key = jax.random.PRNGKey(0)
    k_x, k_m, k_p = jax.random.split(key, 3)

    x = jax.random.normal(k_x, (B, T_TGT, D_MODEL), jnp.float32)
    memory = jax.random.normal(k_m, (B, T_SRC, D_MODEL), jnp.float32)
    # src mask: all source positions visible ([B, 1, T_src])
    src_mask = jnp.ones((B, 1, T_SRC), jnp.int32)
    # tgt mask: subsequent (causal) mask ([1, T_tgt, T_tgt])
    tgt_mask = jnp.tril(jnp.ones((T_TGT, T_TGT), jnp.int32))[None, :, :]

    layer_keys = jax.random.split(k_p, N_LAYERS)
    layers = [init_layer_params(k) for k in layer_keys]
    norm_g = jnp.ones((D_MODEL,), jnp.float32)
    norm_b = jnp.zeros((D_MODEL,), jnp.float32)
    packed = pack_params(layers, norm_g, norm_b)

    out = run(x, memory, src_mask, tgt_mask, packed)
    jax.block_until_ready(out)

    assert out.shape == (B, T_TGT, D_MODEL) and out.dtype == jnp.float32
    assert bool(jnp.all(jnp.isfinite(out)))

    ref = decoder_reference(x, memory, src_mask, tgt_mask, layers, norm_g, norm_b)
    max_err = float(jnp.max(jnp.abs(out - ref)))
    assert max_err < 1e-2, f"mismatch vs reference: max abs err {max_err}"
    print("KERNEL_OK")
</pallas_src>

<mosaic_0001>
module attributes {stable_mosaic.version = 11 : i64} {
  func.func @kernel(%arg0: memref<36x32xf32, #tpu.memory_space<vmem>>, %arg1: memref<32x10xf32, #tpu.memory_space<vmem>>, %arg2: memref<488x96xf32, #tpu.memory_space<vmem>>, %arg3: memref<16x32xf32, #tpu.memory_space<vmem>>) attributes {dimension_semantics = [], scalar_prefetch = 0 : i64, scratch_operands = 0 : i64, tpu.core_type = #tpu.core_type<tc>} {
    %c0 = arith.constant 0 : index
    %c0_0 = arith.constant 0 : index
    %0 = vector.load %arg0[%c0, %c0_0] : memref<36x32xf32, #tpu.memory_space<vmem>>, vector<16x32xf32>
    %c16 = arith.constant 16 : index
    %c0_1 = arith.constant 0 : index
    %1 = vector.load %arg0[%c16, %c0_1] : memref<36x32xf32, #tpu.memory_space<vmem>>, vector<20x32xf32>
    %c0_2 = arith.constant 0 : index
    %c0_3 = arith.constant 0 : index
    %2 = vector.load %arg1[%c0_2, %c0_3] : memref<32x10xf32, #tpu.memory_space<vmem>>, vector<16x8xf32>
    %3 = vector.shape_cast %2 : vector<16x8xf32> to vector<2x8x8xf32>
    %c16_4 = arith.constant 16 : index
    %c0_5 = arith.constant 0 : index
    %4 = vector.load %arg1[%c16_4, %c0_5] : memref<32x10xf32, #tpu.memory_space<vmem>>, vector<16x10xf32>
    %5 = vector.shape_cast %4 : vector<16x10xf32> to vector<2x8x10xf32>
    %c0_6 = arith.constant 0 : index
    %c0_7 = arith.constant 0 : index
    %6 = vector.load %arg2[%c0_6, %c0_7] : memref<488x96xf32, #tpu.memory_space<vmem>>, vector<32x96xf32>
    %c32 = arith.constant 32 : index
    %c0_8 = arith.constant 0 : index
    %7 = vector.load %arg2[%c32, %c0_8] : memref<488x96xf32, #tpu.memory_space<vmem>>, vector<32x32xf32>
    %c64 = arith.constant 64 : index
    %c0_9 = arith.constant 0 : index
    %8 = vector.load %arg2[%c64, %c0_9] : memref<488x96xf32, #tpu.memory_space<vmem>>, vector<32x32xf32>
    %c96 = arith.constant 96 : index
    %c0_10 = arith.constant 0 : index
    %9 = vector.load %arg2[%c96, %c0_10] : memref<488x96xf32, #tpu.memory_space<vmem>>, vector<32x64xf32>
    %c128 = arith.constant 128 : index
    %c0_11 = arith.constant 0 : index
    %10 = vector.load %arg2[%c128, %c0_11] : memref<488x96xf32, #tpu.memory_space<vmem>>, vector<32x32xf32>
    %c160 = arith.constant 160 : index
    %c0_12 = arith.constant 0 : index
    %11 = vector.load %arg2[%c160, %c0_12] : memref<488x96xf32, #tpu.memory_space<vmem>>, vector<32x64xf32>
    %c192 = arith.constant 192 : index
    %c0_13 = arith.constant 0 : index
    %12 = vector.load %arg2[%c192, %c0_13] : memref<488x96xf32, #tpu.memory_space<vmem>>, vector<32x64xf32>
    %c224 = arith.constant 224 : index
    %c0_14 = arith.constant 0 : index
    %13 = vector.load %arg2[%c224, %c0_14] : memref<488x96xf32, #tpu.memory_space<vmem>>, vector<1x96xf32>
    %c225 = arith.constant 225 : index
    %c0_15 = arith.constant 0 : index
    %14 = vector.load %arg2[%c225, %c0_15] : memref<488x96xf32, #tpu.memory_space<vmem>>, vector<1x32xf32>
    %c226 = arith.constant 226 : index
    %c0_16 = arith.constant 0 : index
    %15 = vector.load %arg2[%c226, %c0_16] : memref<488x96xf32, #tpu.memory_space<vmem>>, vector<1x32xf32>
    %c227 = arith.constant 227 : index
    %c0_17 = arith.constant 0 : index
    %16 = vector.load %arg2[%c227, %c0_17] : memref<488x96xf32, #tpu.memory_space<vmem>>, vector<1x64xf32>
    %c228 = arith.constant 228 : index
    %c0_18 = arith.constant 0 : index
    %17 = vector.load %arg2[%c228, %c0_18] : memref<488x96xf32, #tpu.memory_space<vmem>>, vector<1x32xf32>
    %c229 = arith.constant 229 : index
    %c0_19 = arith.constant 0 : index
    %18 = vector.load %arg2[%c229, %c0_19] : memref<488x96xf32, #tpu.memory_space<vmem>>, vector<1x64xf32>
    %c230 = arith.constant 230 : index
    %c0_20 = arith.constant 0 : index
    %19 = vector.load %arg2[%c230, %c0_20] : memref<488x96xf32, #tpu.memory_space<vmem>>, vector<1x32xf32>
    %c232 = arith.constant 232 : index
    %c0_21 = arith.constant 0 : index
    %20 = vector.load %arg2[%c232, %c0_21] : memref<488x96xf32, #tpu.memory_space<vmem>>, vector<1x32xf32>
    %c233 = arith.constant 233 : index
    %c0_22 = arith.constant 0 : index
    %21 = vector.load %arg2[%c233, %c0_22] : memref<488x96xf32, #tpu.memory_space<vmem>>, vector<1x32xf32>
    %cst = arith.constant dense<0.000000e+00> : vector<16xf32>
    %22 = vector.multi_reduction <add>, %0, %cst [1] : vector<16x32xf32> to vector<16xf32>
    %23 = vector.shape_cast %22 : vector<16xf32> to vector<16x1xf32>
    %cst_23 = arith.constant 3.200000e+01 : f32
    %24 = vector.broadcast %cst_23 : f32 to vector<16x1xf32>
    %25 = arith.divf %23, %24 : vector<16x1xf32>
    %26 = vector.broadcast %25 : vector<16x1xf32> to vector<16x32xf32>
    %27 = arith.subf %0, %26 : vector<16x32xf32>
    %28 = arith.mulf %27, %27 : vector<16x32xf32>
    %cst_24 = arith.constant dense<0.000000e+00> : vector<16xf32>
    %29 = vector.multi_reduction <add>, %28, %cst_24 [1] : vector<16x32xf32> to vector<16xf32>
    %30 = vector.shape_cast %29 : vector<16xf32> to vector<16x1xf32>
    %cst_25 = arith.constant 0.0322580636 : f32
    %31 = vector.broadcast %cst_25 : f32 to vector<16x1xf32>
    %32 = arith.mulf %30, %31 : vector<16x1xf32>
    %33 = math.sqrt %32 : vector<16x1xf32>
    %cst_26 = arith.constant 9.99999997E-7 : f32
    %34 = vector.broadcast %cst_26 : f32 to vector<16x1xf32>
    %35 = arith.addf %33, %34 : vector<16x1xf32>
    %36 = tpu.reciprocal %35 : vector<16x1xf32> -> vector<16x1xf32>
    %37 = vector.broadcast %36 : vector<16x1xf32> to vector<16x32xf32>
    %38 = arith.mulf %27, %37 : vector<16x32xf32>
    %39 = vector.broadcast %20 : vector<1x32xf32> to vector<16x32xf32>
    %40 = arith.mulf %39, %38 : vector<16x32xf32>
    %41 = vector.broadcast %21 : vector<1x32xf32> to vector<16x32xf32>
    %42 = arith.addf %40, %41 : vector<16x32xf32>
    %cst_27 = arith.constant dense<0.000000e+00> : vector<16x96xf32>
    %43 = tpu.matmul %42, %6, %cst_27 {dimension_numbers = #tpu.dot_dimension_numbers<[1], [0], [0], [1], [0, 0, 1, 1], [], []>} : vector<16x32xf32>, vector<32x96xf32>, vector<16x96xf32> -> vector<16x96xf32>
    %44 = vector.broadcast %13 : vector<1x96xf32> to vector<16x96xf32>
    %45 = arith.addf %43, %44 : vector<16x96xf32>
    %46 = vector.extract_strided_slice %45 {offsets = [0, 0], sizes = [16, 32], strides = [1, 1]} : vector<16x96xf32> to vector<16x32xf32>
    %47 = vector.extract_strided_slice %45 {offsets = [0, 32], sizes = [16, 32], strides = [1, 1]} : vector<16x96xf32> to vector<16x32xf32>
    %48 = vector.shape_cast %47 : vector<16x32xf32> to vector<2x8x32xf32>
    %49 = vector.extract_strided_slice %45 {offsets = [0, 64], sizes = [16, 32], strides = [1, 1]} : vector<16x96xf32> to vector<16x32xf32>
    %50 = vector.shape_cast %49 : vector<16x32xf32> to vector<2x8x32xf32>
    %51 = vector.shape_cast %46 : vector<16x32xf32> to vector<2x8x32xf32>
    %52 = vector.extract_strided_slice %51 {offsets = [0, 0, 0], sizes = [2, 8, 8], strides = [1, 1, 1]} : vector<2x8x32xf32> to vector<2x8x8xf32>
    %53 = vector.extract_strided_slice %48 {offsets = [0, 0, 0], sizes = [2, 8, 8], strides = [1, 1, 1]} : vector<2x8x32xf32> to vector<2x8x8xf32>
    %54 = vector.extract_strided_slice %50 {offsets = [0, 0, 0], sizes = [2, 8, 8], strides = [1, 1, 1]} : vector<2x8x32xf32> to vector<2x8x8xf32>
    "tpu.trace_start"() <{level = 10 : i32, message = "bqd,bkd->bqk"}> : () -> ()
    %cst_28 = arith.constant dense<0.000000e+00> : vector<2x8x8xf32>
    %55 = tpu.matmul %52, %53, %cst_28 {dimension_numbers = #tpu.dot_dimension_numbers<[2], [2], [1], [1], [0, 0, 0, 1, 1, 1], [0], [0]>} : vector<2x8x8xf32>, vector<2x8x8xf32>, vector<2x8x8xf32> -> vector<2x8x8xf32>
    "tpu.trace_stop"() : () -> ()
    %56 = arith.addf %55, %3 : vector<2x8x8xf32>
    %cst_29 = arith.constant dense<0xFF800000> : vector<2x8xf32>
    %57 = vector.multi_reduction <maximumf>, %56, %cst_29 [2] : vector<2x8x8xf32> to vector<2x8xf32>
    %58 = vector.shape_cast %57 : vector<2x8xf32> to vector<2x8x1xf32>
    %59 = vector.broadcast %58 : vector<2x8x1xf32> to vector<2x8x8xf32>
    %60 = arith.subf %56, %59 : vector<2x8x8xf32>
    %61 = math.exp %60 : vector<2x8x8xf32>
    %cst_30 = arith.constant dense<0.000000e+00> : vector<2x8xf32>
    %62 = vector.multi_reduction <add>, %61, %cst_30 [2] : vector<2x8x8xf32> to vector<2x8xf32>
    %63 = vector.shape_cast %62 : vector<2x8xf32> to vector<2x8x1xf32>
    %64 = tpu.reciprocal %63 {approx = true} : vector<2x8x1xf32> -> vector<2x8x1xf32>
    %65 = vector.broadcast %64 : vector<2x8x1xf32> to vector<2x8x8xf32>
    %66 = arith.mulf %61, %65 : vector<2x8x8xf32>
    "tpu.trace_start"() <{level = 10 : i32, message = "bqk,bkd->bqd"}> : () -> ()
    %cst_31 = arith.constant dense<0.000000e+00> : vector<2x8x8xf32>
    %67 = tpu.matmul %66, %54, %cst_31 {dimension_numbers = #tpu.dot_dimension_numbers<[2], [1], [1], [2], [0, 0, 0, 1, 1, 2], [0], [0]>} : vector<2x8x8xf32>, vector<2x8x8xf32>, vector<2x8x8xf32> -> vector<2x8x8xf32>
    "tpu.trace_stop"() : () -> ()
    %68 = vector.extract_strided_slice %51 {offsets = [0, 0, 8], sizes = [2, 8, 8], strides = [1, 1, 1]} : vector<2x8x32xf32> to vector<2x8x8xf32>
    %69 = vector.extract_strided_slice %48 {offsets = [0, 0, 8], sizes = [2, 8, 8], strides = [1, 1, 1]} : vector<2x8x32xf32> to vector<2x8x8xf32>
    %70 = vector.extract_strided_slice %50 {offsets = [0, 0, 8], sizes = [2, 8, 8], strides = [1, 1, 1]} : vector<2x8x32xf32> to vector<2x8x8xf32>
    "tpu.trace_start"() <{level = 10 : i32, message = "bqd,bkd->bqk"}> : () -> ()
    %cst_32 = arith.constant dense<0.000000e+00> : vector<2x8x8xf32>
    %71 = tpu.matmul %68, %69, %cst_32 {dimension_numbers = #tpu.dot_dimension_numbers<[2], [2], [1], [1], [0, 0, 0, 1, 1, 1], [0], [0]>} : vector<2x8x8xf32>, vector<2x8x8xf32>, vector<2x8x8xf32> -> vector<2x8x8xf32>
    "tpu.trace_stop"() : () -> ()
    %72 = arith.addf %71, %3 : vector<2x8x8xf32>
    %cst_33 = arith.constant dense<0xFF800000> : vector<2x8xf32>
    %73 = vector.multi_reduction <maximumf>, %72, %cst_33 [2] : vector<2x8x8xf32> to vector<2x8xf32>
    %74 = vector.shape_cast %73 : vector<2x8xf32> to vector<2x8x1xf32>
    %75 = vector.broadcast %74 : vector<2x8x1xf32> to vector<2x8x8xf32>
    %76 = arith.subf %72, %75 : vector<2x8x8xf32>
    %77 = math.exp %76 : vector<2x8x8xf32>
    %cst_34 = arith.constant dense<0.000000e+00> : vector<2x8xf32>
    %78 = vector.multi_reduction <add>, %77, %cst_34 [2] : vector<2x8x8xf32> to vector<2x8xf32>
    %79 = vector.shape_cast %78 : vector<2x8xf32> to vector<2x8x1xf32>
    %80 = tpu.reciprocal %79 {approx = true} : vector<2x8x1xf32> -> vector<2x8x1xf32>
    %81 = vector.broadcast %80 : vector<2x8x1xf32> to vector<2x8x8xf32>
    %82 = arith.mulf %77, %81 : vector<2x8x8xf32>
    "tpu.trace_start"() <{level = 10 : i32, message = "bqk,bkd->bqd"}> : () -> ()
    %cst_35 = arith.constant dense<0.000000e+00> : vector<2x8x8xf32>
    %83 = tpu.matmul %82, %70, %cst_35 {dimension_numbers = #tpu.dot_dimension_numbers<[2], [1], [1], [2], [0, 0, 0, 1, 1, 2], [0], [0]>} : vector<2x8x8xf32>, vector<2x8x8xf32>, vector<2x8x8xf32> -> vector<2x8x8xf32>
    "tpu.trace_stop"() : () -> ()
    %84 = vector.extract_strided_slice %51 {offsets = [0, 0, 16], sizes = [2, 8, 8], strides = [1, 1, 1]} : vector<2x8x32xf32> to vector<2x8x8xf32>
    %85 = vector.extract_strided_slice %48 {offsets = [0, 0, 16], sizes = [2, 8, 8], strides = [1, 1, 1]} : vector<2x8x32xf32> to vector<2x8x8xf32>
    %86 = vector.extract_strided_slice %50 {offsets = [0, 0, 16], sizes = [2, 8, 8], strides = [1, 1, 1]} : vector<2x8x32xf32> to vector<2x8x8xf32>
    "tpu.trace_start"() <{level = 10 : i32, message = "bqd,bkd->bqk"}> : () -> ()
    %cst_36 = arith.constant dense<0.000000e+00> : vector<2x8x8xf32>
    %87 = tpu.matmul %84, %85, %cst_36 {dimension_numbers = #tpu.dot_dimension_numbers<[2], [2], [1], [1], [0, 0, 0, 1, 1, 1], [0], [0]>} : vector<2x8x8xf32>, vector<2x8x8xf32>, vector<2x8x8xf32> -> vector<2x8x8xf32>
    "tpu.trace_stop"() : () -> ()
    %88 = arith.addf %87, %3 : vector<2x8x8xf32>
    %cst_37 = arith.constant dense<0xFF800000> : vector<2x8xf32>
    %89 = vector.multi_reduction <maximumf>, %88, %cst_37 [2] : vector<2x8x8xf32> to vector<2x8xf32>
    %90 = vector.shape_cast %89 : vector<2x8xf32> to vector<2x8x1xf32>
    %91 = vector.broadcast %90 : vector<2x8x1xf32> to vector<2x8x8xf32>
    %92 = arith.subf %88, %91 : vector<2x8x8xf32>
    %93 = math.exp %92 : vector<2x8x8xf32>
    %cst_38 = arith.constant dense<0.000000e+00> : vector<2x8xf32>
    %94 = vector.multi_reduction <add>, %93, %cst_38 [2] : vector<2x8x8xf32> to vector<2x8xf32>
    %95 = vector.shape_cast %94 : vector<2x8xf32> to vector<2x8x1xf32>
    %96 = tpu.reciprocal %95 {approx = true} : vector<2x8x1xf32> -> vector<2x8x1xf32>
    %97 = vector.broadcast %96 : vector<2x8x1xf32> to vector<2x8x8xf32>
    %98 = arith.mulf %93, %97 : vector<2x8x8xf32>
    "tpu.trace_start"() <{level = 10 : i32, message = "bqk,bkd->bqd"}> : () -> ()
    %cst_39 = arith.constant dense<0.000000e+00> : vector<2x8x8xf32>
    %99 = tpu.matmul %98, %86, %cst_39 {dimension_numbers = #tpu.dot_dimension_numbers<[2], [1], [1], [2], [0, 0, 0, 1, 1, 2], [0], [0]>} : vector<2x8x8xf32>, vector<2x8x8xf32>, vector<2x8x8xf32> -> vector<2x8x8xf32>
    "tpu.trace_stop"() : () -> ()
    %100 = vector.extract_strided_slice %51 {offsets = [0, 0, 24], sizes = [2, 8, 8], strides = [1, 1, 1]} : vector<2x8x32xf32> to vector<2x8x8xf32>
    %101 = vector.extract_strided_slice %48 {offsets = [0, 0, 24], sizes = [2, 8, 8], strides = [1, 1, 1]} : vector<2x8x32xf32> to vector<2x8x8xf32>
    %102 = vector.extract_strided_slice %50 {offsets = [0, 0, 24], sizes = [2, 8, 8], strides = [1, 1, 1]} : vector<2x8x32xf32> to vector<2x8x8xf32>
    "tpu.trace_start"() <{level = 10 : i32, message = "bqd,bkd->bqk"}> : () -> ()
    %cst_40 = arith.constant dense<0.000000e+00> : vector<2x8x8xf32>
    %103 = tpu.matmul %100, %101, %cst_40 {dimension_numbers = #tpu.dot_dimension_numbers<[2], [2], [1], [1], [0, 0, 0, 1, 1, 1], [0], [0]>} : vector<2x8x8xf32>, vector<2x8x8xf32>, vector<2x8x8xf32> -> vector<2x8x8xf32>
    "tpu.trace_stop"() : () -> ()
    %104 = arith.addf %103, %3 : vector<2x8x8xf32>
    %cst_41 = arith.constant dense<0xFF800000> : vector<2x8xf32>
    %105 = vector.multi_reduction <maximumf>, %104, %cst_41 [2] : vector<2x8x8xf32> to vector<2x8xf32>
    %106 = vector.shape_cast %105 : vector<2x8xf32> to vector<2x8x1xf32>
    %107 = vector.broadcast %106 : vector<2x8x1xf32> to vector<2x8x8xf32>
    %108 = arith.subf %104, %107 : vector<2x8x8xf32>
    %109 = math.exp %108 : vector<2x8x8xf32>
    %cst_42 = arith.constant dense<0.000000e+00> : vector<2x8xf32>
    %110 = vector.multi_reduction <add>, %109, %cst_42 [2] : vector<2x8x8xf32> to vector<2x8xf32>
    %111 = vector.shape_cast %110 : vector<2x8xf32> to vector<2x8x1xf32>
    %112 = tpu.reciprocal %111 {approx = true} : vector<2x8x1xf32> -> vector<2x8x1xf32>
    %113 = vector.broadcast %112 : vector<2x8x1xf32> to vector<2x8x8xf32>
    %114 = arith.mulf %109, %113 : vector<2x8x8xf32>
    "tpu.trace_start"() <{level = 10 : i32, message = "bqk,bkd->bqd"}> : () -> ()
    %cst_43 = arith.constant dense<0.000000e+00> : vector<2x8x8xf32>
    %115 = tpu.matmul %114, %102, %cst_43 {dimension_numbers = #tpu.dot_dimension_numbers<[2], [1], [1], [2], [0, 0, 0, 1, 1, 2], [0], [0]>} : vector<2x8x8xf32>, vector<2x8x8xf32>, vector<2x8x8xf32> -> vector<2x8x8xf32>
    "tpu.trace_stop"() : () -> ()
    %116 = tpu.concatenate %67, %83, %99, %115 in 2 : vector<2x8x8xf32>, vector<2x8x8xf32>, vector<2x8x8xf32>, vector<2x8x8xf32> -> vector<2x8x32xf32>
    %117 = vector.shape_cast %116 : vector<2x8x32xf32> to vector<16x32xf32>
    %cst_44 = arith.constant dense<0.000000e+00> : vector<16x32xf32>
    %118 = tpu.matmul %117, %7, %cst_44 {dimension_numbers = #tpu.dot_dimension_numbers<[1], [0], [0], [1], [0, 0, 1, 1], [], []>} : vector<16x32xf32>, vector<32x32xf32>, vector<16x32xf32> -> vector<16x32xf32>
    %119 = arith.addf %0, %118 : vector<16x32xf32>
    %120 = vector.broadcast %14 : vector<1x32xf32> to vector<16x32xf32>
    %121 = arith.addf %119, %120 : vector<16x32xf32>
    %c234 = arith.constant 234 : index
    %c0_45 = arith.constant 0 : index
    %122 = vector.load %arg2[%c234, %c0_45] : memref<488x96xf32, #tpu.memory_space<vmem>>, vector<1x32xf32>
    %c235 = arith.constant 235 : index
    %c0_46 = arith.constant 0 : index
    %123 = vector.load %arg2[%c235, %c0_46] : memref<488x96xf32, #tpu.memory_space<vmem>>, vector<1x32xf32>
    %cst_47 = arith.constant dense<0.000000e+00> : vector<16xf32>
    %124 = vector.multi_reduction <add>, %121, %cst_47 [1] : vector<16x32xf32> to vector<16xf32>
    %125 = vector.shape_cast %124 : vector<16xf32> to vector<16x1xf32>
    %cst_48 = arith.constant 3.200000e+01 : f32
    %126 = vector.broadcast %cst_48 : f32 to vector<16x1xf32>
    %127 = arith.divf %125, %126 : vector<16x1xf32>
    %128 = vector.broadcast %127 : vector<16x1xf32> to vector<16x32xf32>
    %129 = arith.subf %121, %128 : vector<16x32xf32>
    %130 = arith.mulf %129, %129 : vector<16x32xf32>
    %cst_49 = arith.constant dense<0.000000e+00> : vector<16xf32>
    %131 = vector.multi_reduction <add>, %130, %cst_49 [1] : vector<16x32xf32> to vector<16xf32>
    %132 = vector.shape_cast %131 : vector<16xf32> to vector<16x1xf32>
    %cst_50 = arith.constant 0.0322580636 : f32
    %133 = vector.broadcast %cst_50 : f32 to vector<16x1xf32>
    %134 = arith.mulf %132, %133 : vector<16x1xf32>
    %135 = math.sqrt %134 : vector<16x1xf32>
    %cst_51 = arith.constant 9.99999997E-7 : f32
    %136 = vector.broadcast %cst_51 : f32 to vector<16x1xf32>
    %137 = arith.addf %135, %136 : vector<16x1xf32>
    %138 = tpu.reciprocal %137 : vector<16x1xf32> -> vector<16x1xf32>
    %139 = vector.broadcast %138 : vector<16x1xf32> to vector<16x32xf32>
    %140 = arith.mulf %129, %139 : vector<16x32xf32>
    %141 = vector.broadcast %122 : vector<1x32xf32> to vector<16x32xf32>
    %142 = arith.mulf %141, %140 : vector<16x32xf32>
    %143 = vector.broadcast %123 : vector<1x32xf32> to vector<16x32xf32>
    %144 = arith.addf %142, %143 : vector<16x32xf32>
    %cst_52 = arith.constant dense<0.000000e+00> : vector<16x32xf32>
    %145 = tpu.matmul %144, %8, %cst_52 {dimension_numbers = #tpu.dot_dimension_numbers<[1], [0], [0], [1], [0, 0, 1, 1], [], []>} : vector<16x32xf32>, vector<32x32xf32>, vector<16x32xf32> -> vector<16x32xf32>
    %146 = vector.broadcast %15 : vector<1x32xf32> to vector<16x32xf32>
    %147 = arith.addf %145, %146 : vector<16x32xf32>
    %cst_53 = arith.constant dense<0.000000e+00> : vector<20x64xf32>
    %148 = tpu.matmul %1, %9, %cst_53 {dimension_numbers = #tpu.dot_dimension_numbers<[1], [0], [0], [1], [0, 0, 1, 1], [], []>} : vector<20x32xf32>, vector<32x64xf32>, vector<20x64xf32> -> vector<20x64xf32>
    %149 = vector.broadcast %16 : vector<1x64xf32> to vector<20x64xf32>
    %150 = arith.addf %148, %149 : vector<20x64xf32>
    %151 = vector.extract_strided_slice %150 {offsets = [0, 0], sizes = [20, 32], strides = [1, 1]} : vector<20x64xf32> to vector<20x32xf32>
    %152 = vector.shape_cast %151 : vector<20x32xf32> to vector<2x10x32xf32>
    %153 = vector.extract_strided_slice %150 {offsets = [0, 32], sizes = [20, 32], strides = [1, 1]} : vector<20x64xf32> to vector<20x32xf32>
    %154 = vector.shape_cast %153 : vector<20x32xf32> to vector<2x10x32xf32>
    %155 = vector.shape_cast %147 : vector<16x32xf32> to vector<2x8x32xf32>
    %156 = vector.extract_strided_slice %155 {offsets = [0, 0, 0], sizes = [2, 8, 8], strides = [1, 1, 1]} : vector<2x8x32xf32> to vector<2x8x8xf32>
    %157 = vector.extract_strided_slice %152 {offsets = [0, 0, 0], sizes = [2, 10, 8], strides = [1, 1, 1]} : vector<2x10x32xf32> to vector<2x10x8xf32>
    %158 = vector.extract_strided_slice %154 {offsets = [0, 0, 0], sizes = [2, 10, 8], strides = [1, 1, 1]} : vector<2x10x32xf32> to vector<2x10x8xf32>
    "tpu.trace_start"() <{level = 10 : i32, message = "bqd,bkd->bqk"}> : () -> ()
    %cst_54 = arith.constant dense<0.000000e+00> : vector<2x8x10xf32>
    %159 = tpu.matmul %156, %157, %cst_54 {dimension_numbers = #tpu.dot_dimension_numbers<[2], [2], [1], [1], [0, 0, 0, 1, 1, 1], [0], [0]>} : vector<2x8x8xf32>, vector<2x10x8xf32>, vector<2x8x10xf32> -> vector<2x8x10xf32>
    "tpu.trace_stop"() : () -> ()
    %160 = arith.addf %159, %5 : vector<2x8x10xf32>
    %cst_55 = arith.constant dense<0xFF800000> : vector<2x8xf32>
    %161 = vector.multi_reduction <maximumf>, %160, %cst_55 [2] : vector<2x8x10xf32> to vector<2x8xf32>
    %162 = vector.shape_cast %161 : vector<2x8xf32> to vector<2x8x1xf32>
    %163 = vector.broadcast %162 : vector<2x8x1xf32> to vector<2x8x10xf32>
    %164 = arith.subf %160, %163 : vector<2x8x10xf32>
    %165 = math.exp %164 : vector<2x8x10xf32>
    %cst_56 = arith.constant dense<0.000000e+00> : vector<2x8xf32>
    %166 = vector.multi_reduction <add>, %165, %cst_56 [2] : vector<2x8x10xf32> to vector<2x8xf32>
    %167 = vector.shape_cast %166 : vector<2x8xf32> to vector<2x8x1xf32>
    %168 = tpu.reciprocal %167 {approx = true} : vector<2x8x1xf32> -> vector<2x8x1xf32>
    %169 = vector.broadcast %168 : vector<2x8x1xf32> to vector<2x8x10xf32>
    %170 = arith.mulf %165, %169 : vector<2x8x10xf32>
    "tpu.trace_start"() <{level = 10 : i32, message = "bqk,bkd->bqd"}> : () -> ()
    %cst_57 = arith.constant dense<0.000000e+00> : vector<2x8x8xf32>
    %171 = tpu.matmul %170, %158, %cst_57 {dimension_numbers = #tpu.dot_dimension_numbers<[2], [1], [1], [2], [0, 0, 0, 1, 1, 2], [0], [0]>} : vector<2x8x10xf32>, vector<2x10x8xf32>, vector<2x8x8xf32> -> vector<2x8x8xf32>
    "tpu.trace_stop"() : () -> ()
    %172 = vector.extract_strided_slice %155 {offsets = [0, 0, 8], sizes = [2, 8, 8], strides = [1, 1, 1]} : vector<2x8x32xf32> to vector<2x8x8xf32>
    %173 = vector.extract_strided_slice %152 {offsets = [0, 0, 8], sizes = [2, 10, 8], strides = [1, 1, 1]} : vector<2x10x32xf32> to vector<2x10x8xf32>
    %174 = vector.extract_strided_slice %154 {offsets = [0, 0, 8], sizes = [2, 10, 8], strides = [1, 1, 1]} : vector<2x10x32xf32> to vector<2x10x8xf32>
    "tpu.trace_start"() <{level = 10 : i32, message = "bqd,bkd->bqk"}> : () -> ()
    %cst_58 = arith.constant dense<0.000000e+00> : vector<2x8x10xf32>
    %175 = tpu.matmul %172, %173, %cst_58 {dimension_numbers = #tpu.dot_dimension_numbers<[2], [2], [1], [1], [0, 0, 0, 1, 1, 1], [0], [0]>} : vector<2x8x8xf32>, vector<2x10x8xf32>, vector<2x8x10xf32> -> vector<2x8x10xf32>
    "tpu.trace_stop"() : () -> ()
    %176 = arith.addf %175, %5 : vector<2x8x10xf32>
    %cst_59 = arith.constant dense<0xFF800000> : vector<2x8xf32>
    %177 = vector.multi_reduction <maximumf>, %176, %cst_59 [2] : vector<2x8x10xf32> to vector<2x8xf32>
    %178 = vector.shape_cast %177 : vector<2x8xf32> to vector<2x8x1xf32>
    %179 = vector.broadcast %178 : vector<2x8x1xf32> to vector<2x8x10xf32>
    %180 = arith.subf %176, %179 : vector<2x8x10xf32>
    %181 = math.exp %180 : vector<2x8x10xf32>
    %cst_60 = arith.constant dense<0.000000e+00> : vector<2x8xf32>
    %182 = vector.multi_reduction <add>, %181, %cst_60 [2] : vector<2x8x10xf32> to vector<2x8xf32>
    %183 = vector.shape_cast %182 : vector<2x8xf32> to vector<2x8x1xf32>
    %184 = tpu.reciprocal %183 {approx = true} : vector<2x8x1xf32> -> vector<2x8x1xf32>
    %185 = vector.broadcast %184 : vector<2x8x1xf32> to vector<2x8x10xf32>
    %186 = arith.mulf %181, %185 : vector<2x8x10xf32>
    "tpu.trace_start"() <{level = 10 : i32, message = "bqk,bkd->bqd"}> : () -> ()
    %cst_61 = arith.constant dense<0.000000e+00> : vector<2x8x8xf32>
    %187 = tpu.matmul %186, %174, %cst_61 {dimension_numbers = #tpu.dot_dimension_numbers<[2], [1], [1], [2], [0, 0, 0, 1, 1, 2], [0], [0]>} : vector<2x8x10xf32>, vector<2x10x8xf32>, vector<2x8x8xf32> -> vector<2x8x8xf32>
    "tpu.trace_stop"() : () -> ()
    %188 = vector.extract_strided_slice %155 {offsets = [0, 0, 16], sizes = [2, 8, 8], strides = [1, 1, 1]} : vector<2x8x32xf32> to vector<2x8x8xf32>
    %189 = vector.extract_strided_slice %152 {offsets = [0, 0, 16], sizes = [2, 10, 8], strides = [1, 1, 1]} : vector<2x10x32xf32> to vector<2x10x8xf32>
    %190 = vector.extract_strided_slice %154 {offsets = [0, 0, 16], sizes = [2, 10, 8], strides = [1, 1, 1]} : vector<2x10x32xf32> to vector<2x10x8xf32>
    "tpu.trace_start"() <{level = 10 : i32, message = "bqd,bkd->bqk"}> : () -> ()
    %cst_62 = arith.constant dense<0.000000e+00> : vector<2x8x10xf32>
    %191 = tpu.matmul %188, %189, %cst_62 {dimension_numbers = #tpu.dot_dimension_numbers<[2], [2], [1], [1], [0, 0, 0, 1, 1, 1], [0], [0]>} : vector<2x8x8xf32>, vector<2x10x8xf32>, vector<2x8x10xf32> -> vector<2x8x10xf32>
    "tpu.trace_stop"() : () -> ()
    %192 = arith.addf %191, %5 : vector<2x8x10xf32>
    %cst_63 = arith.constant dense<0xFF800000> : vector<2x8xf32>
    %193 = vector.multi_reduction <maximumf>, %192, %cst_63 [2] : vector<2x8x10xf32> to vector<2x8xf32>
    %194 = vector.shape_cast %193 : vector<2x8xf32> to vector<2x8x1xf32>
    %195 = vector.broadcast %194 : vector<2x8x1xf32> to vector<2x8x10xf32>
    %196 = arith.subf %192, %195 : vector<2x8x10xf32>
    %197 = math.exp %196 : vector<2x8x10xf32>
    %cst_64 = arith.constant dense<0.000000e+00> : vector<2x8xf32>
    %198 = vector.multi_reduction <add>, %197, %cst_64 [2] : vector<2x8x10xf32> to vector<2x8xf32>
    %199 = vector.shape_cast %198 : vector<2x8xf32> to vector<2x8x1xf32>
    %200 = tpu.reciprocal %199 {approx = true} : vector<2x8x1xf32> -> vector<2x8x1xf32>
    %201 = vector.broadcast %200 : vector<2x8x1xf32> to vector<2x8x10xf32>
    %202 = arith.mulf %197, %201 : vector<2x8x10xf32>
    "tpu.trace_start"() <{level = 10 : i32, message = "bqk,bkd->bqd"}> : () -> ()
    %cst_65 = arith.constant dense<0.000000e+00> : vector<2x8x8xf32>
    %203 = tpu.matmul %202, %190, %cst_65 {dimension_numbers = #tpu.dot_dimension_numbers<[2], [1], [1], [2], [0, 0, 0, 1, 1, 2], [0], [0]>} : vector<2x8x10xf32>, vector<2x10x8xf32>, vector<2x8x8xf32> -> vector<2x8x8xf32>
    "tpu.trace_stop"() : () -> ()
    %204 = vector.extract_strided_slice %155 {offsets = [0, 0, 24], sizes = [2, 8, 8], strides = [1, 1, 1]} : vector<2x8x32xf32> to vector<2x8x8xf32>
    %205 = vector.extract_strided_slice %152 {offsets = [0, 0, 24], sizes = [2, 10, 8], strides = [1, 1, 1]} : vector<2x10x32xf32> to vector<2x10x8xf32>
    %206 = vector.extract_strided_slice %154 {offsets = [0, 0, 24], sizes = [2, 10, 8], strides = [1, 1, 1]} : vector<2x10x32xf32> to vector<2x10x8xf32>
    "tpu.trace_start"() <{level = 10 : i32, message = "bqd,bkd->bqk"}> : () -> ()
    %cst_66 = arith.constant dense<0.000000e+00> : vector<2x8x10xf32>
    %207 = tpu.matmul %204, %205, %cst_66 {dimension_numbers = #tpu.dot_dimension_numbers<[2], [2], [1], [1], [0, 0, 0, 1, 1, 1], [0], [0]>} : vector<2x8x8xf32>, vector<2x10x8xf32>, vector<2x8x10xf32> -> vector<2x8x10xf32>
    "tpu.trace_stop"() : () -> ()
    %208 = arith.addf %207, %5 : vector<2x8x10xf32>
    %cst_67 = arith.constant dense<0xFF800000> : vector<2x8xf32>
    %209 = vector.multi_reduction <maximumf>, %208, %cst_67 [2] : vector<2x8x10xf32> to vector<2x8xf32>
    %210 = vector.shape_cast %209 : vector<2x8xf32> to vector<2x8x1xf32>
    %211 = vector.broadcast %210 : vector<2x8x1xf32> to vector<2x8x10xf32>
    %212 = arith.subf %208, %211 : vector<2x8x10xf32>
    %213 = math.exp %212 : vector<2x8x10xf32>
    %cst_68 = arith.constant dense<0.000000e+00> : vector<2x8xf32>
    %214 = vector.multi_reduction <add>, %213, %cst_68 [2] : vector<2x8x10xf32> to vector<2x8xf32>
    %215 = vector.shape_cast %214 : vector<2x8xf32> to vector<2x8x1xf32>
    %216 = tpu.reciprocal %215 {approx = true} : vector<2x8x1xf32> -> vector<2x8x1xf32>
    %217 = vector.broadcast %216 : vector<2x8x1xf32> to vector<2x8x10xf32>
    %218 = arith.mulf %213, %217 : vector<2x8x10xf32>
    "tpu.trace_start"() <{level = 10 : i32, message = "bqk,bkd->bqd"}> : () -> ()
    %cst_69 = arith.constant dense<0.000000e+00> : vector<2x8x8xf32>
    %219 = tpu.matmul %218, %206, %cst_69 {dimension_numbers = #tpu.dot_dimension_numbers<[2], [1], [1], [2], [0, 0, 0, 1, 1, 2], [0], [0]>} : vector<2x8x10xf32>, vector<2x10x8xf32>, vector<2x8x8xf32> -> vector<2x8x8xf32>
    "tpu.trace_stop"() : () -> ()
    %220 = tpu.concatenate %171, %187, %203, %219 in 2 : vector<2x8x8xf32>, vector<2x8x8xf32>, vector<2x8x8xf32>, vector<2x8x8xf32> -> vector<2x8x32xf32>
    %221 = vector.shape_cast %220 : vector<2x8x32xf32> to vector<16x32xf32>
    %cst_70 = arith.constant dense<0.000000e+00> : vector<16x32xf32>
    %222 = tpu.matmul %221, %10, %cst_70 {dimension_numbers = #tpu.dot_dimension_numbers<[1], [0], [0], [1], [0, 0, 1, 1], [], []>} : vector<16x32xf32>, vector<32x32xf32>, vector<16x32xf32> -> vector<16x32xf32>
    %223 = arith.addf %121, %222 : vector<16x32xf32>
    %224 = vector.broadcast %17 : vector<1x32xf32> to vector<16x32xf32>
    %225 = arith.addf %223, %224 : vector<16x32xf32>
    %c236 = arith.constant 236 : index
    %c0_71 = arith.constant 0 : index
    %226 = vector.load %arg2[%c236, %c0_71] : memref<488x96xf32, #tpu.memory_space<vmem>>, vector<1x32xf32>
    %c237 = arith.constant 237 : index
    %c0_72 = arith.constant 0 : index
    %227 = vector.load %arg2[%c237, %c0_72] : memref<488x96xf32, #tpu.memory_space<vmem>>, vector<1x32xf32>
    %cst_73 = arith.constant dense<0.000000e+00> : vector<16xf32>
    %228 = vector.multi_reduction <add>, %225, %cst_73 [1] : vector<16x32xf32> to vector<16xf32>
    %229 = vector.shape_cast %228 : vector<16xf32> to vector<16x1xf32>
    %cst_74 = arith.constant 3.200000e+01 : f32
    %230 = vector.broadcast %cst_74 : f32 to vector<16x1xf32>
    %231 = arith.divf %229, %230 : vector<16x1xf32>
    %232 = vector.broadcast %231 : vector<16x1xf32> to vector<16x32xf32>
    %233 = arith.subf %225, %232 : vector<16x32xf32>
    %234 = arith.mulf %233, %233 : vector<16x32xf32>
    %cst_75 = arith.constant dense<0.000000e+00> : vector<16xf32>
    %235 = vector.multi_reduction <add>, %234, %cst_75 [1] : vector<16x32xf32> to vector<16xf32>
    %236 = vector.shape_cast %235 : vector<16xf32> to vector<16x1xf32>
    %cst_76 = arith.constant 0.0322580636 : f32
    %237 = vector.broadcast %cst_76 : f32 to vector<16x1xf32>
    %238 = arith.mulf %236, %237 : vector<16x1xf32>
    %239 = math.sqrt %238 : vector<16x1xf32>
    %cst_77 = arith.constant 9.99999997E-7 : f32
    %240 = vector.broadcast %cst_77 : f32 to vector<16x1xf32>
    %241 = arith.addf %239, %240 : vector<16x1xf32>
    %242 = tpu.reciprocal %241 : vector<16x1xf32> -> vector<16x1xf32>
    %243 = vector.broadcast %242 : vector<16x1xf32> to vector<16x32xf32>
    %244 = arith.mulf %233, %243 : vector<16x32xf32>
    %245 = vector.broadcast %226 : vector<1x32xf32> to vector<16x32xf32>
    %246 = arith.mulf %245, %244 : vector<16x32xf32>
    %247 = vector.broadcast %227 : vector<1x32xf32> to vector<16x32xf32>
    %248 = arith.addf %246, %247 : vector<16x32xf32>
    %cst_78 = arith.constant dense<0.000000e+00> : vector<16x64xf32>
    %249 = tpu.matmul %248, %11, %cst_78 {dimension_numbers = #tpu.dot_dimension_numbers<[1], [0], [0], [1], [0, 0, 1, 1], [], []>} : vector<16x32xf32>, vector<32x64xf32>, vector<16x64xf32> -> vector<16x64xf32>
    %250 = vector.broadcast %18 : vector<1x64xf32> to vector<16x64xf32>
    %251 = arith.addf %249, %250 : vector<16x64xf32>
    %cst_79 = arith.constant 0.000000e+00 : f32
    %252 = vector.broadcast %cst_79 : f32 to vector<16x64xf32>
    %253 = arith.maximumf %251, %252 : vector<16x64xf32>
    %cst_80 = arith.constant dense<0.000000e+00> : vector<16x32xf32>
    %254 = tpu.matmul %253, %12, %cst_80 {dimension_numbers = #tpu.dot_dimension_numbers<[1], [1], [0], [0], [0, 0, 1, 0], [], []>} : vector<16x64xf32>, vector<32x64xf32>, vector<16x32xf32> -> vector<16x32xf32>
    %255 = arith.addf %225, %254 : vector<16x32xf32>
    %256 = vector.broadcast %19 : vector<1x32xf32> to vector<16x32xf32>
    %257 = arith.addf %255, %256 : vector<16x32xf32>
    %c240 = arith.constant 240 : index
    %c0_81 = arith.constant 0 : index
    %258 = vector.load %arg2[%c240, %c0_81] : memref<488x96xf32, #tpu.memory_space<vmem>>, vector<32x96xf32>
    %c272 = arith.constant 272 : index
    %c0_82 = arith.constant 0 : index
    %259 = vector.load %arg2[%c272, %c0_82] : memref<488x96xf32, #tpu.memory_space<vmem>>, vector<32x32xf32>
    %c304 = arith.constant 304 : index
    %c0_83 = arith.constant 0 : index
    %260 = vector.load %arg2[%c304, %c0_83] : memref<488x96xf32, #tpu.memory_space<vmem>>, vector<32x32xf32>
    %c336 = arith.constant 336 : index
    %c0_84 = arith.constant 0 : index
    %261 = vector.load %arg2[%c336, %c0_84] : memref<488x96xf32, #tpu.memory_space<vmem>>, vector<32x64xf32>
    %c368 = arith.constant 368 : index
    %c0_85 = arith.constant 0 : index
    %262 = vector.load %arg2[%c368, %c0_85] : memref<488x96xf32, #tpu.memory_space<vmem>>, vector<32x32xf32>
    %c400 = arith.constant 400 : index
    %c0_86 = arith.constant 0 : index
    %263 = vector.load %arg2[%c400, %c0_86] : memref<488x96xf32, #tpu.memory_space<vmem>>, vector<32x64xf32>
    %c432 = arith.constant 432 : index
    %c0_87 = arith.constant 0 : index
    %264 = vector.load %arg2[%c432, %c0_87] : memref<488x96xf32, #tpu.memory_space<vmem>>, vector<32x64xf32>
    %c464 = arith.constant 464 : index
    %c0_88 = arith.constant 0 : index
    %265 = vector.load %arg2[%c464, %c0_88] : memref<488x96xf32, #tpu.memory_space<vmem>>, vector<1x96xf32>
    %c465 = arith.constant 465 : index
    %c0_89 = arith.constant 0 : index
    %266 = vector.load %arg2[%c465, %c0_89] : memref<488x96xf32, #tpu.memory_space<vmem>>, vector<1x32xf32>
    %c466 = arith.constant 466 : index
    %c0_90 = arith.constant 0 : index
    %267 = vector.load %arg2[%c466, %c0_90] : memref<488x96xf32, #tpu.memory_space<vmem>>, vector<1x32xf32>
    %c467 = arith.constant 467 : index
    %c0_91 = arith.constant 0 : index
    %268 = vector.load %arg2[%c467, %c0_91] : memref<488x96xf32, #tpu.memory_space<vmem>>, vector<1x64xf32>
    %c468 = arith.constant 468 : index
    %c0_92 = arith.constant 0 : index
    %269 = vector.load %arg2[%c468, %c0_92] : memref<488x96xf32, #tpu.memory_space<vmem>>, vector<1x32xf32>
    %c469 = arith.constant 469 : index
    %c0_93 = arith.constant 0 : index
    %270 = vector.load %arg2[%c469, %c0_93] : memref<488x96xf32, #tpu.memory_space<vmem>>, vector<1x64xf32>
    %c470 = arith.constant 470 : index
    %c0_94 = arith.constant 0 : index
    %271 = vector.load %arg2[%c470, %c0_94] : memref<488x96xf32, #tpu.memory_space<vmem>>, vector<1x32xf32>
    %c472 = arith.constant 472 : index
    %c0_95 = arith.constant 0 : index
    %272 = vector.load %arg2[%c472, %c0_95] : memref<488x96xf32, #tpu.memory_space<vmem>>, vector<1x32xf32>
    %c473 = arith.constant 473 : index
    %c0_96 = arith.constant 0 : index
    %273 = vector.load %arg2[%c473, %c0_96] : memref<488x96xf32, #tpu.memory_space<vmem>>, vector<1x32xf32>
    %cst_97 = arith.constant dense<0.000000e+00> : vector<16xf32>
    %274 = vector.multi_reduction <add>, %257, %cst_97 [1] : vector<16x32xf32> to vector<16xf32>
    %275 = vector.shape_cast %274 : vector<16xf32> to vector<16x1xf32>
    %cst_98 = arith.constant 3.200000e+01 : f32
    %276 = vector.broadcast %cst_98 : f32 to vector<16x1xf32>
    %277 = arith.divf %275, %276 : vector<16x1xf32>
    %278 = vector.broadcast %277 : vector<16x1xf32> to vector<16x32xf32>
    %279 = arith.subf %257, %278 : vector<16x32xf32>
    %280 = arith.mulf %279, %279 : vector<16x32xf32>
    %cst_99 = arith.constant dense<0.000000e+00> : vector<16xf32>
    %281 = vector.multi_reduction <add>, %280, %cst_99 [1] : vector<16x32xf32> to vector<16xf32>
    %282 = vector.shape_cast %281 : vector<16xf32> to vector<16x1xf32>
    %cst_100 = arith.constant 0.0322580636 : f32
    %283 = vector.broadcast %cst_100 : f32 to vector<16x1xf32>
    %284 = arith.mulf %282, %283 : vector<16x1xf32>
    %285 = math.sqrt %284 : vector<16x1xf32>
    %cst_101 = arith.constant 9.99999997E-7 : f32
    %286 = vector.broadcast %cst_101 : f32 to vector<16x1xf32>
    %287 = arith.addf %285, %286 : vector<16x1xf32>
    %288 = tpu.reciprocal %287 : vector<16x1xf32> -> vector<16x1xf32>
    %289 = vector.broadcast %288 : vector<16x1xf32> to vector<16x32xf32>
    %290 = arith.mulf %279, %289 : vector<16x32xf32>
    %291 = vector.broadcast %272 : vector<1x32xf32> to vector<16x32xf32>
    %292 = arith.mulf %291, %290 : vector<16x32xf32>
    %293 = vector.broadcast %273 : vector<1x32xf32> to vector<16x32xf32>
    %294 = arith.addf %292, %293 : vector<16x32xf32>
    %cst_102 = arith.constant dense<0.000000e+00> : vector<16x96xf32>
    %295 = tpu.matmul %294, %258, %cst_102 {dimension_numbers = #tpu.dot_dimension_numbers<[1], [0], [0], [1], [0, 0, 1, 1], [], []>} : vector<16x32xf32>, vector<32x96xf32>, vector<16x96xf32> -> vector<16x96xf32>
    %296 = vector.broadcast %265 : vector<1x96xf32> to vector<16x96xf32>
    %297 = arith.addf %295, %296 : vector<16x96xf32>
    %298 = vector.extract_strided_slice %297 {offsets = [0, 0], sizes = [16, 32], strides = [1, 1]} : vector<16x96xf32> to vector<16x32xf32>
    %299 = vector.extract_strided_slice %297 {offsets = [0, 32], sizes = [16, 32], strides = [1, 1]} : vector<16x96xf32> to vector<16x32xf32>
    %300 = vector.shape_cast %299 : vector<16x32xf32> to vector<2x8x32xf32>
    %301 = vector.extract_strided_slice %297 {offsets = [0, 64], sizes = [16, 32], strides = [1, 1]} : vector<16x96xf32> to vector<16x32xf32>
    %302 = vector.shape_cast %301 : vector<16x32xf32> to vector<2x8x32xf32>
    %303 = vector.shape_cast %298 : vector<16x32xf32> to vector<2x8x32xf32>
    %304 = vector.extract_strided_slice %303 {offsets = [0, 0, 0], sizes = [2, 8, 8], strides = [1, 1, 1]} : vector<2x8x32xf32> to vector<2x8x8xf32>
    %305 = vector.extract_strided_slice %300 {offsets = [0, 0, 0], sizes = [2, 8, 8], strides = [1, 1, 1]} : vector<2x8x32xf32> to vector<2x8x8xf32>
    %306 = vector.extract_strided_slice %302 {offsets = [0, 0, 0], sizes = [2, 8, 8], strides = [1, 1, 1]} : vector<2x8x32xf32> to vector<2x8x8xf32>
    "tpu.trace_start"() <{level = 10 : i32, message = "bqd,bkd->bqk"}> : () -> ()
    %cst_103 = arith.constant dense<0.000000e+00> : vector<2x8x8xf32>
    %307 = tpu.matmul %304, %305, %cst_103 {dimension_numbers = #tpu.dot_dimension_numbers<[2], [2], [1], [1], [0, 0, 0, 1, 1, 1], [0], [0]>} : vector<2x8x8xf32>, vector<2x8x8xf32>, vector<2x8x8xf32> -> vector<2x8x8xf32>
    "tpu.trace_stop"() : () -> ()
    %308 = arith.addf %307, %3 : vector<2x8x8xf32>
    %cst_104 = arith.constant dense<0xFF800000> : vector<2x8xf32>
    %309 = vector.multi_reduction <maximumf>, %308, %cst_104 [2] : vector<2x8x8xf32> to vector<2x8xf32>
    %310 = vector.shape_cast %309 : vector<2x8xf32> to vector<2x8x1xf32>
    %311 = vector.broadcast %310 : vector<2x8x1xf32> to vector<2x8x8xf32>
    %312 = arith.subf %308, %311 : vector<2x8x8xf32>
    %313 = math.exp %312 : vector<2x8x8xf32>
    %cst_105 = arith.constant dense<0.000000e+00> : vector<2x8xf32>
    %314 = vector.multi_reduction <add>, %313, %cst_105 [2] : vector<2x8x8xf32> to vector<2x8xf32>
    %315 = vector.shape_cast %314 : vector<2x8xf32> to vector<2x8x1xf32>
    %316 = tpu.reciprocal %315 {approx = true} : vector<2x8x1xf32> -> vector<2x8x1xf32>
    %317 = vector.broadcast %316 : vector<2x8x1xf32> to vector<2x8x8xf32>
    %318 = arith.mulf %313, %317 : vector<2x8x8xf32>
    "tpu.trace_start"() <{level = 10 : i32, message = "bqk,bkd->bqd"}> : () -> ()
    %cst_106 = arith.constant dense<0.000000e+00> : vector<2x8x8xf32>
    %319 = tpu.matmul %318, %306, %cst_106 {dimension_numbers = #tpu.dot_dimension_numbers<[2], [1], [1], [2], [0, 0, 0, 1, 1, 2], [0], [0]>} : vector<2x8x8xf32>, vector<2x8x8xf32>, vector<2x8x8xf32> -> vector<2x8x8xf32>
    "tpu.trace_stop"() : () -> ()
    %320 = vector.extract_strided_slice %303 {offsets = [0, 0, 8], sizes = [2, 8, 8], strides = [1, 1, 1]} : vector<2x8x32xf32> to vector<2x8x8xf32>
    %321 = vector.extract_strided_slice %300 {offsets = [0, 0, 8], sizes = [2, 8, 8], strides = [1, 1, 1]} : vector<2x8x32xf32> to vector<2x8x8xf32>
    %322 = vector.extract_strided_slice %302 {offsets = [0, 0, 8], sizes = [2, 8, 8], strides = [1, 1, 1]} : vector<2x8x32xf32> to vector<2x8x8xf32>
    "tpu.trace_start"() <{level = 10 : i32, message = "bqd,bkd->bqk"}> : () -> ()
    %cst_107 = arith.constant dense<0.000000e+00> : vector<2x8x8xf32>
    %323 = tpu.matmul %320, %321, %cst_107 {dimension_numbers = #tpu.dot_dimension_numbers<[2], [2], [1], [1], [0, 0, 0, 1, 1, 1], [0], [0]>} : vector<2x8x8xf32>, vector<2x8x8xf32>, vector<2x8x8xf32> -> vector<2x8x8xf32>
    "tpu.trace_stop"() : () -> ()
    %324 = arith.addf %323, %3 : vector<2x8x8xf32>
    %cst_108 = arith.constant dense<0xFF800000> : vector<2x8xf32>
    %325 = vector.multi_reduction <maximumf>, %324, %cst_108 [2] : vector<2x8x8xf32> to vector<2x8xf32>
    %326 = vector.shape_cast %325 : vector<2x8xf32> to vector<2x8x1xf32>
    %327 = vector.broadcast %326 : vector<2x8x1xf32> to vector<2x8x8xf32>
    %328 = arith.subf %324, %327 : vector<2x8x8xf32>
    %329 = math.exp %328 : vector<2x8x8xf32>
    %cst_109 = arith.constant dense<0.000000e+00> : vector<2x8xf32>
    %330 = vector.multi_reduction <add>, %329, %cst_109 [2] : vector<2x8x8xf32> to vector<2x8xf32>
    %331 = vector.shape_cast %330 : vector<2x8xf32> to vector<2x8x1xf32>
    %332 = tpu.reciprocal %331 {approx = true} : vector<2x8x1xf32> -> vector<2x8x1xf32>
    %333 = vector.broadcast %332 : vector<2x8x1xf32> to vector<2x8x8xf32>
    %334 = arith.mulf %329, %333 : vector<2x8x8xf32>
    "tpu.trace_start"() <{level = 10 : i32, message = "bqk,bkd->bqd"}> : () -> ()
    %cst_110 = arith.constant dense<0.000000e+00> : vector<2x8x8xf32>
    %335 = tpu.matmul %334, %322, %cst_110 {dimension_numbers = #tpu.dot_dimension_numbers<[2], [1], [1], [2], [0, 0, 0, 1, 1, 2], [0], [0]>} : vector<2x8x8xf32>, vector<2x8x8xf32>, vector<2x8x8xf32> -> vector<2x8x8xf32>
    "tpu.trace_stop"() : () -> ()
    %336 = vector.extract_strided_slice %303 {offsets = [0, 0, 16], sizes = [2, 8, 8], strides = [1, 1, 1]} : vector<2x8x32xf32> to vector<2x8x8xf32>
    %337 = vector.extract_strided_slice %300 {offsets = [0, 0, 16], sizes = [2, 8, 8], strides = [1, 1, 1]} : vector<2x8x32xf32> to vector<2x8x8xf32>
    %338 = vector.extract_strided_slice %302 {offsets = [0, 0, 16], sizes = [2, 8, 8], strides = [1, 1, 1]} : vector<2x8x32xf32> to vector<2x8x8xf32>
    "tpu.trace_start"() <{level = 10 : i32, message = "bqd,bkd->bqk"}> : () -> ()
    %cst_111 = arith.constant dense<0.000000e+00> : vector<2x8x8xf32>
    %339 = tpu.matmul %336, %337, %cst_111 {dimension_numbers = #tpu.dot_dimension_numbers<[2], [2], [1], [1], [0, 0, 0, 1, 1, 1], [0], [0]>} : vector<2x8x8xf32>, vector<2x8x8xf32>, vector<2x8x8xf32> -> vector<2x8x8xf32>
    "tpu.trace_stop"() : () -> ()
    %340 = arith.addf %339, %3 : vector<2x8x8xf32>
    %cst_112 = arith.constant dense<0xFF800000> : vector<2x8xf32>
    %341 = vector.multi_reduction <maximumf>, %340, %cst_112 [2] : vector<2x8x8xf32> to vector<2x8xf32>
    %342 = vector.shape_cast %341 : vector<2x8xf32> to vector<2x8x1xf32>
    %343 = vector.broadcast %342 : vector<2x8x1xf32> to vector<2x8x8xf32>
    %344 = arith.subf %340, %343 : vector<2x8x8xf32>
    %345 = math.exp %344 : vector<2x8x8xf32>
    %cst_113 = arith.constant dense<0.000000e+00> : vector<2x8xf32>
    %346 = vector.multi_reduction <add>, %345, %cst_113 [2] : vector<2x8x8xf32> to vector<2x8xf32>
    %347 = vector.shape_cast %346 : vector<2x8xf32> to vector<2x8x1xf32>
    %348 = tpu.reciprocal %347 {approx = true} : vector<2x8x1xf32> -> vector<2x8x1xf32>
    %349 = vector.broadcast %348 : vector<2x8x1xf32> to vector<2x8x8xf32>
    %350 = arith.mulf %345, %349 : vector<2x8x8xf32>
    "tpu.trace_start"() <{level = 10 : i32, message = "bqk,bkd->bqd"}> : () -> ()
    %cst_114 = arith.constant dense<0.000000e+00> : vector<2x8x8xf32>
    %351 = tpu.matmul %350, %338, %cst_114 {dimension_numbers = #tpu.dot_dimension_numbers<[2], [1], [1], [2], [0, 0, 0, 1, 1, 2], [0], [0]>} : vector<2x8x8xf32>, vector<2x8x8xf32>, vector<2x8x8xf32> -> vector<2x8x8xf32>
    "tpu.trace_stop"() : () -> ()
    %352 = vector.extract_strided_slice %303 {offsets = [0, 0, 24], sizes = [2, 8, 8], strides = [1, 1, 1]} : vector<2x8x32xf32> to vector<2x8x8xf32>
    %353 = vector.extract_strided_slice %300 {offsets = [0, 0, 24], sizes = [2, 8, 8], strides = [1, 1, 1]} : vector<2x8x32xf32> to vector<2x8x8xf32>
    %354 = vector.extract_strided_slice %302 {offsets = [0, 0, 24], sizes = [2, 8, 8], strides = [1, 1, 1]} : vector<2x8x32xf32> to vector<2x8x8xf32>
    "tpu.trace_start"() <{level = 10 : i32, message = "bqd,bkd->bqk"}> : () -> ()
    %cst_115 = arith.constant dense<0.000000e+00> : vector<2x8x8xf32>
    %355 = tpu.matmul %352, %353, %cst_115 {dimension_numbers = #tpu.dot_dimension_numbers<[2], [2], [1], [1], [0, 0, 0, 1, 1, 1], [0], [0]>} : vector<2x8x8xf32>, vector<2x8x8xf32>, vector<2x8x8xf32> -> vector<2x8x8xf32>
    "tpu.trace_stop"() : () -> ()
    %356 = arith.addf %355, %3 : vector<2x8x8xf32>
    %cst_116 = arith.constant dense<0xFF800000> : vector<2x8xf32>
    %357 = vector.multi_reduction <maximumf>, %356, %cst_116 [2] : vector<2x8x8xf32> to vector<2x8xf32>
    %358 = vector.shape_cast %357 : vector<2x8xf32> to vector<2x8x1xf32>
    %359 = vector.broadcast %358 : vector<2x8x1xf32> to vector<2x8x8xf32>
    %360 = arith.subf %356, %359 : vector<2x8x8xf32>
    %361 = math.exp %360 : vector<2x8x8xf32>
    %cst_117 = arith.constant dense<0.000000e+00> : vector<2x8xf32>
    %362 = vector.multi_reduction <add>, %361, %cst_117 [2] : vector<2x8x8xf32> to vector<2x8xf32>
    %363 = vector.shape_cast %362 : vector<2x8xf32> to vector<2x8x1xf32>
    %364 = tpu.reciprocal %363 {approx = true} : vector<2x8x1xf32> -> vector<2x8x1xf32>
    %365 = vector.broadcast %364 : vector<2x8x1xf32> to vector<2x8x8xf32>
    %366 = arith.mulf %361, %365 : vector<2x8x8xf32>
    "tpu.trace_start"() <{level = 10 : i32, message = "bqk,bkd->bqd"}> : () -> ()
    %cst_118 = arith.constant dense<0.000000e+00> : vector<2x8x8xf32>
    %367 = tpu.matmul %366, %354, %cst_118 {dimension_numbers = #tpu.dot_dimension_numbers<[2], [1], [1], [2], [0, 0, 0, 1, 1, 2], [0], [0]>} : vector<2x8x8xf32>, vector<2x8x8xf32>, vector<2x8x8xf32> -> vector<2x8x8xf32>
    "tpu.trace_stop"() : () -> ()
    %368 = tpu.concatenate %319, %335, %351, %367 in 2 : vector<2x8x8xf32>, vector<2x8x8xf32>, vector<2x8x8xf32>, vector<2x8x8xf32> -> vector<2x8x32xf32>
    %369 = vector.shape_cast %368 : vector<2x8x32xf32> to vector<16x32xf32>
    %cst_119 = arith.constant dense<0.000000e+00> : vector<16x32xf32>
    %370 = tpu.matmul %369, %259, %cst_119 {dimension_numbers = #tpu.dot_dimension_numbers<[1], [0], [0], [1], [0, 0, 1, 1], [], []>} : vector<16x32xf32>, vector<32x32xf32>, vector<16x32xf32> -> vector<16x32xf32>
    %371 = arith.addf %257, %370 : vector<16x32xf32>
    %372 = vector.broadcast %266 : vector<1x32xf32> to vector<16x32xf32>
    %373 = arith.addf %371, %372 : vector<16x32xf32>
    %c474 = arith.constant 474 : index
    %c0_120 = arith.constant 0 : index
    %374 = vector.load %arg2[%c474, %c0_120] : memref<488x96xf32, #tpu.memory_space<vmem>>, vector<1x32xf32>
    %c475 = arith.constant 475 : index
    %c0_121 = arith.constant 0 : index
    %375 = vector.load %arg2[%c475, %c0_121] : memref<488x96xf32, #tpu.memory_space<vmem>>, vector<1x32xf32>
    %cst_122 = arith.constant dense<0.000000e+00> : vector<16xf32>
    %376 = vector.multi_reduction <add>, %373, %cst_122 [1] : vector<16x32xf32> to vector<16xf32>
    %377 = vector.shape_cast %376 : vector<16xf32> to vector<16x1xf32>
    %cst_123 = arith.constant 3.200000e+01 : f32
    %378 = vector.broadcast %cst_123 : f32 to vector<16x1xf32>
    %379 = arith.divf %377, %378 : vector<16x1xf32>
    %380 = vector.broadcast %379 : vector<16x1xf32> to vector<16x32xf32>
    %381 = arith.subf %373, %380 : vector<16x32xf32>
    %382 = arith.mulf %381, %381 : vector<16x32xf32>
    %cst_124 = arith.constant dense<0.000000e+00> : vector<16xf32>
    %383 = vector.multi_reduction <add>, %382, %cst_124 [1] : vector<16x32xf32> to vector<16xf32>
    %384 = vector.shape_cast %383 : vector<16xf32> to vector<16x1xf32>
    %cst_125 = arith.constant 0.0322580636 : f32
    %385 = vector.broadcast %cst_125 : f32 to vector<16x1xf32>
    %386 = arith.mulf %384, %385 : vector<16x1xf32>
    %387 = math.sqrt %386 : vector<16x1xf32>
    %cst_126 = arith.constant 9.99999997E-7 : f32
    %388 = vector.broadcast %cst_126 : f32 to vector<16x1xf32>
    %389 = arith.addf %387, %388 : vector<16x1xf32>
    %390 = tpu.reciprocal %389 : vector<16x1xf32> -> vector<16x1xf32>
    %391 = vector.broadcast %390 : vector<16x1xf32> to vector<16x32xf32>
    %392 = arith.mulf %381, %391 : vector<16x32xf32>
    %393 = vector.broadcast %374 : vector<1x32xf32> to vector<16x32xf32>
    %394 = arith.mulf %393, %392 : vector<16x32xf32>
    %395 = vector.broadcast %375 : vector<1x32xf32> to vector<16x32xf32>
    %396 = arith.addf %394, %395 : vector<16x32xf32>
    %cst_127 = arith.constant dense<0.000000e+00> : vector<16x32xf32>
    %397 = tpu.matmul %396, %260, %cst_127 {dimension_numbers = #tpu.dot_dimension_numbers<[1], [0], [0], [1], [0, 0, 1, 1], [], []>} : vector<16x32xf32>, vector<32x32xf32>, vector<16x32xf32> -> vector<16x32xf32>
    %398 = vector.broadcast %267 : vector<1x32xf32> to vector<16x32xf32>
    %399 = arith.addf %397, %398 : vector<16x32xf32>
    %cst_128 = arith.constant dense<0.000000e+00> : vector<20x64xf32>
    %400 = tpu.matmul %1, %261, %cst_128 {dimension_numbers = #tpu.dot_dimension_numbers<[1], [0], [0], [1], [0, 0, 1, 1], [], []>} : vector<20x32xf32>, vector<32x64xf32>, vector<20x64xf32> -> vector<20x64xf32>
    %401 = vector.broadcast %268 : vector<1x64xf32> to vector<20x64xf32>
    %402 = arith.addf %400, %401 : vector<20x64xf32>
    %403 = vector.extract_strided_slice %402 {offsets = [0, 0], sizes = [20, 32], strides = [1, 1]} : vector<20x64xf32> to vector<20x32xf32>
    %404 = vector.shape_cast %403 : vector<20x32xf32> to vector<2x10x32xf32>
    %405 = vector.extract_strided_slice %402 {offsets = [0, 32], sizes = [20, 32], strides = [1, 1]} : vector<20x64xf32> to vector<20x32xf32>
    %406 = vector.shape_cast %405 : vector<20x32xf32> to vector<2x10x32xf32>
    %407 = vector.shape_cast %399 : vector<16x32xf32> to vector<2x8x32xf32>
    %408 = vector.extract_strided_slice %407 {offsets = [0, 0, 0], sizes = [2, 8, 8], strides = [1, 1, 1]} : vector<2x8x32xf32> to vector<2x8x8xf32>
    %409 = vector.extract_strided_slice %404 {offsets = [0, 0, 0], sizes = [2, 10, 8], strides = [1, 1, 1]} : vector<2x10x32xf32> to vector<2x10x8xf32>
    %410 = vector.extract_strided_slice %406 {offsets = [0, 0, 0], sizes = [2, 10, 8], strides = [1, 1, 1]} : vector<2x10x32xf32> to vector<2x10x8xf32>
    "tpu.trace_start"() <{level = 10 : i32, message = "bqd,bkd->bqk"}> : () -> ()
    %cst_129 = arith.constant dense<0.000000e+00> : vector<2x8x10xf32>
    %411 = tpu.matmul %408, %409, %cst_129 {dimension_numbers = #tpu.dot_dimension_numbers<[2], [2], [1], [1], [0, 0, 0, 1, 1, 1], [0], [0]>} : vector<2x8x8xf32>, vector<2x10x8xf32>, vector<2x8x10xf32> -> vector<2x8x10xf32>
    "tpu.trace_stop"() : () -> ()
    %412 = arith.addf %411, %5 : vector<2x8x10xf32>
    %cst_130 = arith.constant dense<0xFF800000> : vector<2x8xf32>
    %413 = vector.multi_reduction <maximumf>, %412, %cst_130 [2] : vector<2x8x10xf32> to vector<2x8xf32>
    %414 = vector.shape_cast %413 : vector<2x8xf32> to vector<2x8x1xf32>
    %415 = vector.broadcast %414 : vector<2x8x1xf32> to vector<2x8x10xf32>
    %416 = arith.subf %412, %415 : vector<2x8x10xf32>
    %417 = math.exp %416 : vector<2x8x10xf32>
    %cst_131 = arith.constant dense<0.000000e+00> : vector<2x8xf32>
    %418 = vector.multi_reduction <add>, %417, %cst_131 [2] : vector<2x8x10xf32> to vector<2x8xf32>
    %419 = vector.shape_cast %418 : vector<2x8xf32> to vector<2x8x1xf32>
    %420 = tpu.reciprocal %419 {approx = true} : vector<2x8x1xf32> -> vector<2x8x1xf32>
    %421 = vector.broadcast %420 : vector<2x8x1xf32> to vector<2x8x10xf32>
    %422 = arith.mulf %417, %421 : vector<2x8x10xf32>
    "tpu.trace_start"() <{level = 10 : i32, message = "bqk,bkd->bqd"}> : () -> ()
    %cst_132 = arith.constant dense<0.000000e+00> : vector<2x8x8xf32>
    %423 = tpu.matmul %422, %410, %cst_132 {dimension_numbers = #tpu.dot_dimension_numbers<[2], [1], [1], [2], [0, 0, 0, 1, 1, 2], [0], [0]>} : vector<2x8x10xf32>, vector<2x10x8xf32>, vector<2x8x8xf32> -> vector<2x8x8xf32>
    "tpu.trace_stop"() : () -> ()
    %424 = vector.extract_strided_slice %407 {offsets = [0, 0, 8], sizes = [2, 8, 8], strides = [1, 1, 1]} : vector<2x8x32xf32> to vector<2x8x8xf32>
    %425 = vector.extract_strided_slice %404 {offsets = [0, 0, 8], sizes = [2, 10, 8], strides = [1, 1, 1]} : vector<2x10x32xf32> to vector<2x10x8xf32>
    %426 = vector.extract_strided_slice %406 {offsets = [0, 0, 8], sizes = [2, 10, 8], strides = [1, 1, 1]} : vector<2x10x32xf32> to vector<2x10x8xf32>
    "tpu.trace_start"() <{level = 10 : i32, message = "bqd,bkd->bqk"}> : () -> ()
    %cst_133 = arith.constant dense<0.000000e+00> : vector<2x8x10xf32>
    %427 = tpu.matmul %424, %425, %cst_133 {dimension_numbers = #tpu.dot_dimension_numbers<[2], [2], [1], [1], [0, 0, 0, 1, 1, 1], [0], [0]>} : vector<2x8x8xf32>, vector<2x10x8xf32>, vector<2x8x10xf32> -> vector<2x8x10xf32>
    "tpu.trace_stop"() : () -> ()
    %428 = arith.addf %427, %5 : vector<2x8x10xf32>
    %cst_134 = arith.constant dense<0xFF800000> : vector<2x8xf32>
    %429 = vector.multi_reduction <maximumf>, %428, %cst_134 [2] : vector<2x8x10xf32> to vector<2x8xf32>
    %430 = vector.shape_cast %429 : vector<2x8xf32> to vector<2x8x1xf32>
    %431 = vector.broadcast %430 : vector<2x8x1xf32> to vector<2x8x10xf32>
    %432 = arith.subf %428, %431 : vector<2x8x10xf32>
    %433 = math.exp %432 : vector<2x8x10xf32>
    %cst_135 = arith.constant dense<0.000000e+00> : vector<2x8xf32>
    %434 = vector.multi_reduction <add>, %433, %cst_135 [2] : vector<2x8x10xf32> to vector<2x8xf32>
    %435 = vector.shape_cast %434 : vector<2x8xf32> to vector<2x8x1xf32>
    %436 = tpu.reciprocal %435 {approx = true} : vector<2x8x1xf32> -> vector<2x8x1xf32>
    %437 = vector.broadcast %436 : vector<2x8x1xf32> to vector<2x8x10xf32>
    %438 = arith.mulf %433, %437 : vector<2x8x10xf32>
    "tpu.trace_start"() <{level = 10 : i32, message = "bqk,bkd->bqd"}> : () -> ()
    %cst_136 = arith.constant dense<0.000000e+00> : vector<2x8x8xf32>
    %439 = tpu.matmul %438, %426, %cst_136 {dimension_numbers = #tpu.dot_dimension_numbers<[2], [1], [1], [2], [0, 0, 0, 1, 1, 2], [0], [0]>} : vector<2x8x10xf32>, vector<2x10x8xf32>, vector<2x8x8xf32> -> vector<2x8x8xf32>
    "tpu.trace_stop"() : () -> ()
    %440 = vector.extract_strided_slice %407 {offsets = [0, 0, 16], sizes = [2, 8, 8], strides = [1, 1, 1]} : vector<2x8x32xf32> to vector<2x8x8xf32>
    %441 = vector.extract_strided_slice %404 {offsets = [0, 0, 16], sizes = [2, 10, 8], strides = [1, 1, 1]} : vector<2x10x32xf32> to vector<2x10x8xf32>
    %442 = vector.extract_strided_slice %406 {offsets = [0, 0, 16], sizes = [2, 10, 8], strides = [1, 1, 1]} : vector<2x10x32xf32> to vector<2x10x8xf32>
    "tpu.trace_start"() <{level = 10 : i32, message = "bqd,bkd->bqk"}> : () -> ()
    %cst_137 = arith.constant dense<0.000000e+00> : vector<2x8x10xf32>
    %443 = tpu.matmul %440, %441, %cst_137 {dimension_numbers = #tpu.dot_dimension_numbers<[2], [2], [1], [1], [0, 0, 0, 1, 1, 1], [0], [0]>} : vector<2x8x8xf32>, vector<2x10x8xf32>, vector<2x8x10xf32> -> vector<2x8x10xf32>
    "tpu.trace_stop"() : () -> ()
    %444 = arith.addf %443, %5 : vector<2x8x10xf32>
    %cst_138 = arith.constant dense<0xFF800000> : vector<2x8xf32>
    %445 = vector.multi_reduction <maximumf>, %444, %cst_138 [2] : vector<2x8x10xf32> to vector<2x8xf32>
    %446 = vector.shape_cast %445 : vector<2x8xf32> to vector<2x8x1xf32>
    %447 = vector.broadcast %446 : vector<2x8x1xf32> to vector<2x8x10xf32>
    %448 = arith.subf %444, %447 : vector<2x8x10xf32>
    %449 = math.exp %448 : vector<2x8x10xf32>
    %cst_139 = arith.constant dense<0.000000e+00> : vector<2x8xf32>
    %450 = vector.multi_reduction <add>, %449, %cst_139 [2] : vector<2x8x10xf32> to vector<2x8xf32>
    %451 = vector.shape_cast %450 : vector<2x8xf32> to vector<2x8x1xf32>
    %452 = tpu.reciprocal %451 {approx = true} : vector<2x8x1xf32> -> vector<2x8x1xf32>
    %453 = vector.broadcast %452 : vector<2x8x1xf32> to vector<2x8x10xf32>
    %454 = arith.mulf %449, %453 : vector<2x8x10xf32>
    "tpu.trace_start"() <{level = 10 : i32, message = "bqk,bkd->bqd"}> : () -> ()
    %cst_140 = arith.constant dense<0.000000e+00> : vector<2x8x8xf32>
    %455 = tpu.matmul %454, %442, %cst_140 {dimension_numbers = #tpu.dot_dimension_numbers<[2], [1], [1], [2], [0, 0, 0, 1, 1, 2], [0], [0]>} : vector<2x8x10xf32>, vector<2x10x8xf32>, vector<2x8x8xf32> -> vector<2x8x8xf32>
    "tpu.trace_stop"() : () -> ()
    %456 = vector.extract_strided_slice %407 {offsets = [0, 0, 24], sizes = [2, 8, 8], strides = [1, 1, 1]} : vector<2x8x32xf32> to vector<2x8x8xf32>
    %457 = vector.extract_strided_slice %404 {offsets = [0, 0, 24], sizes = [2, 10, 8], strides = [1, 1, 1]} : vector<2x10x32xf32> to vector<2x10x8xf32>
    %458 = vector.extract_strided_slice %406 {offsets = [0, 0, 24], sizes = [2, 10, 8], strides = [1, 1, 1]} : vector<2x10x32xf32> to vector<2x10x8xf32>
    "tpu.trace_start"() <{level = 10 : i32, message = "bqd,bkd->bqk"}> : () -> ()
    %cst_141 = arith.constant dense<0.000000e+00> : vector<2x8x10xf32>
    %459 = tpu.matmul %456, %457, %cst_141 {dimension_numbers = #tpu.dot_dimension_numbers<[2], [2], [1], [1], [0, 0, 0, 1, 1, 1], [0], [0]>} : vector<2x8x8xf32>, vector<2x10x8xf32>, vector<2x8x10xf32> -> vector<2x8x10xf32>
    "tpu.trace_stop"() : () -> ()
    %460 = arith.addf %459, %5 : vector<2x8x10xf32>
    %cst_142 = arith.constant dense<0xFF800000> : vector<2x8xf32>
    %461 = vector.multi_reduction <maximumf>, %460, %cst_142 [2] : vector<2x8x10xf32> to vector<2x8xf32>
    %462 = vector.shape_cast %461 : vector<2x8xf32> to vector<2x8x1xf32>
    %463 = vector.broadcast %462 : vector<2x8x1xf32> to vector<2x8x10xf32>
    %464 = arith.subf %460, %463 : vector<2x8x10xf32>
    %465 = math.exp %464 : vector<2x8x10xf32>
    %cst_143 = arith.constant dense<0.000000e+00> : vector<2x8xf32>
    %466 = vector.multi_reduction <add>, %465, %cst_143 [2] : vector<2x8x10xf32> to vector<2x8xf32>
    %467 = vector.shape_cast %466 : vector<2x8xf32> to vector<2x8x1xf32>
    %468 = tpu.reciprocal %467 {approx = true} : vector<2x8x1xf32> -> vector<2x8x1xf32>
    %469 = vector.broadcast %468 : vector<2x8x1xf32> to vector<2x8x10xf32>
    %470 = arith.mulf %465, %469 : vector<2x8x10xf32>
    "tpu.trace_start"() <{level = 10 : i32, message = "bqk,bkd->bqd"}> : () -> ()
    %cst_144 = arith.constant dense<0.000000e+00> : vector<2x8x8xf32>
    %471 = tpu.matmul %470, %458, %cst_144 {dimension_numbers = #tpu.dot_dimension_numbers<[2], [1], [1], [2], [0, 0, 0, 1, 1, 2], [0], [0]>} : vector<2x8x10xf32>, vector<2x10x8xf32>, vector<2x8x8xf32> -> vector<2x8x8xf32>
    "tpu.trace_stop"() : () -> ()
    %472 = tpu.concatenate %423, %439, %455, %471 in 2 : vector<2x8x8xf32>, vector<2x8x8xf32>, vector<2x8x8xf32>, vector<2x8x8xf32> -> vector<2x8x32xf32>
    %473 = vector.shape_cast %472 : vector<2x8x32xf32> to vector<16x32xf32>
    %cst_145 = arith.constant dense<0.000000e+00> : vector<16x32xf32>
    %474 = tpu.matmul %473, %262, %cst_145 {dimension_numbers = #tpu.dot_dimension_numbers<[1], [0], [0], [1], [0, 0, 1, 1], [], []>} : vector<16x32xf32>, vector<32x32xf32>, vector<16x32xf32> -> vector<16x32xf32>
    %475 = arith.addf %373, %474 : vector<16x32xf32>
    %476 = vector.broadcast %269 : vector<1x32xf32> to vector<16x32xf32>
    %477 = arith.addf %475, %476 : vector<16x32xf32>
    %c476 = arith.constant 476 : index
    %c0_146 = arith.constant 0 : index
    %478 = vector.load %arg2[%c476, %c0_146] : memref<488x96xf32, #tpu.memory_space<vmem>>, vector<1x32xf32>
    %c477 = arith.constant 477 : index
    %c0_147 = arith.constant 0 : index
    %479 = vector.load %arg2[%c477, %c0_147] : memref<488x96xf32, #tpu.memory_space<vmem>>, vector<1x32xf32>
    %cst_148 = arith.constant dense<0.000000e+00> : vector<16xf32>
    %480 = vector.multi_reduction <add>, %477, %cst_148 [1] : vector<16x32xf32> to vector<16xf32>
    %481 = vector.shape_cast %480 : vector<16xf32> to vector<16x1xf32>
    %cst_149 = arith.constant 3.200000e+01 : f32
    %482 = vector.broadcast %cst_149 : f32 to vector<16x1xf32>
    %483 = arith.divf %481, %482 : vector<16x1xf32>
    %484 = vector.broadcast %483 : vector<16x1xf32> to vector<16x32xf32>
    %485 = arith.subf %477, %484 : vector<16x32xf32>
    %486 = arith.mulf %485, %485 : vector<16x32xf32>
    %cst_150 = arith.constant dense<0.000000e+00> : vector<16xf32>
    %487 = vector.multi_reduction <add>, %486, %cst_150 [1] : vector<16x32xf32> to vector<16xf32>
    %488 = vector.shape_cast %487 : vector<16xf32> to vector<16x1xf32>
    %cst_151 = arith.constant 0.0322580636 : f32
    %489 = vector.broadcast %cst_151 : f32 to vector<16x1xf32>
    %490 = arith.mulf %488, %489 : vector<16x1xf32>
    %491 = math.sqrt %490 : vector<16x1xf32>
    %cst_152 = arith.constant 9.99999997E-7 : f32
    %492 = vector.broadcast %cst_152 : f32 to vector<16x1xf32>
    %493 = arith.addf %491, %492 : vector<16x1xf32>
    %494 = tpu.reciprocal %493 : vector<16x1xf32> -> vector<16x1xf32>
    %495 = vector.broadcast %494 : vector<16x1xf32> to vector<16x32xf32>
    %496 = arith.mulf %485, %495 : vector<16x32xf32>
    %497 = vector.broadcast %478 : vector<1x32xf32> to vector<16x32xf32>
    %498 = arith.mulf %497, %496 : vector<16x32xf32>
    %499 = vector.broadcast %479 : vector<1x32xf32> to vector<16x32xf32>
    %500 = arith.addf %498, %499 : vector<16x32xf32>
    %cst_153 = arith.constant dense<0.000000e+00> : vector<16x64xf32>
    %501 = tpu.matmul %500, %263, %cst_153 {dimension_numbers = #tpu.dot_dimension_numbers<[1], [0], [0], [1], [0, 0, 1, 1], [], []>} : vector<16x32xf32>, vector<32x64xf32>, vector<16x64xf32> -> vector<16x64xf32>
    %502 = vector.broadcast %270 : vector<1x64xf32> to vector<16x64xf32>
    %503 = arith.addf %501, %502 : vector<16x64xf32>
    %cst_154 = arith.constant 0.000000e+00 : f32
    %504 = vector.broadcast %cst_154 : f32 to vector<16x64xf32>
    %505 = arith.maximumf %503, %504 : vector<16x64xf32>
    %cst_155 = arith.constant dense<0.000000e+00> : vector<16x32xf32>
    %506 = tpu.matmul %505, %264, %cst_155 {dimension_numbers = #tpu.dot_dimension_numbers<[1], [1], [0], [0], [0, 0, 1, 0], [], []>} : vector<16x64xf32>, vector<32x64xf32>, vector<16x32xf32> -> vector<16x32xf32>
    %507 = arith.addf %477, %506 : vector<16x32xf32>
    %508 = vector.broadcast %271 : vector<1x32xf32> to vector<16x32xf32>
    %509 = arith.addf %507, %508 : vector<16x32xf32>
    %c480 = arith.constant 480 : index
    %c0_156 = arith.constant 0 : index
    %510 = vector.load %arg2[%c480, %c0_156] : memref<488x96xf32, #tpu.memory_space<vmem>>, vector<1x32xf32>
    %c481 = arith.constant 481 : index
    %c0_157 = arith.constant 0 : index
    %511 = vector.load %arg2[%c481, %c0_157] : memref<488x96xf32, #tpu.memory_space<vmem>>, vector<1x32xf32>
    %cst_158 = arith.constant dense<0.000000e+00> : vector<16xf32>
    %512 = vector.multi_reduction <add>, %509, %cst_158 [1] : vector<16x32xf32> to vector<16xf32>
    %513 = vector.shape_cast %512 : vector<16xf32> to vector<16x1xf32>
    %cst_159 = arith.constant 3.200000e+01 : f32
    %514 = vector.broadcast %cst_159 : f32 to vector<16x1xf32>
    %515 = arith.divf %513, %514 : vector<16x1xf32>
    %516 = vector.broadcast %515 : vector<16x1xf32> to vector<16x32xf32>
    %517 = arith.subf %509, %516 : vector<16x32xf32>
    %518 = arith.mulf %517, %517 : vector<16x32xf32>
    %cst_160 = arith.constant dense<0.000000e+00> : vector<16xf32>
    %519 = vector.multi_reduction <add>, %518, %cst_160 [1] : vector<16x32xf32> to vector<16xf32>
    %520 = vector.shape_cast %519 : vector<16xf32> to vector<16x1xf32>
    %cst_161 = arith.constant 0.0322580636 : f32
    %521 = vector.broadcast %cst_161 : f32 to vector<16x1xf32>
    %522 = arith.mulf %520, %521 : vector<16x1xf32>
    %523 = math.sqrt %522 : vector<16x1xf32>
    %cst_162 = arith.constant 9.99999997E-7 : f32
    %524 = vector.broadcast %cst_162 : f32 to vector<16x1xf32>
    %525 = arith.addf %523, %524 : vector<16x1xf32>
    %526 = tpu.reciprocal %525 : vector<16x1xf32> -> vector<16x1xf32>
    %527 = vector.broadcast %526 : vector<16x1xf32> to vector<16x32xf32>
    %528 = arith.mulf %517, %527 : vector<16x32xf32>
    %529 = vector.broadcast %510 : vector<1x32xf32> to vector<16x32xf32>
    %530 = arith.mulf %529, %528 : vector<16x32xf32>
    %531 = vector.broadcast %511 : vector<1x32xf32> to vector<16x32xf32>
    %532 = arith.addf %530, %531 : vector<16x32xf32>
    %c0_163 = arith.constant 0 : index
    %c0_164 = arith.constant 0 : index
    %533 = vector.load %arg3[%c0_163, %c0_164] : memref<16x32xf32, #tpu.memory_space<vmem>>, vector<16x32xf32>
    tpu.vector_store %arg3[%c0_163, %c0_164], %532 {strides = array<i32>} : memref<16x32xf32, #tpu.memory_space<vmem>>, vector<16x32xf32>,
    return
  }
}

</mosaic_0001>

<bundles_post_ra>
// kernel: run.1
= control target key start
LH: loop header
LB: loop body
LE: loop exit
PB: predicated region body
PF: predicated region fallthrough
CT: control target
= control target key end

     0   :  { %vm61_vm0 = vcmask 261120   ;;  %s5692_s0 = inlined_call_operand.vmem [shape: f32[36,32], index: 0, kind: input, shape index: {}]   ;;  %s5693_s1 = inlined_call_operand.vmem [shape: f32[32,10], index: 1, kind: input, shape index: {}]   ;;  %s5694_s2 = inlined_call_operand.vmem [shape: f32[488,96], index: 2, kind: input, shape index: {}]   ;;  %s5695_s3 = inlined_call_operand.hbm [shape: f32[16,32], index: 3, kind: output, shape index: {}]  }
   0x1   :  { %v16_v0 = vld [vmem:[%s5692_s0 + $0x8] sm:$0xff]  ;;  %v4380_v1 = vld [vmem:[%s5692_s0] sm:$0xff] }
   0x2   :  { %v65_v2 = vsel %vm61_vm0, %v16_v0, 0.0  ;;  %v62_v3 = vsel %vm61_vm0, %v4380_v1, 0.0 }
   0x3   :  { %66 = vadd.xlane.f32.xlu0 %v65_v2 }
   0xb   :  { %63 = vadd.xlane.f32.xlu0 %v62_v3 }
   0xc   :  { %8 = vsyncpa [#allocation3], 0  ;;  %v4337_v4 = vmov 32.0   ;;  %v27_v21 = vld [vmem:[%s5694_s2 + $0x18] sm:$0xff]  ;;  %v26_v22 = vld [vmem:[%s5694_s2 + $0x10] sm:$0xff]  ;;  %s4338_s30 = smov 88  }
   0xd   :  { %4117 = vrcp.f32 %v4337_v4  ;;  %4033 = vmatpush.msra.mxu3 %v27_v21  ;;  %170 = vmatpush.msra.mxu0 %v27_v21  ;;  %v25_v24 = vld [vmem:[%s5694_s2 + $0x8] sm:$0xff]  ;;  %v24_v26 = vld [vmem:[%s5694_s2] sm:$0xff]  ;;  %s4339_s4 = smov 120   ;;  %s4340_s5 = smov 96   ;;  %vm184_vm14 = vcmask 64512   ;;  %vm726_vm15 = vcmask 130048  }
   0xe   :  { %v4089_v61 = vld [vmem:[%s5694_s2 + $0xe8] ss:$0 sm:$0xff]  ;;  %v4090_v2 = vld [vmem:[%s5694_s2 + $0xe9] ss:$0 sm:$0xff]  ;;  %s4341_s6 = smov 104   ;;  %s4342_s7 = smov 112  }
   0xf   :  { %4034 = vmatpush.msra.mxu3 %v26_v22  ;;  %171 = vmatpush.msra.mxu0 %v26_v22  ;;  %s4343_s8 = smov 64   ;;  %s4344_s9 = smov 80  }
  0x10   :  { %s4345_s10 = smov 72   ;;  %s4346_s15 = smov 56  }
  0x11   :  { %4035 = vmatpush.msra.mxu3 %v25_v24  ;;  %172 = vmatpush.msra.mxu0 %v25_v24  ;;  %s4347_s16 = smov 48   ;;  %s4348_s17 = smov 40  }
  0x12   :  { %s4349_s18 = smov 8   ;;  %s4350_s19 = smov 16  }
  0x13   :  { %v4118_v5 = vpop.eup %4117  ;;  %4036 = vmatpush.msra.mxu3 %v24_v26  ;;  %173 = vmatpush.msra.mxu0 %v24_v26  ;;  %s4351_s20 = smov 24   ;;  %s3855_s21 = sshll.u32 %s5695_s3, 4  ;;  %s3856_s21 = int_to_ptr.hbm [resolvable:$true] %s3855_s21 }
  0x14   :  { %v69_v6 = vmul.f32 32.0, %v4118_v5  ;;  %vm73_vm1 = vweird.f32 %v4118_v5  ;;  %s4352_s22 = smov [#allocation2]   ;;  %s4353_s24 = smov 128  }
  0x15   :  { %s3853_s23 = sshll.u32 %s4352_s22, 4  ;;  %s3854_s23 = int_to_ptr.vmem [resolvable:$true] %s3853_s23 }
  0x16   :  { %v70_v7 = vsub.f32 1.0, %v69_v6 }
  0x18   :  { %v71_v8 = vmul.f32 %v4118_v5, %v70_v7 }
  0x1a   :  { %v72_v9 = vadd.f32 %v4118_v5, %v71_v8 }
  0x1c   :  { %v4385_v10 = vsel %vm73_vm1, %v4118_v5, %v72_v9  ;;  %vm729_vm1 = vcmask 195584  }
  0x76   :  { %v67_v11 = vpop.xlane.xlu0 %66 }
  0x77   :  { %v76_v12 = vmul.f32 %v4385_v10, %v67_v11 }
  0x79   :  { %v4388_v13 = vsub.f32 %v16_v0, %v76_v12 }
  0x7b   :  { %v80_v14 = vmul.f32 %v4388_v13, %v4388_v13 }
  0x7d   :  { %v84_v15 = vsel %vm61_vm0, %v80_v14, 0.0 }
  0x7e   :  { %85 = vadd.xlane.f32.xlu1 %v84_v15  ;;  %v64_v16 = vpop.xlane.xlu0 %63 }
  0x7f   :  { %v75_v17 = vmul.f32 %v4385_v10, %v64_v16 }
  0x81   :  { %v4395_v18 = vsub.f32 %v4380_v1, %v75_v17  ;;  %v4091_v17 = vld [vmem:[%s5694_s2 + $0xe0] ss:$0 sm:$0xff] }
  0x83   :  { %v79_v19 = vmul.f32 %v4395_v18, %v4395_v18 }
  0x85   :  { %v81_v20 = vsel %vm61_vm0, %v79_v19, 0.0 }
  0x86   :  { %82 = vadd.xlane.f32.xlu1 %v81_v20 }
  0xf1   :  { %v86_v23 = vpop.xlane.xlu1 %85 }
  0xf2   :  { %v88_v25 = vmul.f32 0.032258064, %v86_v23 }
  0xf4   :  { %4119 = vrsqrt.f32 %v88_v25  ;;  %vm108_vm2 = vcmp.eq.f32.partialorder %v88_v25, inf  ;;  %v111_v39 = vand.u32 2147483648, %v88_v25  ;;  %vm110_vm3 = vcmp.eq.f32.partialorder %v88_v25, 0.0 }
  0xf9   :  { %v83_v27 = vpop.xlane.xlu1 %82 }
  0xfa   :  { %v4120_v28 = vpop.eup %4119  ;;  %v87_v29 = vmul.f32 0.032258064, %v83_v27 }
  0xfb   :  { %v102_v30 = vmul.f32 %v4120_v28, %v88_v25 }
  0xfc   :  { %4121 = vrsqrt.f32 %v87_v29  ;;  %vm96_vm4 = vcmp.eq.f32.partialorder %v87_v29, inf  ;;  %v99_v47 = vand.u32 2147483648, %v87_v29  ;;  %vm98_vm5 = vcmp.eq.f32.partialorder %v87_v29, 0.0 }
  0xfd   :  { %v103_v31 = vmul.f32 %v4120_v28, %v102_v30 }
  0xff   :  { %v104_v32 = vmul.f32 0.5, %v103_v31 }
 0x101   :  { %v105_v33 = vsub.f32 1.5, %v104_v32 }
 0x102   :  { %v4122_v34 = vpop.eup %4121 }
 0x103   :  { %v106_v35 = vmul.f32 %v4120_v28, %v105_v33  ;;  %v90_v36 = vmul.f32 %v4122_v34, %v87_v29 }
 0x105   :  { %v107_v37 = vmul.f32 %v106_v35, %v88_v25  ;;  %v91_v38 = vmul.f32 %v4122_v34, %v90_v36 }
 0x107   :  { %v109_v40 = vsel %vm108_vm2, %v88_v25, %v107_v37  ;;  %v92_v41 = vmul.f32 0.5, %v91_v38  ;;  %v20_v37 = vld [vmem:[%s5693_s1] sm:$0xff] }
 0x108   :  { %v112_v42 = vsel %vm110_vm3, %v111_v39, %v109_v40 }
 0x109   :  { %v93_v43 = vsub.f32 1.5, %v92_v41  ;;  %v114_v44 = vadd.f32 1e-06, %v112_v42  ;;  %v4476_v41 = vld [vmem:[%s5693_s1 + $0x8] sm:$0xff] }
 0x10b   :  { %v94_v45 = vmul.f32 %v4122_v34, %v93_v43  ;;  %4123 = vrcp.f32 %v114_v44  ;;  %v140_v54 = vand.u32 2147483648, %v114_v44  ;;  %v138_v56 = vand.u32 2147483647, %v114_v44 }
 0x10c   :  { %vm134_vm7 = vweird.f32 %v114_v44 }
 0x10d   :  { %v95_v46 = vmul.f32 %v94_v45, %v87_v29  ;;  %v141_v59 = vor.u32 1.1754944e-38, %v140_v54  ;;  %vm139_vm9 = vcmp.eq.f32.partialorder %v138_v56, 8.507059e+37 }
 0x10f   :  { %v97_v48 = vsel %vm96_vm4, %v87_v29, %v95_v46 }
 0x110   :  { %v100_v49 = vsel %vm98_vm5, %v99_v47, %v97_v48 }
 0x111   :  { %v4124_v50 = vpop.eup %4123  ;;  %v113_v51 = vadd.f32 1e-06, %v100_v49 }
 0x112   :  { %v130_v52 = vmul.f32 %v4124_v50, %v114_v44  ;;  %vm135_vm6 = vweird.f32 %v4124_v50 }
 0x113   :  { %4125 = vrcp.f32 %v113_v51  ;;  %vm136_vm8 = vmor %vm134_vm7, %vm135_vm6  ;;  %v126_v4 = vand.u32 2147483648, %v113_v51  ;;  %v124_v7 = vand.u32 2147483647, %v113_v51  ;;  %vm120_vm11 = vweird.f32 %v113_v51 }
 0x114   :  { %v131_v53 = vsub.f32 1.0, %v130_v52 }
 0x115   :  { %v127_v11 = vor.u32 1.1754944e-38, %v126_v4  ;;  %vm125_vm13 = vcmp.eq.f32.partialorder %v124_v7, 8.507059e+37 }
 0x116   :  { %v132_v55 = vmul.f32 %v4124_v50, %v131_v53 }
 0x118   :  { %v133_v57 = vadd.f32 %v4124_v50, %v132_v55 }
 0x119   :  { %v4126_v58 = vpop.eup %4125 }
 0x11a   :  { %v137_v60 = vsel %vm136_vm8, %v4124_v50, %v133_v57  ;;  %v116_v62 = vmul.f32 %v4126_v58, %v113_v51  ;;  %vm121_vm10 = vweird.f32 %v4126_v58 }
 0x11b   :  { %v142_v63 = vsel %vm139_vm9, %v141_v59, %v137_v60  ;;  %vm122_vm12 = vmor %vm120_vm11, %vm121_vm10 }
 0x11c   :  { %v144_v0 = vmul.f32 %v142_v63, %v4388_v13  ;;  %v117_v3 = vsub.f32 1.0, %v116_v62 }
 0x11e   :  { %v147_v5 = vmul.f32 %v4089_v61, %v144_v0  ;;  %v118_v6 = vmul.f32 %v4126_v58, %v117_v3 }
 0x120   :  { %v150_v8 = vadd.f32 %v4090_v2, %v147_v5  ;;  %v119_v9 = vadd.f32 %v4126_v58, %v118_v6 }
 0x122   :  { %3868 = vmatmul.msk.f32.vlgmr.msra.gmra.mxu3 %vm61_vm0, %v150_v8  ;;  %v123_v12 = vsel %vm122_vm12, %v4126_v58, %v119_v9 }
 0x123   :  { %v128_v13 = vsel %vm125_vm13, %v127_v11, %v123_v12 }
 0x124   :  { %v143_v14 = vmul.f32 %v128_v13, %v4395_v18 }
 0x126   :  { %v146_v15 = vmul.f32 %v4089_v61, %v143_v14 }
 0x128   :  { %v149_v16 = vadd.f32 %v4090_v2, %v146_v15 }
 0x12a   :  { %3867 = vmatmul.msk.f32.vlgmr.msra.gmra.mxu0 %vm61_vm0, %v149_v16 }
 0x1a5   :  { %v178_v19 = vpop.f32.mrf.mxu3 }
 0x1a6   :  { %v4425_v20 = vadd.f32 %v4091_v17, %v178_v19 }
 0x1a7   :  { %v175_v21 = vpop.f32.mrf.mxu0 }
 0x1a8   :  { %v4427_v22 = vadd.f32 %v4091_v17, %v175_v21  ;;  %340 = vrot.lane.b32.xlu0 %v4425_v20, %s4338_s30  ;;  %338 = vrot.lane.b32.xlu1 %v4425_v20, %s4339_s4 }
 0x1aa   :  { %182 = vrot.lane.b32.xlu2 %v4427_v22, %s4340_s5  ;;  %v4054_v18 = vpack.i.bf16 %v4425_v20, %v4427_v22 }
 0x1b0   :  { %570 = vrot.lane.b32.xlu1 %v4427_v22, %s4341_s6  ;;  %440 = vrot.lane.b32.xlu0 %v4427_v22, %s4342_s7 }
 0x1b2   :  { %210 = vrot.lane.b32.xlu2 %v4425_v20, %s4340_s5 }
 0x1b8   :  { %4055 = vrot.lane.b32.xlu1 %v4054_v18, %s4343_s8  ;;  %470 = vrot.lane.b32.xlu0 %v4425_v20, %s4344_s9 }
 0x1ba   :  { %312 = vrot.lane.b32.xlu2 %v4427_v22, %s4338_s30 }
 0x1c2   :  { %442 = vrot.lane.b32.xlu2 %v4427_v22, %s4344_s9 }
 0x1ca   :  { %310 = vrot.lane.b32.xlu2 %v4427_v22, %s4339_s4 }
 0x1d2   :  { %572 = vrot.lane.b32.xlu2 %v4427_v22, %s4345_s10 }
 0x204   :  { %v183_v23 = vpop.permute.xlu2 %182 }
 0x205   :  { %3869 = vmatpush.xpose.msk.msra.mxu1 %vm184_vm14, %v183_v23 }
 0x208   :  { %3870 = vmatmul.msk.f32.vlgmr.msra.gmra.mxu1 %vm184_vm14, %v4427_v22 }
 0x20c   :  { %v211_v24 = vpop.permute.xlu2 %210 }
 0x20d   :  { %3871 = vmatpush.xpose.msk.msra.mxu2 %vm184_vm14, %v211_v24 }
 0x210   :  { %3872 = vmatmul.msk.f32.vlgmr.msra.gmra.mxu2 %vm184_vm14, %v4425_v20 }
 0x214   :  { %v313_v25 = vpop.permute.xlu2 %312 }
 0x215   :  { %3875 = vmatpush.xpose.msk.msrb.mxu1 %vm184_vm14, %v313_v25 }
 0x21a   :  { %v339_v26 = vpop.permute.xlu1 %338  ;;  %v341_v27 = vpop.permute.xlu0 %340 }
 0x21b   :  { %3877 = vmatpush.xpose.msk.msrb.mxu2 %vm184_vm14, %v341_v27 }
 0x21c   :  { %v443_v28 = vpop.permute.xlu2 %442 }
 0x21e   :  { %3878 = vmatmul.msk.f32.vlgmr.msrb.gmra.mxu2 %vm184_vm14, %v339_v26 }
 0x21f   :  { %3881 = vmatpush.xpose.msk.msra.mxu2 %vm184_vm14, %v443_v28 }
 0x222   :  { %v571_v29 = vpop.permute.xlu1 %570  ;;  %v441_v30 = vpop.permute.xlu0 %440 }
 0x224   :  { %v311_v31 = vpop.permute.xlu2 %310 }
 0x225   :  { %3876 = vmatmul.msk.f32.vlgmr.msrb.gmra.mxu1 %vm184_vm14, %v311_v31 }
 0x226   :  { %3882 = vmatmul.msk.f32.vlgmr.msra.gmra.mxu2 %vm184_vm14, %v441_v30 }
 0x22a   :  { %v4056_v32 = vpop.permute.xlu1 %4055  ;;  %v471_v33 = vpop.permute.xlu0 %470 }
 0x22b   :  { %v4058_v34 = vunpack.i.h.bf16 %v4056_v32  ;;  %3883 = vmatpush.xpose.msk.msrb.mxu0 %vm184_vm14, %v471_v33  ;;  %v4057_v35 = vunpack.i.l.bf16 %v4056_v32 }
 0x22c   :  { %v573_v36 = vpop.permute.xlu2 %572 }
 0x22d   :  { %279 = vmatpush.msrb.mxu3 %v4057_v35  ;;  %3887 = vmatpush.xpose.msk.msrb.mxu2 %vm184_vm14, %v573_v36 }
 0x22f   :  { %305 = vmatpush.msra.mxu3 %v4058_v34 }
 0x230   :  { %3888 = vmatmul.msk.f32.vlgmr.msrb.gmra.mxu2 %vm184_vm14, %v571_v29 }
 0x285   :  { %v206_v38 = vpop.f32.mrf.mxu1 }
 0x286   :  { %v207_v39 = vadd.f32 %v206_v38, %v20_v37 }
 0x288   :  { %v236_v40 = vsel %vm184_vm14, %v207_v39, -inf }
 0x289   :  { %237 = vmax.xlane.f32.xlu0 %v236_v40 }
 0x293   :  { %v233_v42 = vpop.f32.mrf.mxu2 }
 0x294   :  { %v234_v43 = vadd.f32 %v233_v42, %v4476_v41 }
 0x296   :  { %v239_v44 = vsel %vm184_vm14, %v234_v43, -inf }
 0x297   :  { %240 = vmax.xlane.f32.xlu2 %v239_v44 }
 0x2a1   :  { %v4480_v45 = vpop.f32.mrf.mxu2 }
 0x2a2   :  { %v335_v46 = vpop.f32.mrf.mxu1  ;;  %v4507_v23 = vadd.f32 %v4480_v45, %v4476_v41 }
 0x2a3   :  { %v336_v47 = vadd.f32 %v335_v46, %v20_v37 }
 0x2a4   :  { %v369_v24 = vsel %vm184_vm14, %v4507_v23, -inf }
 0x2a5   :  { %v366_v48 = vsel %vm184_vm14, %v336_v47, -inf }
 0x2a6   :  { %367 = vmax.xlane.f32.xlu1 %v366_v48 }
 0x2a9   :  { %v465_v49 = vpop.f32.mrf.mxu2 }
 0x2aa   :  { %v466_v50 = vadd.f32 %v465_v49, %v20_v37 }
 0x2ac   :  { %v496_v51 = vsel %vm184_vm14, %v466_v50, -inf }
 0x2ad   :  { %497 = vmax.xlane.f32.xlu0 %v496_v51 }
 0x2b3   :  { %v595_v52 = vpop.f32.mrf.mxu2 }
 0x2b4   :  { %v596_v53 = vadd.f32 %v595_v52, %v20_v37 }
 0x2b6   :  { %v626_v54 = vsel %vm184_vm14, %v596_v53, -inf }
 0x2b7   :  { %627 = vmax.xlane.f32.xlu2 %v626_v54 }
 0x2bf   :  { %598 = vrot.lane.b32.xlu1 %v4425_v20, %s4341_s6 }
 0x2c1   :  { %600 = vrot.lane.b32.xlu0 %v4425_v20, %s4345_s10 }
 0x2cf   :  { %468 = vrot.lane.b32.xlu2 %v4425_v20, %s4342_s7 }
 0x2fc   :  { %v238_v55 = vpop.xlane.xlu0 %237 }
 0x2fd   :  { %v242_v56 = vsub.f32 %v207_v39, %v238_v55 }
 0x2ff   :  { %v244_v57 = vmul.f32 1.442695, %v242_v56 }
 0x301   :  { %4127 = vpow2.f32 %v244_v57 }
 0x307   :  { %v4128_v58 = vpop.eup %4127 }
 0x308   :  { %v248_v59 = vsel %vm184_vm14, %v4128_v58, 0.0 }
 0x309   :  { %249 = vadd.xlane.f32.xlu1 %v248_v59 }
 0x30a   :  { %v241_v60 = vpop.xlane.xlu2 %240 }
 0x30b   :  { %v243_v61 = vsub.f32 %v234_v43, %v241_v60 }
 0x30d   :  { %v246_v62 = vmul.f32 1.442695, %v243_v61 }
 0x30f   :  { %4129 = vpow2.f32 %v246_v62 }
 0x315   :  { %v4130_v63 = vpop.eup %4129 }
 0x316   :  { %v251_v0 = vsel %vm184_vm14, %v4130_v63, 0.0 }
 0x317   :  { %252 = vadd.xlane.f32.xlu2 %v251_v0 }
 0x319   :  { %v368_v2 = vpop.xlane.xlu1 %367 }
 0x31a   :  { %v372_v3 = vsub.f32 %v336_v47, %v368_v2 }
 0x31c   :  { %v374_v4 = vmul.f32 1.442695, %v372_v3 }
 0x31e   :  { %4131 = vpow2.f32 %v374_v4  ;;  %v31_v4 = vld [vmem:[%s5694_s2 + $0x38] sm:$0xff] }
 0x31f   :  { %750 = vmatpush.msra.mxu2 %v31_v4 }
 0x320   :  { %v498_v5 = vpop.xlane.xlu0 %497 }
 0x321   :  { %v502_v6 = vsub.f32 %v466_v50, %v498_v5  ;;  %v30_v5 = vld [vmem:[%s5694_s2 + $0x30] sm:$0xff] }
 0x322   :  { %388 = vrot.lane.b32.xlu1 %v4427_v22, %s4346_s15  ;;  %751 = vmatpush.msra.mxu2 %v30_v5 }
 0x323   :  { %v504_v7 = vmul.f32 1.442695, %v502_v6 }
 0x324   :  { %v4132_v8 = vpop.eup %4131 }
 0x325   :  { %4133 = vpow2.f32 %v504_v7  ;;  %v378_v9 = vsel %vm184_vm14, %v4132_v8, 0.0 }
 0x326   :  { %379 = vadd.xlane.f32.xlu0 %v378_v9  ;;  %v28_v9 = vld [vmem:[%s5694_s2 + $0x20] sm:$0xff] }
 0x32a   :  { %v628_v11 = vpop.xlane.xlu2 %627 }
 0x32b   :  { %v4134_v12 = vpop.eup %4133  ;;  %v632_v16 = vsub.f32 %v596_v53, %v628_v11 }
 0x32c   :  { %v508_v13 = vsel %vm184_vm14, %v4134_v12, 0.0 }
 0x32d   :  { %509 = vadd.xlane.f32.xlu2 %v508_v13  ;;  %v634_v19 = vmul.f32 1.442695, %v632_v16 }
 0x32f   :  { %4135 = vpow2.f32 %v634_v19 }
 0x331   :  { %v599_v17 = vpop.permute.xlu1 %598 }
 0x332   :  { %v469_v14 = vpop.permute.xlu2 %468 }
 0x333   :  { %3884 = vmatmul.msk.f32.vlgmr.msrb.gmra.mxu0 %vm184_vm14, %v469_v14  ;;  %v601_v15 = vpop.permute.xlu0 %600 }
 0x334   :  { %3889 = vmatpush.xpose.msk.msra.mxu0 %vm184_vm14, %v601_v15 }
 0x335   :  { %v4136_v21 = vpop.eup %4135 }
 0x336   :  { %v638_v18 = vsel %vm184_vm14, %v4136_v21, 0.0 }
 0x33a   :  { %518 = vrot.lane.b32.xlu0 %v4427_v22, %s4347_s16 }
 0x33b   :  { %3890 = vmatmul.msk.f32.vlgmr.msra.gmra.mxu0 %vm184_vm14, %v599_v17 }
 0x345   :  { %648 = vrot.lane.b32.xlu2 %v4427_v22, %s4348_s17 }
 0x34c   :  { %639 = vadd.xlane.f32.xlu1 %v638_v18 }
 0x354   :  { %370 = vmax.xlane.f32.xlu1 %v369_v24 }
 0x37c   :  { %v250_v25 = vpop.xlane.xlu1 %249 }
 0x37d   :  { %4137 = vrcp.f32 %v250_v25 }
 0x383   :  { %v4138_v26 = vpop.eup %4137 }
 0x384   :  { %v256_v27 = vmul.f32 %v4138_v26, %v4128_v58 }
 0x386   :  { %3873 = vmatmul.msk.f32.vlgmr.msrb.gmra.mxu3 %vm184_vm14, %v256_v27 }
 0x38a   :  { %v253_v28 = vpop.xlane.xlu2 %252 }
 0x38b   :  { %4139 = vrcp.f32 %v253_v28 }
 0x391   :  { %v4140_v22 = vpop.eup %4139 }
 0x392   :  { %v257_v29 = vmul.f32 %v4140_v22, %v4130_v63  ;;  %v4557_v22 = vld [vmem:[%s5694_s2 + $0xe1] ss:$0 sm:$0xff] }
 0x394   :  { %3874 = vmatmul.msk.f32.vlgmr.msra.gmra.mxu3 %vm184_vm14, %v257_v29  ;;  %v389_v30 = vpop.permute.xlu1 %388 }
 0x395   :  { %409 = vmatpush.msrb.mxu3 %v389_v30 }
 0x399   :  { %v380_v31 = vpop.xlane.xlu0 %379 }
 0x39a   :  { %4141 = vrcp.f32 %v380_v31 }
 0x3a0   :  { %v4142_v32 = vpop.eup %4141  ;;  %v510_v33 = vpop.xlane.xlu2 %509 }
 0x3a1   :  { %v386_v34 = vmul.f32 %v4142_v32, %v4132_v8  ;;  %4143 = vrcp.f32 %v510_v33  ;;  %v29_v8 = vld [vmem:[%s5694_s2 + $0x28] sm:$0xff] }
 0x3a2   :  { %752 = vmatpush.msra.mxu2 %v29_v8 }
 0x3a3   :  { %3879 = vmatmul.msk.f32.vlgmr.msrb.gmra.mxu3 %vm184_vm14, %v386_v34 }
 0x3a4   :  { %753 = vmatpush.msra.mxu2 %v28_v9 }
 0x3a7   :  { %v4144_v35 = vpop.eup %4143 }
 0x3a8   :  { %v516_v36 = vmul.f32 %v4144_v35, %v4134_v12  ;;  %v649_v38 = vpop.permute.xlu2 %648 }
 0x3ac   :  { %v519_v37 = vpop.permute.xlu0 %518 }
 0x3ad   :  { %539 = vmatpush.msra.mxu3 %v519_v37  ;;  %v37_v37 = vld [vmem:[%s5694_s2 + $0x68] sm:$0xff] }
 0x3ae   :  { %3885 = vmatmul.msk.f32.vlgmr.msra.gmra.mxu3 %vm184_vm14, %v516_v36  ;;  %v38_v36 = vld [vmem:[%s5694_s2 + $0x70] sm:$0xff] }
 0x3af   :  { %669 = vmatpush.msrb.mxu3 %v649_v38  ;;  %v36_v38 = vld [vmem:[%s5694_s2 + $0x60] sm:$0xff] }
 0x3b0   :  { %v493_v39 = vpop.f32.mrf.mxu0 }
 0x3b1   :  { %v494_v40 = vadd.f32 %v493_v39, %v4476_v41  ;;  %v17_v39 = vld [vmem:[%s5692_s0 + $0x10] sm:$0xff] }
 0x3b3   :  { %v499_v42 = vsel %vm184_vm14, %v494_v40, -inf }
 0x3b4   :  { %500 = vmax.xlane.f32.xlu0 %v499_v42  ;;  %v19_v42 = vld [vmem:[%s5692_s0 + $0x20] sm:$0xf] }
 0x3b8   :  { %v623_v43 = vpop.f32.mrf.mxu0 }
 0x3b9   :  { %v624_v44 = vadd.f32 %v623_v43, %v4476_v41 }
 0x3bb   :  { %v629_v45 = vsel %vm184_vm14, %v624_v44, -inf }
 0x3bc   :  { %630 = vmax.xlane.f32.xlu1 %v629_v45 }
 0x3bf   :  { %v640_v46 = vpop.xlane.xlu1 %639 }
 0x3c0   :  { %4145 = vrcp.f32 %v640_v46 }
 0x3c6   :  { %v4146_v47 = vpop.eup %4145 }
 0x3c7   :  { %v646_v48 = vmul.f32 %v4146_v47, %v4136_v21  ;;  %v371_v52 = vpop.xlane.xlu1 %370 }
 0x3c8   :  { %414 = vrot.lane.b32.xlu0 %v4425_v20, %s4346_s15  ;;  %v373_v2 = vsub.f32 %v4507_v23, %v371_v52 }
 0x3c9   :  { %3891 = vmatmul.msk.f32.vlgmr.msrb.gmra.mxu3 %vm184_vm14, %v646_v48 }
 0x3ca   :  { %v376_v3 = vmul.f32 1.442695, %v373_v2 }
 0x409   :  { %v281_v49 = vpop.f32.mrf.mxu3 }
 0x417   :  { %v4522_v50 = vpop.f32.mrf.mxu3 }
 0x426   :  { %v411_v51 = vpop.f32.mrf.mxu3 }
 0x427   :  { %702 = vrot.lane.b32.xlu2 %v411_v51, %s4349_s18  ;;  %v501_v55 = vpop.xlane.xlu0 %500 }
 0x428   :  { %v503_v60 = vsub.f32 %v494_v40, %v501_v55  ;;  %v18_v40 = vld [vmem:[%s5692_s0 + $0x18] sm:$0xff] }
 0x42a   :  { %v506_v62 = vmul.f32 1.442695, %v503_v60 }
 0x42f   :  { %v631_v41 = vpop.xlane.xlu1 %630 }
 0x430   :  { %v633_v53 = vsub.f32 %v624_v44, %v631_v41 }
 0x431   :  { %v541_v54 = vpop.f32.mrf.mxu3 }
 0x432   :  { %v636_v56 = vmul.f32 1.442695, %v633_v53  ;;  %710 = vrot.lane.b32.xlu1 %v541_v54, %s4350_s19  ;;  %v4093_v54 = vld [vmem:[%s5694_s2 + $0xe3] ss:$0 sm:$0xff] }
 0x434   :  { %4147 = vpow2.f32 %v636_v56  ;;  %v35_v56 = vld [vmem:[%s5694_s2 + $0x58] sm:$0xff] }
 0x435   :  { %4149 = vpow2.f32 %v506_v62  ;;  %869 = vmatpush.msrb.mxu0 %v35_v56  ;;  %v32_v62 = vld [vmem:[%s5694_s2 + $0x40] sm:$0xff] }
 0x436   :  { %4151 = vpow2.f32 %v376_v3 }
 0x43a   :  { %v4148_v57 = vpop.eup %4147  ;;  %v415_v58 = vpop.permute.xlu0 %414 }
 0x43b   :  { %435 = vmatpush.msra.mxu1 %v415_v58  ;;  %v641_v59 = vsel %vm184_vm14, %v4148_v57, 0.0  ;;  %v4150_v63 = vpop.eup %4149  ;;  %v33_v58 = vld [vmem:[%s5694_s2 + $0x48] sm:$0xff] }
 0x43c   :  { %642 = vadd.xlane.f32.xlu0 %v641_v59  ;;  %v511_v0 = vsel %vm184_vm14, %v4150_v63, 0.0  ;;  %v4152_v6 = vpop.eup %4151 }
 0x43d   :  { %v381_v7 = vsel %vm184_vm14, %v4152_v6, 0.0 }
 0x44c   :  { %v671_v61 = vpop.f32.mrf.mxu3 }
 0x44d   :  { %718 = vrot.lane.b32.xlu2 %v671_v61, %s4351_s20 }
 0x45c   :  { %512 = vadd.xlane.f32.xlu1 %v511_v0 }
 0x475   :  { %674 = vrot.lane.b32.xlu1 %v4425_v20, %s4348_s17 }
 0x476   :  { %382 = vadd.xlane.f32.xlu2 %v381_v7 }
 0x481   :  { %v703_v11 = vpop.permute.xlu2 %702 }
 0x482   :  { %v724_v13 = vsel %vm184_vm14, %v281_v49, %v703_v11 }
 0x48e   :  { %544 = vrot.lane.b32.xlu2 %v4425_v20, %s4347_s16 }
 0x4a4   :  { %v711_v12 = vpop.permute.xlu1 %710 }
 0x4a5   :  { %v727_v14 = vsel %vm726_vm15, %v724_v13, %v711_v12 }
 0x4a7   :  { %v719_v15 = vpop.permute.xlu2 %718 }
 0x4a8   :  { %v730_v16 = vsel %vm729_vm1, %v727_v14, %v719_v15 }
 0x4a9   :  { %3893 = vmatmul.msk.f32.vlgmr.msra.gmra.mxu2 %vm61_vm0, %v730_v16 }
 0x4af   :  { %v643_v24 = vpop.xlane.xlu0 %642 }
 0x4cf   :  { %v513_v19 = vpop.xlane.xlu1 %512 }
 0x4e7   :  { %v675_v23 = vpop.permute.xlu1 %674 }
 0x4e9   :  { %v383_v17 = vpop.xlane.xlu2 %382 }
 0x4ea   :  { %4153 = vrcp.f32 %v383_v17 }
 0x4eb   :  { %4155 = vrcp.f32 %v513_v19 }
 0x4ec   :  { %4157 = vrcp.f32 %v643_v24 }
 0x4f0   :  { %v4154_v21 = vpop.eup %4153 }
 0x4f1   :  { %v387_v18 = vmul.f32 %v4154_v21, %v4152_v6  ;;  %v545_v20 = vpop.permute.xlu2 %544  ;;  %v4156_v25 = vpop.eup %4155 }
 0x4f2   :  { %565 = vmatpush.msrb.mxu1 %v545_v20  ;;  %v517_v26 = vmul.f32 %v4156_v25, %v4150_v63  ;;  %v4158_v27 = vpop.eup %4157 }
 0x4f3   :  { %3880 = vmatmul.msk.f32.vlgmr.msra.gmra.mxu1 %vm184_vm14, %v387_v18  ;;  %v647_v28 = vmul.f32 %v4158_v27, %v4148_v57 }
 0x4f4   :  { %695 = vmatpush.msra.mxu1 %v675_v23 }
 0x4fb   :  { %3886 = vmatmul.msk.f32.vlgmr.msrb.gmra.mxu1 %vm184_vm14, %v517_v26 }
 0x503   :  { %3892 = vmatmul.msk.f32.vlgmr.msra.gmra.mxu1 %vm184_vm14, %v647_v28 }
 0x52c   :  { %v755_v29 = vpop.f32.mrf.mxu2 }
 0x52d   :  { %v761_v30 = vadd.f32 %v755_v29, %v4380_v1  ;;  %v39_v1 = vld [vmem:[%s5694_s2 + $0x78] sm:$0xff] }
 0x52e   :  { %902 = vmatpush.msra.mxu3 %v39_v1 }
 0x52f   :  { %v4561_v31 = vadd.f32 %v4557_v22, %v761_v30 }
 0x530   :  { %903 = vmatpush.msra.mxu3 %v38_v36 }
 0x531   :  { %v768_v32 = vsel %vm61_vm0, %v4561_v31, 0.0 }
 0x532   :  { %769 = vadd.xlane.f32.xlu2 %v768_v32  ;;  %904 = vmatpush.msra.mxu3 %v37_v37 }
 0x534   :  { %905 = vmatpush.msra.mxu3 %v36_v38  ;;  %v4673_v38 = vld [vmem:[%s5694_s2 + $0xea] ss:$0 sm:$0xff] }
 0x535   :  { %3897 = vmatmul.msk.f32.vlgmr.msra.gmra.mxu3 %vm61_vm0, %v17_v39 }
 0x53d   :  { %3898 = vmatmul.msk.f32.gmra.mxu3 %vm61_vm0, %v18_v40 }
 0x545   :  { %3899 = vmatmul.msk.f32.gmra.mxu3 %vm61_vm0, %v19_v42  ;;  %v4681_v42 = vld [vmem:[%s5694_s2 + $0xeb] ss:$0 sm:$0xff] }
 0x570   :  { %v437_v33 = vpop.f32.mrf.mxu1 }
 0x571   :  { %704 = vrot.lane.b32.xlu0 %v437_v33, %s4349_s18 }
 0x578   :  { %v567_v34 = vpop.f32.mrf.mxu1 }
 0x579   :  { %712 = vrot.lane.b32.xlu1 %v567_v34, %s4350_s19 }
 0x580   :  { %v697_v35 = vpop.f32.mrf.mxu1 }
 0x581   :  { %720 = vrot.lane.b32.xlu1 %v697_v35, %s4351_s20 }
 0x5a5   :  { %v770_v43 = vpop.xlane.xlu2 %769 }
 0x5a6   :  { %v774_v44 = vmul.f32 %v770_v43, %v4385_v10 }
 0x5a8   :  { %v4594_v45 = vsub.f32 %v4561_v31, %v774_v44 }
 0x5aa   :  { %v778_v46 = vmul.f32 %v4594_v45, %v4594_v45 }
 0x5ac   :  { %v780_v47 = vsel %vm61_vm0, %v778_v46, 0.0 }
 0x5ad   :  { %781 = vadd.xlane.f32.xlu1 %v780_v47 }
 0x5b8   :  { %v907_v55 = vpop.f32.mrf.mxu3 }
 0x5b9   :  { %v4613_v57 = vadd.f32 %v4093_v54, %v907_v55 }
 0x5bb   :  { %v4619_v59 = vrot.slane %v4613_v57, 2  ;;  %v4622_v60 = vrot.slane %v4613_v57, 4  ;;  %v4625_v61 = vrot.slane %v4613_v57, 6  ;;  %926 = vst [vmem:[#allocation1] ss:$4 sm:$0xff] %v4613_v57 }
 0x5bd   :  { %928 = vst [vmem:[#allocation1 + $0x1] ss:$4 sm:$0xff] %v4619_v59 }
 0x5be   :  { %930 = vst [vmem:[#allocation1 + $0x2] ss:$4 sm:$0xff] %v4622_v60 }
 0x5bf   :  { %932 = vst [vmem:[#allocation1 + $0x3] ss:$4 sm:$0xff] %v4625_v61 }
 0x5c0   :  { %v910_v2 = vpop.f32.mrf.mxu3 }
 0x5c1   :  { %v4634_v3 = vadd.f32 %v4093_v54, %v910_v2 }
 0x5c3   :  { %v4637_v4 = vrot.slane %v4634_v3, 2  ;;  %934 = vst [vmem:[#allocation1 + $0x20] ss:$4 sm:$0xff] %v4634_v3  ;;  %v4641_v5 = vrot.slane %v4634_v3, 4  ;;  %v4644_v6 = vrot.slane %v4634_v3, 6 }
 0x5c6   :  { %v935_v8 = vld.sshfl [vmem:[#allocation1] sm:$0xff pattern:$0x73625140] }
 0x5c7   :  { %964 = vst [vmem:[#allocation1] ss:$4 sm:$0xff] %v4637_v4 }
 0x5c8   :  { %966 = vst [vmem:[#allocation1 + $0x1] ss:$4 sm:$0xff] %v4641_v5  ;;  %v913_v15 = vpop.f32.mrf.mxu3 }
 0x5c9   :  { %968 = vst [vmem:[#allocation1 + $0x2] ss:$4 sm:$0xff] %v4644_v6  ;;  %v4650_v17 = vadd.f32 %v4093_v54, %v913_v15  ;;  %v4303_v54 = vld [vmem:[%s5692_s0 + $0x8] sm:$0xff] }
 0x5ca   :  { %v936_v12 = vld.sshfl [vmem:[#allocation1 + $0x20] sm:$0xff pattern:$0x73625140] }
 0x5cb   :  { %3900 = vmatpush.xpose.msk.msrb.mxu1 %vm184_vm14, %v936_v12  ;;  %v4654_v21 = vrot.slane %v4650_v17, 2  ;;  %970 = vst [vmem:[#allocation1 + $0x3] ss:$4 sm:$0xff] %v4650_v17 }
 0x5cd   :  { %972 = vst [vmem:[#allocation1 + $0x20] ss:$4 sm:$0xff] %v4654_v21 }
 0x5cf   :  { %3901 = vmatpush.xpose.msk.msrb.mxu1 %vm184_vm14, %v935_v8 }
 0x5d2   :  { %v973_v25 = vld.sshfl [vmem:[#allocation1] sm:$0xff pattern:$0x73625140] }
 0x5d3   :  { %1025 = vst [vmem:[#allocation1] ss:$4 sm:$0xff] %v4613_v57 }
 0x5d4   :  { %v974_v26 = vld.sshfl [vmem:[#allocation1 + $0x20] sm:$0xff pattern:$0x73625140]  ;;  %1027 = vst [vmem:[#allocation1 + $0x1] ss:$4 sm:$0xff] %v4619_v59 }
 0x5d5   :  { %1029 = vst [vmem:[#allocation1 + $0x2] ss:$4 sm:$0xff] %v4622_v60  ;;  %3903 = vmatpush.xpose.msk.msra.mxu1 %vm184_vm14, %v974_v26 }
 0x5d6   :  { %1031 = vst [vmem:[#allocation1 + $0x3] ss:$4 sm:$0xff] %v4625_v61 }
 0x5d7   :  { %1033 = vst [vmem:[#allocation1 + $0x20] ss:$4 sm:$0xff] %v4634_v3 }
 0x5d9   :  { %3904 = vmatpush.xpose.msk.msra.mxu1 %vm184_vm14, %v973_v25 }
 0x5dd   :  { %v1034_v34 = vld.sshfl [vmem:[#allocation1] sm:$0xff pattern:$0x73625140] }
 0x5de   :  { %1067 = vst [vmem:[#allocation1] ss:$4 sm:$0xff] %v4637_v4  ;;  %1036 = vrot.lane.b32.xlu1 %v1034_v34, %s4340_s5  ;;  %v4667_v36 = vld.sshfl [vmem:[#allocation1 + $0x20] sm:$0xff pattern:$0x73625140] }
 0x5df   :  { %1069 = vst [vmem:[#allocation1 + $0x1] ss:$4 sm:$0xff] %v4641_v5 }
 0x5e0   :  { %1071 = vst [vmem:[#allocation1 + $0x2] ss:$4 sm:$0xff] %v4644_v6 }
 0x5e1   :  { %1073 = vst [vmem:[#allocation1 + $0x3] ss:$4 sm:$0xff] %v4650_v17 }
 0x5e2   :  { %1075 = vst [vmem:[#allocation1 + $0x20] ss:$4 sm:$0xff] %v4654_v21 }
 0x5e3   :  { %v705_v49 = vpop.permute.xlu0 %704 }
 0x5e4   :  { %v725_v51 = vsel %vm184_vm14, %v4522_v50, %v705_v49  ;;  %v34_v50 = vld [vmem:[%s5694_s2 + $0x50] sm:$0xff] }
 0x5e5   :  { %870 = vmatpush.msrb.mxu0 %v34_v50 }
 0x5e7   :  { %871 = vmatpush.msrb.mxu0 %v33_v58 }
 0x5e8   :  { %v4687_v46 = vld.sshfl [vmem:[#allocation1] sm:$0xff pattern:$0x73625140] }
 0x5e9   :  { %872 = vmatpush.msrb.mxu0 %v32_v62  ;;  %1110 = vst [vmem:[#allocation1] ss:$4 sm:$0xff] %v4613_v57  ;;  %v4690_v47 = vld.sshfl [vmem:[#allocation1 + $0x20] sm:$0xff pattern:$0x73625140] }
 0x5ea   :  { %1112 = vst [vmem:[#allocation1 + $0x1] ss:$4 sm:$0xff] %v4619_v59 }
 0x5eb   :  { %v713_v48 = vpop.permute.xlu1 %712  ;;  %1114 = vst [vmem:[#allocation1 + $0x2] ss:$4 sm:$0xff] %v4622_v60 }
 0x5ec   :  { %v728_v52 = vsel %vm726_vm15, %v725_v51, %v713_v48  ;;  %1116 = vst [vmem:[#allocation1 + $0x3] ss:$4 sm:$0xff] %v4625_v61 }
 0x5ed   :  { %1118 = vst [vmem:[#allocation1 + $0x20] ss:$4 sm:$0xff] %v4634_v3 }
 0x5f3   :  { %v721_v41 = vpop.permute.xlu1 %720 }
 0x5f4   :  { %v731_v53 = vsel %vm729_vm1, %v728_v52, %v721_v41  ;;  %v4698_v48 = vld.sshfl [vmem:[#allocation1 + $0x20] sm:$0xff pattern:$0x73625140] }
 0x5f5   :  { %3894 = vmatmul.msk.f32.gmra.mxu2 %vm61_vm0, %v731_v53  ;;  %1161 = vst [vmem:[#allocation1 + $0x20] ss:$4 sm:$0xff] %v4654_v21 }
 0x5fc   :  { %v1163_v51 = vld.sshfl [vmem:[#allocation1 + $0x20] sm:$0xff pattern:$0x73625140] }
 0x5fd   :  { %1224 = vst [vmem:[#allocation1 + $0x20] ss:$4 sm:$0xff] %v4634_v3 }
 0x604   :  { %v4712_v41 = vld.sshfl [vmem:[#allocation1 + $0x20] sm:$0xff pattern:$0x73625140] }
 0x605   :  { %1265 = vst [vmem:[#allocation1 + $0x20] ss:$4 sm:$0xff] %v4654_v21 }
 0x60c   :  { %v4729_v62 = vld.sshfl [vmem:[#allocation1 + $0x20] sm:$0xff pattern:$0x73625140] }
 0x60d   :  { %1308 = vst [vmem:[#allocation1 + $0x20] ss:$4 sm:$0xff] %v4634_v3 }
 0x620   :  { %v782_v63 = vpop.xlane.xlu1 %781 }
 0x621   :  { %v786_v0 = vmul.f32 0.032258064, %v782_v63  ;;  %v1310_v63 = vld.sshfl [vmem:[#allocation1 + $0x20] sm:$0xff pattern:$0x73625140] }
 0x622   :  { %1351 = vst [vmem:[#allocation1 + $0x20] ss:$4 sm:$0xff] %v4654_v21 }
 0x623   :  { %4159 = vrsqrt.f32 %v786_v0  ;;  %vm795_vm2 = vcmp.eq.f32.partialorder %v786_v0, inf  ;;  %v798_v18 = vand.u32 2147483648, %v786_v0  ;;  %vm797_vm3 = vcmp.eq.f32.partialorder %v786_v0, 0.0 }
 0x629   :  { %v4160_v7 = vpop.eup %4159  ;;  %v1353_v2 = vld.sshfl [vmem:[#allocation1 + $0x20] sm:$0xff pattern:$0x73625140] }
 0x62a   :  { %v789_v9 = vmul.f32 %v4160_v7, %v786_v0  ;;  %1414 = vst [vmem:[#allocation1 + $0x20] ss:$4 sm:$0xff] %v4634_v3 }
 0x62c   :  { %v790_v11 = vmul.f32 %v4160_v7, %v789_v9 }
 0x62e   :  { %v791_v13 = vmul.f32 0.5, %v790_v11 }
 0x630   :  { %v792_v14 = vsub.f32 1.5, %v791_v13 }
 0x631   :  { %v4752_v8 = vld.sshfl [vmem:[#allocation1 + $0x20] sm:$0xff pattern:$0x73625140] }
 0x632   :  { %v793_v16 = vmul.f32 %v4160_v7, %v792_v14  ;;  %1455 = vst [vmem:[#allocation1 + $0x20] ss:$4 sm:$0xff] %v4654_v21 }
 0x634   :  { %v794_v19 = vmul.f32 %v793_v16, %v786_v0 }
 0x636   :  { %v796_v20 = vsel %vm795_vm2, %v786_v0, %v794_v19  ;;  %vm1044_vm2 = vcmask 1041408  }
 0x637   :  { %v799_v23 = vsel %vm797_vm3, %v798_v18, %v796_v20  ;;  %vm1002_vm3 = vcmask 80896  }
 0x638   :  { %v812_v24 = vadd.f32 1e-06, %v799_v23 }
 0x639   :  { %v4763_v11 = vld.sshfl [vmem:[#allocation1 + $0x20] sm:$0xff pattern:$0x73625140] }
 0x63a   :  { %4161 = vrcp.f32 %v812_v24  ;;  %v825_v30 = vand.u32 2147483648, %v812_v24  ;;  %v823_v33 = vand.u32 2147483647, %v812_v24  ;;  %vm819_vm5 = vweird.f32 %v812_v24  ;;  %1498 = vst [vmem:[#allocation1 + $0x20] ss:$4 sm:$0xff] %v4634_v3 }
 0x63c   :  { %v826_v1 = vor.u32 1.1754944e-38, %v825_v30  ;;  %vm824_vm7 = vcmp.eq.f32.partialorder %v823_v33, 8.507059e+37 }
 0x640   :  { %v4162_v27 = vpop.eup %4161 }
 0x641   :  { %v815_v28 = vmul.f32 %v4162_v27, %v812_v24  ;;  %vm820_vm4 = vweird.f32 %v4162_v27  ;;  %v1500_v13 = vld.sshfl [vmem:[#allocation1 + $0x20] sm:$0xff pattern:$0x73625140] }
 0x642   :  { %vm821_vm6 = vmor %vm819_vm5, %vm820_vm4  ;;  %1541 = vst [vmem:[#allocation1 + $0x20] ss:$4 sm:$0xff] %v4654_v21 }
 0x643   :  { %v816_v29 = vsub.f32 1.0, %v815_v28 }
 0x645   :  { %v817_v32 = vmul.f32 %v4162_v27, %v816_v29 }
 0x647   :  { %v818_v35 = vadd.f32 %v4162_v27, %v817_v32 }
 0x649   :  { %v822_v37 = vsel %vm821_vm6, %v4162_v27, %v818_v35  ;;  %v1543_v15 = vld.sshfl [vmem:[#allocation1 + $0x20] sm:$0xff pattern:$0x73625140]  ;;  %vm1858_vm6 = vcmask 523264  }
 0x64a   :  { %v827_v39 = vsel %vm824_vm7, %v826_v1, %v822_v37  ;;  %1604 = vst [vmem:[#allocation1 + $0x20] ss:$4 sm:$0xff] %v4634_v3 }
 0x64b   :  { %v842_v40 = vmul.f32 %v827_v39, %v4594_v45  ;;  %v1119_v45 = vld.sshfl [vmem:[#allocation1] sm:$0xff pattern:$0x73625140] }
 0x64c   :  { %1153 = vst [vmem:[#allocation1] ss:$4 sm:$0xff] %v4637_v4  ;;  %1121 = vrot.lane.b32.xlu1 %v1119_v45, %s4339_s4 }
 0x64d   :  { %v845_v43 = vmul.f32 %v4673_v38, %v842_v40  ;;  %1155 = vst [vmem:[#allocation1 + $0x1] ss:$4 sm:$0xff] %v4641_v5 }
 0x64e   :  { %1157 = vst [vmem:[#allocation1 + $0x2] ss:$4 sm:$0xff] %v4644_v6 }
 0x64f   :  { %v848_v44 = vadd.f32 %v4681_v42, %v845_v43  ;;  %1159 = vst [vmem:[#allocation1 + $0x3] ss:$4 sm:$0xff] %v4650_v17 }
 0x650   :  { %v1037_v28 = vpop.permute.xlu1 %1036 }
 0x651   :  { %3895 = vmatmul.msk.f32.vlgmr.msrb.gmra.mxu0 %vm61_vm0, %v848_v44 }
 0x654   :  { %1313 = vrot.lane.b32.xlu1 %v1310_v63, %s4342_s7 }
 0x656   :  { %v1162_v49 = vld.sshfl [vmem:[#allocation1] sm:$0xff pattern:$0x73625140] }
 0x657   :  { %1216 = vst [vmem:[#allocation1] ss:$4 sm:$0xff] %v4613_v57 }
 0x658   :  { %1218 = vst [vmem:[#allocation1 + $0x1] ss:$4 sm:$0xff] %v4619_v59 }
 0x659   :  { %1220 = vst [vmem:[#allocation1 + $0x2] ss:$4 sm:$0xff] %v4622_v60 }
 0x65a   :  { %1222 = vst [vmem:[#allocation1 + $0x3] ss:$4 sm:$0xff] %v4625_v61 }
 0x661   :  { %v4709_v52 = vld.sshfl [vmem:[#allocation1] sm:$0xff pattern:$0x73625140] }
 0x662   :  { %1257 = vst [vmem:[#allocation1] ss:$4 sm:$0xff] %v4637_v4 }
 0x663   :  { %1259 = vst [vmem:[#allocation1 + $0x1] ss:$4 sm:$0xff] %v4641_v5 }
 0x664   :  { %1261 = vst [vmem:[#allocation1 + $0x2] ss:$4 sm:$0xff] %v4644_v6 }
 0x665   :  { %1263 = vst [vmem:[#allocation1 + $0x3] ss:$4 sm:$0xff] %v4650_v17 }
 0x66c   :  { %v4724_v50 = vld.sshfl [vmem:[#allocation1] sm:$0xff pattern:$0x73625140] }
 0x66d   :  { %1300 = vst [vmem:[#allocation1] ss:$4 sm:$0xff] %v4613_v57 }
 0x66e   :  { %1302 = vst [vmem:[#allocation1 + $0x1] ss:$4 sm:$0xff] %v4619_v59 }
 0x66f   :  { %1304 = vst [vmem:[#allocation1 + $0x2] ss:$4 sm:$0xff] %v4622_v60 }
 0x670   :  { %1306 = vst [vmem:[#allocation1 + $0x3] ss:$4 sm:$0xff] %v4625_v61 }
 0x678   :  { %v758_v53 = vpop.f32.mrf.mxu2 }
 0x679   :  { %v762_v55 = vadd.f32 %v4303_v54, %v758_v53 }
 0x67b   :  { %v4722_v56 = vadd.f32 %v4557_v22, %v762_v55  ;;  %v1309_v22 = vld.sshfl [vmem:[#allocation1] sm:$0xff pattern:$0x73625140] }
 0x67c   :  { %1343 = vst [vmem:[#allocation1] ss:$4 sm:$0xff] %v4637_v4  ;;  %1311 = vrot.lane.b32.xlu1 %v1309_v22, %s4342_s7 }
 0x67d   :  { %v771_v58 = vsel %vm61_vm0, %v4722_v56, 0.0  ;;  %1345 = vst [vmem:[#allocation1 + $0x1] ss:$4 sm:$0xff] %v4641_v5 }
 0x67e   :  { %772 = vadd.xlane.f32.xlu0 %v771_v58  ;;  %1347 = vst [vmem:[#allocation1 + $0x2] ss:$4 sm:$0xff] %v4644_v6  ;;  %v4815_v58 = vld.sshfl [vmem:[#allocation1 + $0x20] sm:$0xff pattern:$0x73625140] }
 0x67f   :  { %1349 = vst [vmem:[#allocation1 + $0x3] ss:$4 sm:$0xff] %v4650_v17 }
 0x680   :  { %1645 = vst [vmem:[#allocation1 + $0x20] ss:$4 sm:$0xff] %v4654_v21 }
 0x684   :  { %1503 = vrot.lane.b32.xlu1 %v1500_v13, %s4341_s6 }
 0x686   :  { %v1352_v0 = vld.sshfl [vmem:[#allocation1] sm:$0xff pattern:$0x73625140] }
 0x687   :  { %1406 = vst [vmem:[#allocation1] ss:$4 sm:$0xff] %v4613_v57 }
 0x688   :  { %1408 = vst [vmem:[#allocation1 + $0x1] ss:$4 sm:$0xff] %v4619_v59 }
 0x689   :  { %1410 = vst [vmem:[#allocation1 + $0x2] ss:$4 sm:$0xff] %v4622_v60 }
 0x68a   :  { %1412 = vst [vmem:[#allocation1 + $0x3] ss:$4 sm:$0xff] %v4625_v61 }
 0x691   :  { %v4749_v7 = vld.sshfl [vmem:[#allocation1] sm:$0xff pattern:$0x73625140] }
 0x692   :  { %1166 = vrot.lane.b32.xlu0 %v1163_v51, %s4339_s4  ;;  %1447 = vst [vmem:[#allocation1] ss:$4 sm:$0xff] %v4637_v4 }
 0x693   :  { %1449 = vst [vmem:[#allocation1 + $0x1] ss:$4 sm:$0xff] %v4641_v5 }
 0x694   :  { %1451 = vst [vmem:[#allocation1 + $0x2] ss:$4 sm:$0xff] %v4644_v6 }
 0x695   :  { %1453 = vst [vmem:[#allocation1 + $0x3] ss:$4 sm:$0xff] %v4650_v17 }
 0x69a   :  { %1164 = vrot.lane.b32.xlu0 %v1162_v49, %s4339_s4 }
 0x69c   :  { %v4759_v9 = vld.sshfl [vmem:[#allocation1] sm:$0xff pattern:$0x73625140] }
 0x69d   :  { %1490 = vst [vmem:[#allocation1] ss:$4 sm:$0xff] %v4613_v57 }
 0x69e   :  { %1492 = vst [vmem:[#allocation1 + $0x1] ss:$4 sm:$0xff] %v4619_v59 }
 0x69f   :  { %1494 = vst [vmem:[#allocation1 + $0x2] ss:$4 sm:$0xff] %v4622_v60 }
 0x6a0   :  { %1496 = vst [vmem:[#allocation1 + $0x3] ss:$4 sm:$0xff] %v4625_v61 }
 0x6a2   :  { %1356 = vrot.lane.b32.xlu0 %v1353_v2, %s4342_s7 }
 0x6a7   :  { %v1499_v12 = vld.sshfl [vmem:[#allocation1] sm:$0xff pattern:$0x73625140] }
 0x6a8   :  { %1533 = vst [vmem:[#allocation1] ss:$4 sm:$0xff] %v4637_v4  ;;  %1501 = vrot.lane.b32.xlu1 %v1499_v12, %s4341_s6 }
 0x6a9   :  { %1535 = vst [vmem:[#allocation1 + $0x1] ss:$4 sm:$0xff] %v4641_v5 }
 0x6aa   :  { %1354 = vrot.lane.b32.xlu0 %v1352_v0, %s4342_s7  ;;  %1537 = vst [vmem:[#allocation1 + $0x2] ss:$4 sm:$0xff] %v4644_v6 }
 0x6ab   :  { %1539 = vst [vmem:[#allocation1 + $0x3] ss:$4 sm:$0xff] %v4650_v17 }
 0x6b2   :  { %v1542_v14 = vld.sshfl [vmem:[#allocation1] sm:$0xff pattern:$0x73625140]  ;;  %1546 = vrot.lane.b32.xlu0 %v1543_v15, %s4341_s6 }
 0x6b3   :  { %1596 = vst [vmem:[#allocation1] ss:$4 sm:$0xff] %v4613_v57  ;;  %v4789_v57 = vld [vmem:[%s5694_s2 + $0xe2] ss:$0 sm:$0xff] }
 0x6b4   :  { %1598 = vst [vmem:[#allocation1 + $0x1] ss:$4 sm:$0xff] %v4619_v59 }
 0x6b5   :  { %1600 = vst [vmem:[#allocation1 + $0x2] ss:$4 sm:$0xff] %v4622_v60 }
 0x6b6   :  { %1602 = vst [vmem:[#allocation1 + $0x3] ss:$4 sm:$0xff] %v4625_v61 }
 0x6ba   :  { %1544 = vrot.lane.b32.xlu0 %v1542_v14, %s4341_s6  ;;  %v22_v14 = vld [vmem:[%s5693_s1 + $0x10] sm:$0xff] }
 0x6bd   :  { %v4783_v16 = vld.sshfl [vmem:[#allocation1] sm:$0xff pattern:$0x73625140] }
 0x6be   :  { %1637 = vst [vmem:[#allocation1] ss:$4 sm:$0xff] %v4637_v4  ;;  %v1122_v1 = vpop.permute.xlu1 %1121 }
 0x6bf   :  { %1639 = vst [vmem:[#allocation1 + $0x1] ss:$4 sm:$0xff] %v4641_v5 }
 0x6c0   :  { %1641 = vst [vmem:[#allocation1 + $0x2] ss:$4 sm:$0xff] %v4644_v6 }
 0x6c1   :  { %1643 = vst [vmem:[#allocation1 + $0x3] ss:$4 sm:$0xff] %v4650_v17 }
 0x6c6   :  { %v1314_v0 = vpop.permute.xlu1 %1313 }
 0x6ce   :  { %v874_v59 = vpop.f32.mrf.mxu0 }
 0x6cf   :  { %v4795_v60 = vadd.f32 %v4789_v57, %v874_v59 }
 0x6d1   :  { %3902 = vmatmul.msk.f32.vlgmr.msrb.gmra.mxu1 %vm184_vm14, %v4795_v60  ;;  %1488 = vrot.lane.b32.xlu0 %v4795_v60, %s4341_s6 }
 0x6f1   :  { %v773_v61 = vpop.xlane.xlu0 %772 }
 0x6f2   :  { %v775_v3 = vmul.f32 %v773_v61, %v4385_v10 }
 0x6f4   :  { %v777_v4 = vsub.f32 %v4722_v56, %v775_v3 }
 0x6f6   :  { %v779_v5 = vmul.f32 %v777_v4, %v777_v4 }
 0x6f8   :  { %v783_v6 = vsel %vm61_vm0, %v779_v5, 0.0 }
 0x6f9   :  { %784 = vadd.xlane.f32.xlu2 %v783_v6 }
 0x704   :  { %v1167_v22 = vpop.permute.xlu0 %1166 }
 0x70c   :  { %v1165_v63 = vpop.permute.xlu0 %1164 }
 0x711   :  { %1038 = vrot.lane.b32.xlu2 %v4667_v36, %s4340_s5 }
 0x714   :  { %v1357_v6 = vpop.permute.xlu0 %1356 }
 0x719   :  { %1123 = vrot.lane.b32.xlu2 %v4698_v48, %s4339_s4 }
 0x721   :  { %1108 = vrot.lane.b32.xlu2 %v4795_v60, %s4339_s4 }
 0x74e   :  { %v961_v15 = vpop.f32.mrf.mxu1 }
 0x76c   :  { %v785_v17 = vpop.xlane.xlu2 %784 }
 0x76d   :  { %v787_v19 = vmul.f32 0.032258064, %v785_v17 }
 0x76f   :  { %4163 = vrsqrt.f32 %v787_v19  ;;  %vm807_vm8 = vcmp.eq.f32.partialorder %v787_v19, inf  ;;  %v810_v32 = vand.u32 2147483648, %v787_v19  ;;  %vm809_vm9 = vcmp.eq.f32.partialorder %v787_v19, 0.0 }
 0x774   :  { %v1039_v18 = vpop.permute.xlu2 %1038 }
 0x775   :  { %v4164_v20 = vpop.eup %4163  ;;  %3906 = vmatpush.msk.msrb.mxu2 %vm1044_vm2, %v1039_v18 }
 0x776   :  { %v801_v23 = vmul.f32 %v4164_v20, %v787_v19 }
 0x777   :  { %1062 = vmatpush.msrb.mxu2 %v1037_v28 }
 0x778   :  { %v802_v24 = vmul.f32 %v4164_v20, %v801_v23 }
 0x779   :  { %3913 = vmatpush.xpose.msk.msra.mxu2 %vm184_vm14, %v1167_v22 }
 0x77a   :  { %v803_v25 = vmul.f32 0.5, %v802_v24 }
 0x77c   :  { %v804_v26 = vsub.f32 1.5, %v803_v25  ;;  %v1124_v27 = vpop.permute.xlu2 %1123 }
 0x77d   :  { %3910 = vmatpush.xpose.msk.msrb.mxu1 %vm184_vm14, %v1124_v27  ;;  %3914 = vmatpush.xpose.msk.msra.mxu2 %vm184_vm14, %v1165_v63 }
 0x77e   :  { %v805_v29 = vmul.f32 %v4164_v20, %v804_v26 }
 0x780   :  { %v806_v30 = vmul.f32 %v805_v29, %v787_v19 }
 0x781   :  { %3911 = vmatpush.xpose.msk.msrb.mxu1 %vm184_vm14, %v1122_v1 }
 0x782   :  { %v808_v33 = vsel %vm807_vm8, %v787_v19, %v806_v30  ;;  %v1355_v19 = vpop.permute.xlu0 %1354  ;;  %v23_v30 = vld [vmem:[%s5693_s1 + $0x18] sm:$0xff] }
 0x783   :  { %v811_v34 = vsel %vm809_vm9, %v810_v32, %v808_v33 }
 0x784   :  { %v813_v35 = vadd.f32 1e-06, %v811_v34  ;;  %v1109_v12 = vpop.permute.xlu2 %1108 }
 0x786   :  { %4165 = vrcp.f32 %v813_v35  ;;  %v839_v40 = vand.u32 2147483648, %v813_v35  ;;  %v837_v44 = vand.u32 2147483647, %v813_v35  ;;  %vm833_vm11 = vweird.f32 %v813_v35 }
 0x788   :  { %v840_v48 = vor.u32 1.1754944e-38, %v839_v40  ;;  %vm838_vm13 = vcmp.eq.f32.partialorder %v837_v44, 8.507059e+37 }
 0x78a   :  { %v1547_v20 = vpop.permute.xlu0 %1546 }
 0x78c   :  { %v4166_v36 = vpop.eup %4165 }
 0x78d   :  { %v829_v37 = vmul.f32 %v4166_v36, %v813_v35  ;;  %vm834_vm10 = vweird.f32 %v4166_v36 }
 0x78e   :  { %vm835_vm12 = vmor %vm833_vm11, %vm834_vm10 }
 0x78f   :  { %v830_v39 = vsub.f32 1.0, %v829_v37 }
 0x791   :  { %v831_v43 = vmul.f32 %v4166_v36, %v830_v39 }
 0x792   :  { %v1545_v26 = vpop.permute.xlu0 %1544 }
 0x793   :  { %v832_v45 = vadd.f32 %v4166_v36, %v831_v43 }
 0x795   :  { %v836_v49 = vsel %vm835_vm12, %v4166_v36, %v832_v45 }
 0x796   :  { %v841_v51 = vsel %vm838_vm13, %v840_v48, %v836_v49 }
 0x797   :  { %v843_v53 = vmul.f32 %v841_v51, %v777_v4 }
 0x799   :  { %v846_v54 = vmul.f32 %v4673_v38, %v843_v53  ;;  %v1312_v38 = vpop.permute.xlu1 %1311 }
 0x79a   :  { %v1489_v29 = vpop.permute.xlu0 %1488 }
 0x79b   :  { %v849_v55 = vadd.f32 %v4681_v42, %v846_v54 }
 0x79d   :  { %3896 = vmatmul.msk.f32.gmra.mxu0 %vm61_vm0, %v849_v55 }
 0x7a1   :  { %v1504_v21 = vpop.permute.xlu1 %1503 }
 0x7a9   :  { %v1502_v13 = vpop.permute.xlu1 %1501 }
 0x81a   :  { %v877_v2 = vpop.f32.mrf.mxu0 }
 0x81b   :  { %v878_v42 = vadd.f32 %v4789_v57, %v877_v2  ;;  %v962_v57 = vadd.f32 %v961_v15, %v22_v14  ;;  %v4059_v2 = vpack.i.bf16 %v4724_v50, %v4709_v52 }
 0x81d   :  { %1151 = vrot.lane.b32.xlu2 %v878_v42, %s4339_s4  ;;  %3905 = vmatmul.msk.f32.vlgmr.msra.gmra.mxu1 %vm184_vm14, %v878_v42  ;;  %v1003_v59 = vsel %vm1002_vm3, %v962_v57, -inf }
 0x81e   :  { %3920 = vmatpush.xpose.msk.msra.mxu1 %vm184_vm14, %v1314_v0 }
 0x822   :  { %3921 = vmatpush.xpose.msk.msra.mxu1 %vm184_vm14, %v1312_v38 }
 0x825   :  { %1341 = vrot.lane.b32.xlu2 %v878_v42, %s4342_s7  ;;  %3912 = vmatmul.msk.f32.vlgmr.msrb.gmra.mxu1 %vm184_vm14, %v1109_v12 }
 0x826   :  { %3930 = vmatpush.xpose.msk.msrb.mxu1 %vm184_vm14, %v1504_v21 }
 0x82a   :  { %3931 = vmatpush.xpose.msk.msrb.mxu1 %vm184_vm14, %v1502_v13 }
 0x84e   :  { %1004 = vmax.xlane.f32.xlu2 %v1003_v59 }
 0x866   :  { %1298 = vrot.lane.b32.xlu2 %v4795_v60, %s4342_s7 }
 0x877   :  { %v1152_v17 = vpop.permute.xlu2 %1151 }
 0x87f   :  { %v1342_v18 = vpop.permute.xlu2 %1341 }
 0x89a   :  { %v999_v61 = vpop.f32.mrf.mxu1 }
 0x89b   :  { %v1000_v32 = vadd.f32 %v999_v61, %v23_v30 }
 0x89d   :  { %v1006_v33 = vsel %vm1002_vm3, %v1000_v32, -inf }
 0x8a2   :  { %v1148_v3 = vpop.f32.mrf.mxu1 }
 0x8a3   :  { %v1149_v4 = vadd.f32 %v1148_v3, %v22_v14 }
 0x8a5   :  { %v1194_v5 = vsel %vm1002_vm3, %v1149_v4, -inf }
 0x8a6   :  { %1195 = vmax.xlane.f32.xlu1 %v1194_v5 }
 0x8c1   :  { %v1005_v23 = vpop.xlane.xlu2 %1004 }
 0x8c2   :  { %v1009_v24 = vsub.f32 %v962_v57, %v1005_v23  ;;  %v4064_v23 = vpack.i.bf16 %v4759_v9, %v4749_v7 }
 0x8c4   :  { %v1011_v25 = vmul.f32 1.442695, %v1009_v24 }
 0x8c6   :  { %4167 = vpow2.f32 %v1011_v25  ;;  %v1647_v25 = vld.sshfl [vmem:[#allocation1 + $0x20] sm:$0xff pattern:$0x73625140] }
 0x8c9   :  { %v1299_v27 = vpop.permute.xlu2 %1298 }
 0x8ca   :  { %3922 = vmatmul.msk.f32.vlgmr.msra.gmra.mxu1 %vm184_vm14, %v1299_v27 }
 0x8cc   :  { %v4168_v60 = vpop.eup %4167 }
 0x8cd   :  { %v1015_v28 = vsel %vm1002_vm3, %v4168_v60, 0.0 }
 0x8ce   :  { %1016 = vadd.xlane.f32.xlu2 %v1015_v28 }
 0x8d2   :  { %3932 = vmatmul.msk.f32.vlgmr.msrb.gmra.mxu1 %vm184_vm14, %v1489_v29 }
 0x8e6   :  { %1531 = vrot.lane.b32.xlu2 %v878_v42, %s4341_s6 }
 0x90f   :  { %1007 = vmax.xlane.f32.xlu2 %v1006_v33 }
 0x919   :  { %v1196_v34 = vpop.xlane.xlu1 %1195 }
 0x91a   :  { %v1200_v35 = vsub.f32 %v1149_v4, %v1196_v34 }
 0x91c   :  { %v1202_v36 = vmul.f32 1.442695, %v1200_v35 }
 0x941   :  { %v1017_v1 = vpop.xlane.xlu2 %1016 }
 0x942   :  { %4169 = vrcp.f32 %v1017_v1 }
 0x943   :  { %4171 = vpow2.f32 %v1202_v36 }
 0x947   :  { %v1338_v37 = vpop.f32.mrf.mxu1 }
 0x948   :  { %v4170_v39 = vpop.eup %4169  ;;  %v1339_v40 = vadd.f32 %v1338_v37, %v22_v14 }
 0x949   :  { %v1023_v43 = vmul.f32 %v4170_v39, %v4168_v60  ;;  %v4848_v45 = vpop.eup %4171  ;;  %v1532_v54 = vpop.permute.xlu2 %1531 }
 0x94a   :  { %v1384_v44 = vsel %vm1002_vm3, %v1339_v40, -inf  ;;  %v1206_v51 = vsel %vm1002_vm3, %v4848_v45, 0.0 }
 0x94b   :  { %1385 = vmax.xlane.f32.xlu2 %v1384_v44  ;;  %3907 = vmatmul.msk.f32.vlgmr.msrb.gmra.mxu2 %vm1002_vm3, %v1023_v43 }
 0x94c   :  { %3923 = vmatpush.xpose.msk.msrb.mxu2 %vm184_vm14, %v1357_v6 }
 0x94f   :  { %v1528_v48 = vpop.f32.mrf.mxu1 }
 0x950   :  { %3924 = vmatpush.xpose.msk.msrb.mxu2 %vm184_vm14, %v1355_v19  ;;  %v1529_v49 = vadd.f32 %v1528_v48, %v22_v14 }
 0x952   :  { %v1574_v53 = vsel %vm1002_vm3, %v1529_v49, -inf }
 0x953   :  { %1207 = vadd.xlane.f32.xlu2 %v1206_v51  ;;  %3915 = vmatmul.msk.f32.vlgmr.msra.gmra.mxu2 %vm184_vm14, %v1152_v17 }
 0x954   :  { %3933 = vmatpush.xpose.msk.msra.mxu2 %vm184_vm14, %v1547_v20  ;;  %1575 = vmax.xlane.f32.xlu0 %v1574_v53  ;;  %v1646_v53 = vld.sshfl [vmem:[#allocation1] sm:$0xff pattern:$0x73625140] }
 0x958   :  { %3934 = vmatpush.xpose.msk.msra.mxu2 %vm184_vm14, %v1545_v26 }
 0x95b   :  { %3925 = vmatmul.msk.f32.vlgmr.msrb.gmra.mxu2 %vm184_vm14, %v1342_v18 }
 0x963   :  { %3935 = vmatmul.msk.f32.vlgmr.msra.gmra.mxu2 %vm184_vm14, %v1532_v54  ;;  %v4069_v54 = vpack.i.bf16 %v1646_v53, %v4783_v16 }
 0x96b   :  { %1229 = vrot.lane.b32.xlu2 %v4712_v41, %s4338_s30 }
 0x982   :  { %v1008_v55 = vpop.xlane.xlu2 %1007 }
 0x983   :  { %v1010_v22 = vsub.f32 %v1000_v32, %v1008_v55 }
 0x985   :  { %v1013_v63 = vmul.f32 1.442695, %v1010_v22 }
 0x987   :  { %4173 = vpow2.f32 %v1013_v63 }
 0x98d   :  { %v4861_v0 = vpop.eup %4173 }
 0x98e   :  { %v1018_v38 = vsel %vm1002_vm3, %v4861_v0, 0.0 }
 0x98f   :  { %1019 = vadd.xlane.f32.xlu1 %v1018_v38 }
 0x9a8   :  { %1078 = vrot.lane.b32.xlu1 %v4687_v46, %s4340_s5 }
 0x9b0   :  { %4060 = vrot.lane.b32.xlu1 %v4059_v2, %s4338_s30 }
 0x9b8   :  { %1270 = vrot.lane.b32.xlu1 %v4729_v62, %s4338_s30 }
 0x9be   :  { %v1386_v50 = vpop.xlane.xlu2 %1385 }
 0x9bf   :  { %v1390_v62 = vsub.f32 %v1339_v40, %v1386_v50 }
 0x9c1   :  { %v1392_v59 = vmul.f32 1.442695, %v1390_v62 }
 0x9c3   :  { %4175 = vpow2.f32 %v1392_v59 }
 0x9c6   :  { %v1208_v26 = vpop.xlane.xlu2 %1207 }
 0x9c7   :  { %v1576_v61 = vpop.xlane.xlu0 %1575 }
 0x9c8   :  { %v1580_v4 = vsub.f32 %v1529_v49, %v1576_v61 }
 0x9c9   :  { %v4881_v5 = vpop.eup %4175 }
 0x9ca   :  { %v1582_v6 = vmul.f32 1.442695, %v1580_v4  ;;  %v1396_v17 = vsel %vm1002_vm3, %v4881_v5, 0.0 }
 0x9cc   :  { %4177 = vpow2.f32 %v1582_v6 }
 0x9ce   :  { %v4872_v41 = vpop.f32.mrf.mxu2  ;;  %v1230_v7 = vpop.permute.xlu2 %1229 }
 0x9d6   :  { %v1191_v42 = vpop.f32.mrf.mxu2 }
 0x9d7   :  { %v1192_v21 = vadd.f32 %v1191_v42, %v23_v30 }
 0x9d9   :  { %v1197_v12 = vsel %vm1002_vm3, %v1192_v21, -inf }
 0x9da   :  { %1198 = vmax.xlane.f32.xlu0 %v1197_v12 }
 0x9de   :  { %v1381_v13 = vpop.f32.mrf.mxu2 }
 0x9df   :  { %v1382_v14 = vadd.f32 %v1381_v13, %v23_v30 }
 0x9e1   :  { %v1387_v15 = vsel %vm1002_vm3, %v1382_v14, -inf }
 0x9e2   :  { %1388 = vmax.xlane.f32.xlu1 %v1387_v15 }
 0x9e6   :  { %v1571_v46 = vpop.f32.mrf.mxu2 }
 0x9e7   :  { %v1572_v57 = vadd.f32 %v1571_v46, %v23_v30 }
 0x9e9   :  { %v1577_v52 = vsel %vm1002_vm3, %v1572_v57, -inf }
 0x9ea   :  { %1578 = vmax.xlane.f32.xlu2 %v1577_v52 }
 0x9ee   :  { %1080 = vrot.lane.b32.xlu0 %v4690_v47, %s4340_s5  ;;  %v4885_v47 = vpop.eup %4177 }
 0x9fb   :  { %1419 = vrot.lane.b32.xlu1 %v4752_v8, %s4344_s9  ;;  %v1586_v8 = vsel %vm1002_vm3, %v4885_v47, 0.0 }
 0xa02   :  { %v1020_v3 = vpop.xlane.xlu1 %1019 }
 0xa18   :  { %1397 = vadd.xlane.f32.xlu0 %v1396_v17 }
 0xa1a   :  { %v1079_v19 = vpop.permute.xlu1 %1078 }
 0xa22   :  { %v4061_v18 = vpop.permute.xlu1 %4060 }
 0xa23   :  { %v4063_v24 = vunpack.i.h.bf16 %v4061_v18  ;;  %v4062_v40 = vunpack.i.l.bf16 %v4061_v18 }
 0xa25   :  { %1587 = vadd.xlane.f32.xlu1 %v1586_v8 }
 0xa2a   :  { %v1271_v20 = vpop.permute.xlu1 %1270 }
 0xa2b   :  { %3918 = vmatpush.msk.msrb.mxu3 %vm1044_vm2, %v1271_v20 }
 0xa2c   :  { %4065 = vrot.lane.b32.xlu0 %v4064_v23, %s4344_s9  ;;  %v43_v23 = vld [vmem:[%s5694_s2 + $0x98] sm:$0xff] }
 0xa2d   :  { %1293 = vmatpush.msrb.mxu3 %v4063_v24  ;;  %1726 = vmatpush.msra.mxu1 %v43_v23  ;;  %v42_v24 = vld [vmem:[%s5694_s2 + $0x90] sm:$0xff] }
 0xa2f   :  { %1727 = vmatpush.msra.mxu1 %v42_v24 }
 0xa34   :  { %1460 = vrot.lane.b32.xlu0 %v4763_v11, %s4344_s9 }
 0xa3c   :  { %1609 = vrot.lane.b32.xlu0 %v4815_v58, %s4345_s10 }
 0xa3e   :  { %1650 = vrot.lane.b32.xlu1 %v1647_v25, %s4345_s10  ;;  %v41_v25 = vld [vmem:[%s5694_s2 + $0x88] sm:$0xff] }
 0xa3f   :  { %1728 = vmatpush.msra.mxu1 %v41_v25 }
 0xa4d   :  { %v1199_v27 = vpop.xlane.xlu0 %1198 }
 0xa4e   :  { %v1201_v60 = vsub.f32 %v1192_v21, %v1199_v27 }
 0xa50   :  { %v1204_v28 = vmul.f32 1.442695, %v1201_v60 }
 0xa52   :  { %4179 = vpow2.f32 %v1204_v28 }
 0xa53   :  { %4181 = vrcp.f32 %v1020_v3 }
 0xa55   :  { %v1389_v9 = vpop.xlane.xlu1 %1388 }
 0xa56   :  { %v1391_v29 = vsub.f32 %v1382_v14, %v1389_v9 }
 0xa58   :  { %v4180_v30 = vpop.eup %4179  ;;  %v1394_v32 = vmul.f32 1.442695, %v1391_v29 }
 0xa59   :  { %v1209_v33 = vsel %vm1002_vm3, %v4180_v30, 0.0  ;;  %v4182_v34 = vpop.eup %4181 }
 0xa5a   :  { %4183 = vpow2.f32 %v1394_v32  ;;  %1210 = vadd.xlane.f32.xlu2 %v1209_v33  ;;  %v1024_v39 = vmul.f32 %v4182_v34, %v4861_v0 }
 0xa5b   :  { %4185 = vrcp.f32 %v1208_v26  ;;  %v40_v26 = vld [vmem:[%s5694_s2 + $0x80] sm:$0xff] }
 0xa5c   :  { %1729 = vmatpush.msra.mxu1 %v40_v26  ;;  %v49_v26 = vld [vmem:[%s5694_s2 + $0xc8] sm:$0xff] }
 0xa5d   :  { %v1579_v11 = vpop.xlane.xlu2 %1578 }
 0xa5e   :  { %v1581_v58 = vsub.f32 %v1572_v57, %v1579_v11 }
 0xa60   :  { %v4184_v35 = vpop.eup %4183  ;;  %v1584_v1 = vmul.f32 1.442695, %v1581_v58  ;;  %v1081_v36 = vpop.permute.xlu0 %1080 }
 0xa61   :  { %3908 = vmatpush.msk.msra.mxu0 %vm1044_vm2, %v1081_v36  ;;  %v1399_v37 = vsel %vm1002_vm3, %v4184_v35, 0.0  ;;  %v4186_v43 = vpop.eup %4185 }
 0xa62   :  { %4187 = vpow2.f32 %v1584_v1  ;;  %1400 = vadd.xlane.f32.xlu2 %v1399_v37  ;;  %v1214_v49 = vmul.f32 %v4186_v43, %v4848_v45 }
 0xa63   :  { %1103 = vmatpush.msra.mxu0 %v1079_v19 }
 0xa64   :  { %3909 = vmatmul.msk.f32.vlgmr.msra.gmra.mxu0 %vm1002_vm3, %v1024_v39 }
 0xa65   :  { %3916 = vmatpush.msk.msrb.mxu0 %vm1044_vm2, %v1230_v7 }
 0xa67   :  { %1252 = vmatpush.msrb.mxu0 %v4062_v40 }
 0xa68   :  { %v4188_v44 = vpop.eup %4187 }
 0xa69   :  { %v1589_v48 = vsel %vm1002_vm3, %v4188_v44, 0.0 }
 0xa6a   :  { %1590 = vadd.xlane.f32.xlu2 %v1589_v48 }
 0xa6c   :  { %3917 = vmatmul.msk.f32.vlgmr.msrb.gmra.mxu0 %vm1002_vm3, %v1214_v49 }
 0xa6d   :  { %v1420_v51 = vpop.permute.xlu1 %1419 }
 0xa6e   :  { %3926 = vmatpush.msk.msra.mxu0 %vm1044_vm2, %v1420_v51 }
 0xa82   :  { %4070 = vrot.lane.b32.xlu2 %v4069_v54, %s4345_s10 }
 0xa8b   :  { %v1398_v55 = vpop.xlane.xlu0 %1397 }
 0xa8c   :  { %4189 = vrcp.f32 %v1398_v55 }
 0xa92   :  { %v4190_v22 = vpop.eup %4189 }
 0xa93   :  { %v1404_v38 = vmul.f32 %v4190_v22, %v4881_v5 }
 0xa98   :  { %v1588_v21 = vpop.xlane.xlu1 %1587 }
 0xa9e   :  { %v4066_v63 = vpop.permute.xlu0 %4065 }
 0xa9f   :  { %v4067_v0 = vunpack.i.l.bf16 %v4066_v63  ;;  %v4068_v2 = vunpack.i.h.bf16 %v4066_v63 }
 0xaa1   :  { %1442 = vmatpush.msra.mxu0 %v4067_v0  ;;  %v47_v0 = vld [vmem:[%s5694_s2 + $0xb8] sm:$0xff] }
 0xaa2   :  { %3927 = vmatmul.msk.f32.vlgmr.msra.gmra.mxu0 %vm1002_vm3, %v1404_v38  ;;  %v46_v38 = vld [vmem:[%s5694_s2 + $0xb0] sm:$0xff]  ;;  %1845 = vmatpush.msrb.mxu2 %v47_v0 }
 0xaa4   :  { %1846 = vmatpush.msrb.mxu2 %v46_v38  ;;  %v48_v38 = vld [vmem:[%s5694_s2 + $0xc0] sm:$0xff] }
 0xaa6   :  { %v1461_v45 = vpop.permute.xlu0 %1460 }
 0xaa7   :  { %3928 = vmatpush.msk.msra.mxu3 %vm1044_vm2, %v1461_v45 }
 0xaa9   :  { %1483 = vmatpush.msra.mxu3 %v4068_v2  ;;  %v45_v2 = vld [vmem:[%s5694_s2 + $0xa8] sm:$0xff] }
 0xaaa   :  { %1847 = vmatpush.msrb.mxu2 %v45_v2 }
 0xaae   :  { %v1610_v42 = vpop.permute.xlu0 %1609 }
 0xaaf   :  { %3936 = vmatpush.msk.msrb.mxu0 %vm1044_vm2, %v1610_v42 }
 0xab0   :  { %v1651_v15 = vpop.permute.xlu1 %1650 }
 0xacd   :  { %v1211_v16 = vpop.xlane.xlu2 %1210 }
 0xace   :  { %4191 = vrcp.f32 %v1211_v16  ;;  %v44_v16 = vld [vmem:[%s5694_s2 + $0xa0] sm:$0xff] }
 0xacf   :  { %1848 = vmatpush.msrb.mxu2 %v44_v16 }
 0xad4   :  { %v4192_v12 = vpop.eup %4191 }
 0xad5   :  { %v1215_v13 = vmul.f32 %v4192_v12, %v4180_v30  ;;  %v1401_v14 = vpop.xlane.xlu2 %1400 }
 0xad6   :  { %4193 = vrcp.f32 %v1401_v14 }
 0xad7   :  { %3919 = vmatmul.msk.f32.vlgmr.msrb.gmra.mxu3 %vm1002_vm3, %v1215_v13  ;;  %4195 = vrcp.f32 %v1588_v21 }
 0xad8   :  { %3938 = vmatpush.msk.msrb.mxu3 %vm1044_vm2, %v1651_v15 }
 0xadc   :  { %v4194_v46 = vpop.eup %4193 }
 0xadd   :  { %v1405_v57 = vmul.f32 %v4194_v46, %v4184_v35  ;;  %v1591_v52 = vpop.xlane.xlu2 %1590  ;;  %v4196_v62 = vpop.eup %4195 }
 0xade   :  { %4197 = vrcp.f32 %v1591_v52  ;;  %v1594_v5 = vmul.f32 %v4196_v62, %v4885_v47 }
 0xadf   :  { %3929 = vmatmul.msk.f32.vlgmr.msra.gmra.mxu3 %vm1002_vm3, %v1405_v57 }
 0xae1   :  { %v1105_v50 = vpop.f32.mrf.mxu0 }
 0xae4   :  { %v4198_v59 = vpop.eup %4197 }
 0xae5   :  { %v4071_v61 = vpop.permute.xlu2 %4070  ;;  %v1595_v6 = vmul.f32 %v4198_v59, %v4188_v44 }
 0xae6   :  { %v4073_v3 = vunpack.i.h.bf16 %v4071_v61  ;;  %v4072_v4 = vunpack.i.l.bf16 %v4071_v61 }
 0xae8   :  { %1632 = vmatpush.msrb.mxu0 %v4072_v4  ;;  %1673 = vmatpush.msrb.mxu3 %v4073_v3 }
 0xae9   :  { %v1254_v17 = vpop.f32.mrf.mxu0  ;;  %3937 = vmatmul.msk.f32.vlgmr.msrb.gmra.mxu0 %vm1002_vm3, %v1594_v5  ;;  %3939 = vmatmul.msk.f32.vlgmr.msrb.gmra.mxu3 %vm1002_vm3, %v1595_v6 }
 0xaea   :  { %1680 = vrot.lane.b32.xlu0 %v1254_v17, %s4349_s18 }
 0xb1f   :  { %v1444_v19 = vpop.f32.mrf.mxu0 }
 0xb20   :  { %1688 = vrot.lane.b32.xlu0 %v1444_v19, %s4350_s19 }
 0xb5a   :  { %v1295_v18 = vpop.f32.mrf.mxu3 }
 0xb5b   :  { %1682 = vrot.lane.b32.xlu2 %v1295_v18, %s4349_s18  ;;  %v51_v18 = vld [vmem:[%s5694_s2 + $0xd8] sm:$0xff] }
 0xb5c   :  { %v1681_v27 = vpop.permute.xlu0 %1680  ;;  %3944 = vmatpush.xpose.msk.msra.mxu0 %vm1858_vm6, %v51_v18 }
 0xb5d   :  { %v1702_v28 = vsel %vm184_vm14, %v4872_v41, %v1681_v27  ;;  %v4097_v41 = vld [vmem:[%s5694_s2 + $0xe4] ss:$0 sm:$0xff] }
 0xb62   :  { %v1485_v8 = vpop.f32.mrf.mxu3 }
 0xb63   :  { %1690 = vrot.lane.b32.xlu1 %v1485_v8, %s4350_s19 }
 0xb66   :  { %v1634_v47 = vpop.f32.mrf.mxu0 }
 0xb67   :  { %1696 = vrot.lane.b32.xlu0 %v1634_v47, %s4351_s20  ;;  %v50_v47 = vld [vmem:[%s5694_s2 + $0xd0] sm:$0xff] }
 0xb68   :  { %3945 = vmatpush.xpose.msk.msra.mxu0 %vm1858_vm6, %v50_v47  ;;  %v1907_v47 = vld [vmem:[%s5694_s2 + $0x100] sm:$0xff] }
 0xb6c   :  { %v1675_v20 = vpop.f32.mrf.mxu3  ;;  %3946 = vmatpush.xpose.msk.msra.mxu0 %vm1858_vm6, %v49_v26 }
 0xb6f   :  { %1698 = vrot.lane.b32.xlu0 %v1675_v20, %s4351_s20 }
 0xb70   :  { %3947 = vmatpush.xpose.msk.msra.mxu0 %vm1858_vm6, %v48_v38 }
 0xb92   :  { %v1689_v60 = vpop.permute.xlu0 %1688 }
 0xb93   :  { %v1704_v7 = vsel %vm726_vm15, %v1702_v28, %v1689_v60 }
 0xbb5   :  { %v1683_v30 = vpop.permute.xlu2 %1682 }
 0xbb6   :  { %v1703_v33 = vsel %vm184_vm14, %v1105_v50, %v1683_v30 }
 0xbd5   :  { %v1691_v32 = vpop.permute.xlu1 %1690 }
 0xbd6   :  { %v1705_v11 = vsel %vm726_vm15, %v1703_v33, %v1691_v32 }
 0xbd9   :  { %v1697_v9 = vpop.permute.xlu0 %1696 }
 0xbda   :  { %v1706_v29 = vsel %vm729_vm1, %v1704_v7, %v1697_v9 }
 0xbdb   :  { %3940 = vmatmul.msk.f32.vlgmr.msra.gmra.mxu1 %vm61_vm0, %v1706_v29 }
 0xbe1   :  { %v1699_v58 = vpop.permute.xlu0 %1698 }
 0xbe2   :  { %v1707_v34 = vsel %vm729_vm1, %v1705_v11, %v1699_v58 }
 0xbe3   :  { %3941 = vmatmul.msk.f32.gmra.mxu1 %vm61_vm0, %v1707_v34  ;;  %v4098_v34 = vld [vmem:[%s5694_s2 + $0xec] ss:$0 sm:$0xff] }
 0xc58   :  { %v1731_v35 = vpop.f32.mrf.mxu1 }
 0xc59   :  { %v1737_v1 = vadd.f32 %v1731_v35, %v4561_v31 }
 0xc5b   :  { %v4951_v36 = vadd.f32 %v4097_v41, %v1737_v1 }
 0xc5d   :  { %v1744_v37 = vsel %vm61_vm0, %v4951_v36, 0.0 }
 0xc5e   :  { %1745 = vadd.xlane.f32.xlu2 %v1744_v37  ;;  %v4099_v37 = vld [vmem:[%s5694_s2 + $0xed] ss:$0 sm:$0xff] }
 0xc60   :  { %v1734_v39 = vpop.f32.mrf.mxu1 }
 0xc61   :  { %v1738_v40 = vadd.f32 %v1734_v39, %v4722_v56 }
 0xc63   :  { %v4956_v43 = vadd.f32 %v4097_v41, %v1738_v40 }
 0xc65   :  { %v1747_v44 = vsel %vm61_vm0, %v4956_v43, 0.0 }
 0xc66   :  { %1748 = vadd.xlane.f32.xlu1 %v1747_v44 }
 0xcd1   :  { %v1746_v48 = vpop.xlane.xlu2 %1745 }
 0xcd2   :  { %v1750_v49 = vmul.f32 %v1746_v48, %v4385_v10 }
 0xcd4   :  { %v4962_v31 = vsub.f32 %v4951_v36, %v1750_v49 }
 0xcd6   :  { %v1754_v51 = vmul.f32 %v4962_v31, %v4962_v31 }
 0xcd8   :  { %v1756_v53 = vsel %vm61_vm0, %v1754_v51, 0.0 }
 0xcd9   :  { %1757 = vadd.xlane.f32.xlu0 %v1756_v53  ;;  %v1749_v54 = vpop.xlane.xlu1 %1748 }
 0xcda   :  { %v1751_v56 = vmul.f32 %v1749_v54, %v4385_v10 }
 0xcdc   :  { %v4969_v55 = vsub.f32 %v4956_v43, %v1751_v56 }
 0xcde   :  { %v1755_v22 = vmul.f32 %v4969_v55, %v4969_v55 }
 0xce0   :  { %v1759_v63 = vsel %vm61_vm0, %v1755_v22, 0.0 }
 0xce1   :  { %1760 = vadd.xlane.f32.xlu2 %v1759_v63 }
 0xd4c   :  { %v1758_v45 = vpop.xlane.xlu0 %1757 }
 0xd4d   :  { %v1762_v42 = vmul.f32 0.032258064, %v1758_v45  ;;  %v4100_v45 = vld [vmem:[%s5694_s2 + $0xe5] ss:$0 sm:$0xff] }
 0xd4f   :  { %4199 = vrsqrt.f32 %v1762_v42  ;;  %vm1771_vm4 = vcmp.eq.f32.partialorder %v1762_v42, inf  ;;  %v1774_v3 = vand.u32 2147483648, %v1762_v42  ;;  %vm1773_vm5 = vcmp.eq.f32.partialorder %v1762_v42, 0.0 }
 0xd54   :  { %v1761_v21 = vpop.xlane.xlu2 %1760 }
 0xd55   :  { %v4200_v12 = vpop.eup %4199  ;;  %v1763_v13 = vmul.f32 0.032258064, %v1761_v21 }
 0xd56   :  { %v1765_v14 = vmul.f32 %v4200_v12, %v1762_v42 }
 0xd57   :  { %4201 = vrsqrt.f32 %v1763_v13  ;;  %vm1783_vm7 = vcmp.eq.f32.partialorder %v1763_v13, inf  ;;  %v1786_v23 = vand.u32 2147483648, %v1763_v13  ;;  %vm1785_vm8 = vcmp.eq.f32.partialorder %v1763_v13, 0.0 }
 0xd58   :  { %v1766_v15 = vmul.f32 %v4200_v12, %v1765_v14 }
 0xd5a   :  { %v1767_v46 = vmul.f32 0.5, %v1766_v15 }
 0xd5c   :  { %v1768_v57 = vsub.f32 1.5, %v1767_v46 }
 0xd5d   :  { %v4202_v52 = vpop.eup %4201 }
 0xd5e   :  { %v1769_v50 = vmul.f32 %v4200_v12, %v1768_v57  ;;  %v1777_v62 = vmul.f32 %v4202_v52, %v1763_v13 }
 0xd60   :  { %v1770_v59 = vmul.f32 %v1769_v50, %v1762_v42  ;;  %v1778_v61 = vmul.f32 %v4202_v52, %v1777_v62 }
 0xd62   :  { %v1772_v4 = vsel %vm1771_vm4, %v1762_v42, %v1770_v59  ;;  %v1779_v5 = vmul.f32 0.5, %v1778_v61 }
 0xd63   :  { %v1775_v6 = vsel %vm1773_vm5, %v1774_v3, %v1772_v4 }
 0xd64   :  { %v1788_v17 = vadd.f32 1e-06, %v1775_v6  ;;  %v1780_v19 = vsub.f32 1.5, %v1779_v5 }
 0xd66   :  { %4203 = vrcp.f32 %v1788_v17  ;;  %v1781_v8 = vmul.f32 %v4202_v52, %v1780_v19  ;;  %v1801_v9 = vand.u32 2147483648, %v1788_v17  ;;  %v1799_v30 = vand.u32 2147483647, %v1788_v17 }
 0xd67   :  { %vm1795_vm10 = vweird.f32 %v1788_v17 }
 0xd68   :  { %v1782_v20 = vmul.f32 %v1781_v8, %v1763_v13  ;;  %v1802_v11 = vor.u32 1.1754944e-38, %v1801_v9  ;;  %vm1800_vm12 = vcmp.eq.f32.partialorder %v1799_v30, 8.507059e+37  ;;  %v1908_v8 = vld [vmem:[%s5694_s2 + $0x108] sm:$0xff] }
 0xd69   :  { %2043 = vmatpush.msra.mxu3 %v1908_v8 }
 0xd6a   :  { %v1784_v24 = vsel %vm1783_vm7, %v1763_v13, %v1782_v20  ;;  %v4101_v13 = vld [vmem:[%s5694_s2 + $0xe6] ss:$0 sm:$0xff] }
 0xd6b   :  { %v1787_v25 = vsel %vm1785_vm8, %v1786_v23, %v1784_v24  ;;  %v1906_v23 = vld [vmem:[%s5694_s2 + $0xf8] sm:$0xff]  ;;  %2044 = vmatpush.msra.mxu3 %v1907_v47 }
 0xd6c   :  { %v4204_v27 = vpop.eup %4203  ;;  %v1789_v60 = vadd.f32 1e-06, %v1787_v25  ;;  %v1905_v25 = vld [vmem:[%s5694_s2 + $0xf0] sm:$0xff] }
 0xd6d   :  { %v1791_v28 = vmul.f32 %v4204_v27, %v1788_v17  ;;  %vm1796_vm9 = vweird.f32 %v4204_v27  ;;  %2045 = vmatpush.msra.mxu3 %v1906_v23 }
 0xd6e   :  { %4205 = vrcp.f32 %v1789_v60  ;;  %vm1797_vm11 = vmor %vm1795_vm10, %vm1796_vm9  ;;  %v1815_v40 = vand.u32 2147483648, %v1789_v60  ;;  %v1813_v49 = vand.u32 2147483647, %v1789_v60  ;;  %vm1809_vm4 = vweird.f32 %v1789_v60 }
 0xd6f   :  { %v1792_v7 = vsub.f32 1.0, %v1791_v28  ;;  %2046 = vmatpush.msra.mxu3 %v1905_v25 }
 0xd70   :  { %v1816_v54 = vor.u32 1.1754944e-38, %v1815_v40  ;;  %vm1814_vm7 = vcmp.eq.f32.partialorder %v1813_v49, 8.507059e+37 }
 0xd71   :  { %v1793_v29 = vmul.f32 %v4204_v27, %v1792_v7 }
 0xd73   :  { %v1794_v32 = vadd.f32 %v4204_v27, %v1793_v29 }
 0xd74   :  { %v4206_v33 = vpop.eup %4205 }
 0xd75   :  { %v1798_v58 = vsel %vm1797_vm11, %v4204_v27, %v1794_v32  ;;  %v1805_v41 = vmul.f32 %v4206_v33, %v1789_v60  ;;  %vm1810_vm13 = vweird.f32 %v4206_v33 }
 0xd76   :  { %v1803_v35 = vsel %vm1800_vm12, %v1802_v11, %v1798_v58  ;;  %vm1811_vm5 = vmor %vm1809_vm4, %vm1810_vm13 }
 0xd77   :  { %v1818_v1 = vmul.f32 %v1803_v35, %v4962_v31  ;;  %v1806_v39 = vsub.f32 1.0, %v1805_v41 }
 0xd79   :  { %v1821_v44 = vmul.f32 %v4098_v34, %v1818_v1  ;;  %v1807_v48 = vmul.f32 %v4206_v33, %v1806_v39 }
 0xd7b   :  { %v1824_v51 = vadd.f32 %v4099_v37, %v1821_v44  ;;  %v1808_v53 = vadd.f32 %v4206_v33, %v1807_v48 }
 0xd7d   :  { %3942 = vmatmul.msk.f32.vlgmr.msrb.gmra.mxu2 %vm61_vm0, %v1824_v51  ;;  %v1812_v56 = vsel %vm1811_vm5, %v4206_v33, %v1808_v53 }
 0xd7e   :  { %v1817_v31 = vsel %vm1814_vm7, %v1816_v54, %v1812_v56 }
 0xd7f   :  { %v1819_v22 = vmul.f32 %v1817_v31, %v4969_v55 }
 0xd81   :  { %v1822_v63 = vmul.f32 %v4098_v34, %v1819_v22 }
 0xd83   :  { %v1825_v0 = vadd.f32 %v4099_v37, %v1822_v63 }
 0xd85   :  { %3943 = vmatmul.msk.f32.gmra.mxu2 %vm61_vm0, %v1825_v0 }
 0xe00   :  { %v1850_v2 = vpop.f32.mrf.mxu2 }
 0xe01   :  { %v1851_v42 = vadd.f32 %v4100_v45, %v1850_v2 }
 0xe03   :  { %v1856_v16 = vmax.f32 %v1851_v42, 0.0 }
 0xe05   :  { %3948 = vmatmul.msk.f32.vlgmr.msra.gmra.mxu0 %vm1858_vm6, %v1856_v16  ;;  %v4102_v16 = vld [vmem:[%s5694_s2 + $0x1d8] ss:$0 sm:$0xff] }
 0xe08   :  { %v1853_v55 = vpop.f32.mrf.mxu2 }
 0xe09   :  { %v1854_v21 = vadd.f32 %v4100_v45, %v1853_v55 }
 0xe0b   :  { %v1857_v12 = vmax.f32 %v1854_v21, 0.0 }
 0xe0d   :  { %3949 = vmatmul.msk.f32.gmra.mxu0 %vm1858_vm6, %v1857_v12 }
 0xe82   :  { %v1894_v14 = vpop.f32.mrf.mxu0 }
 0xe83   :  { %v1900_v15 = vadd.f32 %v1894_v14, %v4951_v36 }
 0xe85   :  { %v5021_v46 = vadd.f32 %v4101_v13, %v1900_v15 }
 0xe87   :  { %v1942_v57 = vsel %vm61_vm0, %v5021_v46, 0.0 }
 0xe88   :  { %1943 = vadd.xlane.f32.xlu1 %v1942_v57 }
 0xe8a   :  { %v1897_v52 = vpop.f32.mrf.mxu0 }
 0xe8b   :  { %v1901_v50 = vadd.f32 %v1897_v52, %v4956_v43 }
 0xe8d   :  { %v5026_v62 = vadd.f32 %v4101_v13, %v1901_v50  ;;  %v4103_v13 = vld [vmem:[%s5694_s2 + $0x1d9] ss:$0 sm:$0xff] }
 0xe8f   :  { %v1945_v59 = vsel %vm61_vm0, %v5026_v62, 0.0 }
 0xe90   :  { %1946 = vadd.xlane.f32.xlu2 %v1945_v59 }
 0xefb   :  { %v1944_v61 = vpop.xlane.xlu1 %1943 }
 0xefc   :  { %v1948_v3 = vmul.f32 %v1944_v61, %v4385_v10 }
 0xefe   :  { %v5032_v36 = vsub.f32 %v5021_v46, %v1948_v3 }
 0xf00   :  { %v1952_v4 = vmul.f32 %v5032_v36, %v5032_v36 }
 0xf02   :  { %v1954_v5 = vsel %vm61_vm0, %v1952_v4, 0.0 }
 0xf03   :  { %1955 = vadd.xlane.f32.xlu0 %v1954_v5  ;;  %v1947_v6 = vpop.xlane.xlu2 %1946 }
 0xf04   :  { %v1949_v43 = vmul.f32 %v1947_v6, %v4385_v10 }
 0xf06   :  { %v5039_v17 = vsub.f32 %v5026_v62, %v1949_v43 }
 0xf08   :  { %v1953_v19 = vmul.f32 %v5039_v17, %v5039_v17 }
 0xf0a   :  { %v1957_v18 = vsel %vm61_vm0, %v1953_v19, 0.0  ;;  %v4104_v19 = vld [vmem:[%s5694_s2 + $0x1d0] ss:$0 sm:$0xff] }
 0xf0b   :  { %1958 = vadd.xlane.f32.xlu1 %v1957_v18 }
 0xf76   :  { %v1956_v20 = vpop.xlane.xlu0 %1955 }
 0xf77   :  { %v1960_v24 = vmul.f32 0.032258064, %v1956_v20 }
 0xf79   :  { %4207 = vrsqrt.f32 %v1960_v24  ;;  %vm1969_vm8 = vcmp.eq.f32.partialorder %v1960_v24, inf  ;;  %v1972_v34 = vand.u32 2147483648, %v1960_v24  ;;  %vm1971_vm9 = vcmp.eq.f32.partialorder %v1960_v24, 0.0 }
 0xf7e   :  { %v1959_v26 = vpop.xlane.xlu1 %1958 }
 0xf7f   :  { %v4208_v27 = vpop.eup %4207  ;;  %v1961_v60 = vmul.f32 0.032258064, %v1959_v26 }
 0xf80   :  { %v1963_v28 = vmul.f32 %v4208_v27, %v1960_v24 }
 0xf81   :  { %4209 = vrsqrt.f32 %v1961_v60  ;;  %vm1981_vm10 = vcmp.eq.f32.partialorder %v1961_v60, inf  ;;  %v1984_v48 = vand.u32 2147483648, %v1961_v60  ;;  %vm1983_vm11 = vcmp.eq.f32.partialorder %v1961_v60, 0.0 }
 0xf82   :  { %v1964_v7 = vmul.f32 %v4208_v27, %v1963_v28 }
 0xf84   :  { %v1965_v9 = vmul.f32 0.5, %v1964_v7 }
 0xf86   :  { %v1966_v29 = vsub.f32 1.5, %v1965_v9 }
 0xf87   :  { %v4210_v30 = vpop.eup %4209 }
 0xf88   :  { %v1967_v32 = vmul.f32 %v4208_v27, %v1966_v29  ;;  %v1975_v33 = vmul.f32 %v4210_v30, %v1961_v60  ;;  %v4304_v29 = vld [vmem:[%s5693_s1] sm:$0xff] }
 0xf8a   :  { %v1968_v11 = vmul.f32 %v1967_v32, %v1960_v24  ;;  %v1976_v58 = vmul.f32 %v4210_v30, %v1975_v33 }
 0xf8c   :  { %v1970_v41 = vsel %vm1969_vm8, %v1960_v24, %v1968_v11  ;;  %v1977_v35 = vmul.f32 0.5, %v1976_v58 }
 0xf8d   :  { %v1973_v1 = vsel %vm1971_vm9, %v1972_v34, %v1970_v41 }
 0xf8e   :  { %v1986_v37 = vadd.f32 1e-06, %v1973_v1  ;;  %v1978_v39 = vsub.f32 1.5, %v1977_v35 }
 0xf90   :  { %4211 = vrcp.f32 %v1986_v37  ;;  %v1979_v40 = vmul.f32 %v4210_v30, %v1978_v39  ;;  %v1999_v22 = vand.u32 2147483648, %v1986_v37  ;;  %v1997_v0 = vand.u32 2147483647, %v1986_v37 }
 0xf91   :  { %vm1993_vm13 = vweird.f32 %v1986_v37 }
 0xf92   :  { %v1980_v44 = vmul.f32 %v1979_v40, %v1961_v60  ;;  %v2000_v2 = vor.u32 1.1754944e-38, %v1999_v22  ;;  %vm1998_vm5 = vcmp.eq.f32.partialorder %v1997_v0, 8.507059e+37 }
 0xf94   :  { %v1982_v49 = vsel %vm1981_vm10, %v1961_v60, %v1980_v44 }
 0xf95   :  { %v1985_v51 = vsel %vm1983_vm11, %v1984_v48, %v1982_v49 }
 0xf96   :  { %v4212_v53 = vpop.eup %4211  ;;  %v1987_v54 = vadd.f32 1e-06, %v1985_v51 }
 0xf97   :  { %v1989_v56 = vmul.f32 %v4212_v53, %v1986_v37  ;;  %vm1994_vm12 = vweird.f32 %v4212_v53 }
 0xf98   :  { %4213 = vrcp.f32 %v1987_v54  ;;  %vm1995_vm4 = vmor %vm1993_vm13, %vm1994_vm12  ;;  %v2013_v15 = vand.u32 2147483648, %v1987_v54  ;;  %v2011_v50 = vand.u32 2147483647, %v1987_v54  ;;  %vm2007_vm8 = vweird.f32 %v1987_v54 }
 0xf99   :  { %v1990_v31 = vsub.f32 1.0, %v1989_v56 }
 0xf9a   :  { %v2014_v3 = vor.u32 1.1754944e-38, %v2013_v15  ;;  %vm2012_vm10 = vcmp.eq.f32.partialorder %v2011_v50, 8.507059e+37 }
 0xf9b   :  { %v1991_v63 = vmul.f32 %v4212_v53, %v1990_v31 }
 0xf9d   :  { %v1992_v38 = vadd.f32 %v4212_v53, %v1991_v63 }
 0xf9e   :  { %v4214_v45 = vpop.eup %4213 }
 0xf9f   :  { %v1996_v42 = vsel %vm1995_vm4, %v4212_v53, %v1992_v38  ;;  %v2003_v55 = vmul.f32 %v4214_v45, %v1987_v54  ;;  %vm2008_vm7 = vweird.f32 %v4214_v45 }
 0xfa0   :  { %v2001_v21 = vsel %vm1998_vm5, %v2000_v2, %v1996_v42  ;;  %vm2009_vm9 = vmor %vm2007_vm8, %vm2008_vm7 }
 0xfa1   :  { %v2016_v12 = vmul.f32 %v2001_v21, %v5032_v36  ;;  %v2004_v14 = vsub.f32 1.0, %v2003_v55 }
 0xfa3   :  { %v2019_v57 = vmul.f32 %v4102_v16, %v2016_v12  ;;  %v2005_v52 = vmul.f32 %v4214_v45, %v2004_v14  ;;  %v4305_v12 = vld [vmem:[%s5693_s1 + $0x8] sm:$0xff] }
 0xfa5   :  { %v2022_v59 = vadd.f32 %v4103_v13, %v2019_v57  ;;  %v2006_v61 = vadd.f32 %v4214_v45, %v2005_v52 }
 0xfa7   :  { %3950 = vmatmul.msk.f32.vlgmr.msra.gmra.mxu3 %vm61_vm0, %v2022_v59  ;;  %v2010_v4 = vsel %vm2009_vm9, %v4214_v45, %v2006_v61 }
 0xfa8   :  { %v2015_v36 = vsel %vm2012_vm10, %v2014_v3, %v2010_v4 }
 0xfa9   :  { %v2017_v5 = vmul.f32 %v2015_v36, %v5039_v17 }
 0xfab   :  { %v2020_v6 = vmul.f32 %v4102_v16, %v2017_v5 }
 0xfad   :  { %v2023_v43 = vadd.f32 %v4103_v13, %v2020_v6 }
 0xfaf   :  { %3951 = vmatmul.msk.f32.gmra.mxu3 %vm61_vm0, %v2023_v43 }
0x102a   :  { %v2048_v18 = vpop.f32.mrf.mxu3 }
0x102b   :  { %v5069_v8 = vadd.f32 %v4104_v19, %v2048_v18 }
0x102d   :  { %2055 = vrot.lane.b32.xlu0 %v5069_v8, %s4340_s5  ;;  %2184 = vrot.lane.b32.xlu1 %v5069_v8, %s4338_s30 }
0x1032   :  { %v2051_v47 = vpop.f32.mrf.mxu3 }
0x1033   :  { %v5075_v20 = vadd.f32 %v4104_v19, %v2051_v47 }
0x1035   :  { %2182 = vrot.lane.b32.xlu0 %v5069_v8, %s4339_s4  ;;  %2444 = vrot.lane.b32.xlu1 %v5069_v8, %s4345_s10 }
0x1036   :  { %2082 = vrot.lane.b32.xlu2 %v5075_v20, %s4340_s5 }
0x103d   :  { %2312 = vrot.lane.b32.xlu0 %v5069_v8, %s4342_s7  ;;  %2212 = vrot.lane.b32.xlu1 %v5075_v20, %s4338_s30 }
0x103e   :  { %2314 = vrot.lane.b32.xlu2 %v5069_v8, %s4344_s9 }
0x1046   :  { %2442 = vrot.lane.b32.xlu2 %v5069_v8, %s4341_s6 }
0x1090   :  { %v2083_v17 = vpop.permute.xlu2 %2082 }
0x1091   :  { %3954 = vmatpush.xpose.msk.msra.mxu2 %vm184_vm14, %v2083_v17 }
0x1094   :  { %3955 = vmatmul.msk.f32.vlgmr.msra.gmra.mxu2 %vm184_vm14, %v5075_v20 }
0x1098   :  { %v2315_v25 = vpop.permute.xlu2 %2314 }
0x109f   :  { %v2056_v23 = vpop.permute.xlu0 %2055  ;;  %v2185_v24 = vpop.permute.xlu1 %2184 }
0x10a0   :  { %3952 = vmatpush.xpose.msk.msrb.mxu1 %vm184_vm14, %v2056_v23  ;;  %3958 = vmatpush.xpose.msk.msrb.mxu2 %vm184_vm14, %v2185_v24  ;;  %v2443_v7 = vpop.permute.xlu2 %2442 }
0x10a3   :  { %3953 = vmatmul.msk.f32.vlgmr.msrb.gmra.mxu1 %vm184_vm14, %v5069_v8 }
0x10a4   :  { %3964 = vmatpush.xpose.msk.msra.mxu2 %vm184_vm14, %v2315_v25 }
0x10a7   :  { %v2183_v26 = vpop.permute.xlu0 %2182  ;;  %v2445_v27 = vpop.permute.xlu1 %2444 }
0x10a8   :  { %3959 = vmatmul.msk.f32.vlgmr.msrb.gmra.mxu2 %vm184_vm14, %v2183_v26 }
0x10a9   :  { %3970 = vmatpush.xpose.msk.msrb.mxu2 %vm184_vm14, %v2445_v27 }
0x10af   :  { %v2313_v60 = vpop.permute.xlu0 %2312  ;;  %v2213_v28 = vpop.permute.xlu1 %2212 }
0x10b0   :  { %3960 = vmatpush.xpose.msk.msrb.mxu0 %vm184_vm14, %v2213_v28  ;;  %3965 = vmatmul.msk.f32.vlgmr.msra.gmra.mxu2 %vm184_vm14, %v2313_v60 }
0x10b8   :  { %3971 = vmatmul.msk.f32.vlgmr.msrb.gmra.mxu2 %vm184_vm14, %v2443_v7 }
0x1117   :  { %v2105_v32 = vpop.f32.mrf.mxu2 }
0x1118   :  { %v5132_v13 = vadd.f32 %v4305_v12, %v2105_v32 }
0x111a   :  { %v2111_v57 = vsel %vm184_vm14, %v5132_v13, -inf }
0x1120   :  { %v2078_v9 = vpop.f32.mrf.mxu1 }
0x1121   :  { %v2079_v30 = vadd.f32 %v4304_v29, %v2078_v9 }
0x1123   :  { %v2108_v33 = vsel %vm184_vm14, %v2079_v30, -inf }
0x1124   :  { %2109 = vmax.xlane.f32.xlu0 %v2108_v33 }
0x112b   :  { %v2207_v11 = vpop.f32.mrf.mxu2 }
0x112c   :  { %v2208_v58 = vadd.f32 %v4304_v29, %v2207_v11 }
0x112e   :  { %v2238_v34 = vsel %vm184_vm14, %v2208_v58, -inf }
0x112f   :  { %2239 = vmax.xlane.f32.xlu1 %v2238_v34 }
0x1133   :  { %v2337_v41 = vpop.f32.mrf.mxu2 }
0x1134   :  { %v2338_v35 = vadd.f32 %v4304_v29, %v2337_v41 }
0x1136   :  { %v2368_v1 = vsel %vm184_vm14, %v2338_v35, -inf }
0x1137   :  { %2369 = vmax.xlane.f32.xlu2 %v2368_v1 }
0x1138   :  { %2342 = vrot.lane.b32.xlu0 %v5075_v20, %s4344_s9 }
0x113b   :  { %v2467_v37 = vpop.f32.mrf.mxu2 }
0x113c   :  { %v2468_v39 = vadd.f32 %v4304_v29, %v2467_v37 }
0x113e   :  { %v2498_v40 = vsel %vm184_vm14, %v2468_v39, -inf }
0x1140   :  { %2472 = vrot.lane.b32.xlu0 %v5075_v20, %s4345_s10 }
0x1148   :  { %2130 = vrot.lane.b32.xlu0 %v5069_v8, %s4343_s8  ;;  %2340 = vrot.lane.b32.xlu1 %v5075_v20, %s4342_s7 }
0x114f   :  { %2210 = vrot.lane.b32.xlu2 %v5075_v20, %s4339_s4 }
0x1172   :  { %2499 = vmax.xlane.f32.xlu0 %v2498_v40 }
0x1186   :  { %2470 = vrot.lane.b32.xlu0 %v5075_v20, %s4341_s6 }
0x1197   :  { %v2110_v44 = vpop.xlane.xlu0 %2109 }
0x1198   :  { %v2114_v48 = vsub.f32 %v2079_v30, %v2110_v44 }
0x119a   :  { %v2116_v49 = vmul.f32 1.442695, %v2114_v48 }
0x119c   :  { %4215 = vpow2.f32 %v2116_v49 }
0x11a2   :  { %v4216_v51 = vpop.eup %4215  ;;  %v2240_v53 = vpop.xlane.xlu1 %2239 }
0x11a3   :  { %v2244_v54 = vsub.f32 %v2208_v58, %v2240_v53  ;;  %v2120_v56 = vsel %vm184_vm14, %v4216_v51, 0.0 }
0x11a4   :  { %2121 = vadd.xlane.f32.xlu2 %v2120_v56 }
0x11a5   :  { %v2246_v31 = vmul.f32 1.442695, %v2244_v54 }
0x11a7   :  { %4217 = vpow2.f32 %v2246_v31 }
0x11aa   :  { %v2343_v22 = vpop.permute.xlu0 %2342  ;;  %v2370_v63 = vpop.xlane.xlu2 %2369 }
0x11ab   :  { %v2374_v0 = vsub.f32 %v2338_v35, %v2370_v63  ;;  %3966 = vmatpush.xpose.msk.msra.mxu0 %vm184_vm14, %v2343_v22 }
0x11ad   :  { %v4218_v38 = vpop.eup %4217  ;;  %v2376_v45 = vmul.f32 1.442695, %v2374_v0 }
0x11ae   :  { %v2250_v2 = vsel %vm184_vm14, %v4218_v38, 0.0 }
0x11af   :  { %4219 = vpow2.f32 %v2376_v45  ;;  %2251 = vadd.xlane.f32.xlu1 %v2250_v2 }
0x11b2   :  { %v2473_v42 = vpop.permute.xlu0 %2472  ;;  %v2211_v16 = vpop.permute.xlu2 %2210 }
0x11b3   :  { %3961 = vmatmul.msk.f32.vlgmr.msrb.gmra.mxu0 %vm184_vm14, %v2211_v16 }
0x11b4   :  { %3972 = vmatpush.xpose.msk.msrb.mxu0 %vm184_vm14, %v2473_v42 }
0x11b5   :  { %v4220_v55 = vpop.eup %4219 }
0x11b6   :  { %v2380_v21 = vsel %vm184_vm14, %v4220_v55, 0.0 }
0x11b7   :  { %2381 = vadd.xlane.f32.xlu0 %v2380_v21  ;;  %v1912_v21 = vld [vmem:[%s5694_s2 + $0x128] sm:$0xff] }
0x11b8   :  { %2620 = vmatpush.msra.mxu2 %v1912_v21 }
0x11ba   :  { %v2131_v14 = vpop.permute.xlu0 %2130  ;;  %v2341_v15 = vpop.permute.xlu1 %2340 }
0x11bb   :  { %2151 = vmatpush.msrb.mxu3 %v2131_v14  ;;  %3967 = vmatmul.msk.f32.vlgmr.msra.gmra.mxu0 %vm184_vm14, %v2341_v15  ;;  %v1909_v14 = vld [vmem:[%s5694_s2 + $0x110] sm:$0xff] }
0x11bc   :  { %2260 = vrot.lane.b32.xlu2 %v5069_v8, %s4346_s15 }
0x11bf   :  { %2112 = vmax.xlane.f32.xlu0 %v2111_v57 }
0x11c4   :  { %2520 = vrot.lane.b32.xlu2 %v5069_v8, %s4348_s17 }
0x11e5   :  { %v2500_v52 = vpop.xlane.xlu0 %2499 }
0x11e6   :  { %v2504_v50 = vsub.f32 %v2468_v39, %v2500_v52 }
0x11e8   :  { %v2506_v59 = vmul.f32 1.442695, %v2504_v50 }
0x11ea   :  { %4221 = vpow2.f32 %v2506_v59 }
0x11f0   :  { %v4222_v61 = vpop.eup %4221 }
0x11f1   :  { %v2510_v3 = vsel %vm184_vm14, %v4222_v61, 0.0 }
0x11f2   :  { %2511 = vadd.xlane.f32.xlu1 %v2510_v3 }
0x11f8   :  { %v2471_v4 = vpop.permute.xlu0 %2470 }
0x11f9   :  { %3973 = vmatmul.msk.f32.vlgmr.msrb.gmra.mxu0 %vm184_vm14, %v2471_v4 }
0x120b   :  { %2390 = vrot.lane.b32.xlu1 %v5069_v8, %s4347_s16 }
0x1217   :  { %v2122_v36 = vpop.xlane.xlu2 %2121 }
0x1218   :  { %4223 = vrcp.f32 %v2122_v36 }
0x121e   :  { %v4224_v5 = vpop.eup %4223 }
0x121f   :  { %v2128_v6 = vmul.f32 %v4224_v5, %v4216_v51  ;;  %v2261_v43 = vpop.permute.xlu2 %2260 }
0x1220   :  { %2281 = vmatpush.msra.mxu3 %v2261_v43 }
0x1221   :  { %3956 = vmatmul.msk.f32.vlgmr.msrb.gmra.mxu3 %vm184_vm14, %v2128_v6 }
0x1222   :  { %v2252_v19 = vpop.xlane.xlu1 %2251 }
0x1223   :  { %4225 = vrcp.f32 %v2252_v19 }
0x1227   :  { %v2521_v33 = vpop.permute.xlu2 %2520 }
0x1229   :  { %v4226_v18 = vpop.eup %4225 }
0x122a   :  { %v2258_v47 = vmul.f32 %v4226_v18, %v4218_v38  ;;  %v2382_v27 = vpop.xlane.xlu0 %2381 }
0x122b   :  { %4227 = vrcp.f32 %v2382_v27  ;;  %v5191_v27 = vld [vmem:[%s5694_s2 + $0x1d1] ss:$0 sm:$0xff] }
0x122c   :  { %3962 = vmatmul.msk.f32.vlgmr.msra.gmra.mxu3 %vm184_vm14, %v2258_v47 }
0x1230   :  { %v2235_v17 = vpop.f32.mrf.mxu0 }
0x1231   :  { %v2236_v23 = vadd.f32 %v4305_v12, %v2235_v17  ;;  %v4228_v29 = vpop.eup %4227 }
0x1232   :  { %v2388_v30 = vmul.f32 %v4228_v29, %v4220_v55  ;;  %v2113_v34 = vpop.xlane.xlu0 %2112 }
0x1233   :  { %v2241_v24 = vsel %vm184_vm14, %v2236_v23, -inf  ;;  %v2115_v56 = vsub.f32 %v5132_v13, %v2113_v34  ;;  %v1910_v13 = vld [vmem:[%s5694_s2 + $0x118] sm:$0xff] }
0x1234   :  { %2242 = vmax.xlane.f32.xlu2 %v2241_v24 }
0x1235   :  { %v2118_v31 = vmul.f32 1.442695, %v2115_v56  ;;  %v4307_v56 = vld [vmem:[%s5692_s0 + $0x18] sm:$0xff] }
0x1238   :  { %v2365_v8 = vpop.f32.mrf.mxu0 }
0x1239   :  { %v2366_v25 = vadd.f32 %v4305_v12, %v2365_v8 }
0x123b   :  { %v2371_v26 = vsel %vm184_vm14, %v2366_v25, -inf }
0x123c   :  { %2372 = vmax.xlane.f32.xlu0 %v2371_v26 }
0x1265   :  { %v2512_v60 = vpop.xlane.xlu1 %2511 }
0x1266   :  { %4229 = vrcp.f32 %v2512_v60 }
0x126c   :  { %v4230_v11 = vpop.eup %4229 }
0x126d   :  { %v2518_v58 = vmul.f32 %v4230_v11, %v4222_v61 }
0x1276   :  { %v2495_v28 = vpop.f32.mrf.mxu0 }
0x1277   :  { %v2496_v7 = vadd.f32 %v4305_v12, %v2495_v28  ;;  %v1911_v12 = vld [vmem:[%s5694_s2 + $0x120] sm:$0xff] }
0x1278   :  { %2621 = vmatpush.msra.mxu2 %v1911_v12 }
0x1279   :  { %v2501_v9 = vsel %vm184_vm14, %v2496_v7, -inf }
0x127a   :  { %2502 = vmax.xlane.f32.xlu0 %v2501_v9  ;;  %2622 = vmatpush.msra.mxu2 %v1910_v13 }
0x127c   :  { %2623 = vmatpush.msra.mxu2 %v1909_v14 }
0x127d   :  { %v2391_v32 = vpop.permute.xlu1 %2390 }
0x127e   :  { %2411 = vmatpush.msrb.mxu3 %v2391_v32 }
0x127f   :  { %3968 = vmatmul.msk.f32.vlgmr.msrb.gmra.mxu3 %vm184_vm14, %v2388_v30 }
0x1280   :  { %2541 = vmatpush.msra.mxu3 %v2521_v33 }
0x1287   :  { %3974 = vmatmul.msk.f32.vlgmr.msra.gmra.mxu3 %vm184_vm14, %v2518_v58 }
0x12a4   :  { %v2153_v41 = vpop.f32.mrf.mxu3 }
0x12a7   :  { %v2243_v35 = vpop.xlane.xlu2 %2242 }
0x12a8   :  { %v2245_v1 = vsub.f32 %v2236_v23, %v2243_v35 }
0x12aa   :  { %v2248_v37 = vmul.f32 1.442695, %v2245_v1 }
0x12ac   :  { %4231 = vpow2.f32 %v2248_v37 }
0x12af   :  { %v2373_v39 = vpop.xlane.xlu0 %2372  ;;  %v2283_v40 = vpop.f32.mrf.mxu3 }
0x12b0   :  { %v2375_v44 = vsub.f32 %v2366_v25, %v2373_v39  ;;  %2574 = vrot.lane.b32.xlu1 %v2283_v40, %s4349_s18 }
0x12b2   :  { %v4232_v48 = vpop.eup %4231  ;;  %v2378_v49 = vmul.f32 1.442695, %v2375_v44 }
0x12b3   :  { %v2253_v51 = vsel %vm184_vm14, %v4232_v48, 0.0 }
0x12b4   :  { %4233 = vpow2.f32 %v2378_v49  ;;  %2254 = vadd.xlane.f32.xlu2 %v2253_v51  ;;  %v1919_v49 = vld [vmem:[%s5694_s2 + $0x160] sm:$0xff]  ;;  %v1918_v51 = vld [vmem:[%s5694_s2 + $0x158] sm:$0xff] }
0x12b5   :  { %4235 = vpow2.f32 %v2118_v31 }
0x12ba   :  { %v4234_v53 = vpop.eup %4233 }
0x12bb   :  { %v2383_v54 = vsel %vm184_vm14, %v4234_v53, 0.0  ;;  %v4236_v22 = vpop.eup %4235 }
0x12bc   :  { %2384 = vadd.xlane.f32.xlu2 %v2383_v54  ;;  %v2123_v63 = vsel %vm184_vm14, %v4236_v22, 0.0  ;;  %v4306_v54 = vld [vmem:[%s5692_s0 + $0x10] sm:$0xff] }
0x12da   :  { %2124 = vadd.xlane.f32.xlu1 %v2123_v63  ;;  %v1916_v63 = vld [vmem:[%s5694_s2 + $0x148] sm:$0xff] }
0x12db   :  { %2739 = vmatpush.msra.mxu0 %v1916_v63 }
0x12ed   :  { %v2503_v0 = vpop.xlane.xlu0 %2502 }
0x12ee   :  { %v2505_v38 = vsub.f32 %v2496_v7, %v2503_v0  ;;  %v1915_v0 = vld [vmem:[%s5694_s2 + $0x140] sm:$0xff] }
0x12ef   :  { %2740 = vmatpush.msra.mxu0 %v1915_v0 }
0x12f0   :  { %v2508_v45 = vmul.f32 1.442695, %v2505_v38  ;;  %v4308_v38 = vld [vmem:[%s5692_s0 + $0x20] sm:$0xf] }
0x12f2   :  { %4237 = vpow2.f32 %v2508_v45  ;;  %v1914_v45 = vld [vmem:[%s5694_s2 + $0x138] sm:$0xff] }
0x12f3   :  { %2416 = vrot.lane.b32.xlu1 %v5075_v20, %s4347_s16  ;;  %2741 = vmatpush.msra.mxu0 %v1914_v45 }
0x12f8   :  { %v4238_v2 = vpop.eup %4237 }
0x12f9   :  { %v2513_v42 = vsel %vm184_vm14, %v4238_v2, 0.0 }
0x12fa   :  { %2514 = vadd.xlane.f32.xlu2 %v2513_v42 }
0x1302   :  { %v2413_v16 = vpop.f32.mrf.mxu3 }
0x1303   :  { %2582 = vrot.lane.b32.xlu0 %v2413_v16, %s4350_s19 }
0x130a   :  { %v2543_v55 = vpop.f32.mrf.mxu3 }
0x130b   :  { %2590 = vrot.lane.b32.xlu0 %v2543_v55, %s4351_s20 }
0x1313   :  { %2156 = vrot.lane.b32.xlu0 %v5075_v20, %s4343_s8 }
0x131b   :  { %2286 = vrot.lane.b32.xlu0 %v5075_v20, %s4346_s15 }
0x1323   :  { %2546 = vrot.lane.b32.xlu0 %v5075_v20, %s4348_s17  ;;  %v2575_v20 = vpop.permute.xlu1 %2574 }
0x1324   :  { %v2596_v52 = vsel %vm184_vm14, %v2153_v41, %v2575_v20 }
0x1327   :  { %v2255_v3 = vpop.xlane.xlu2 %2254 }
0x132f   :  { %v2385_v6 = vpop.xlane.xlu2 %2384 }
0x134d   :  { %v2125_v57 = vpop.xlane.xlu1 %2124 }
0x134e   :  { %4239 = vrcp.f32 %v2125_v57 }
0x134f   :  { %4241 = vrcp.f32 %v2255_v3 }
0x1350   :  { %4243 = vrcp.f32 %v2385_v6 }
0x1354   :  { %v4240_v4 = vpop.eup %4239 }
0x1355   :  { %v2129_v36 = vmul.f32 %v4240_v4, %v4236_v22  ;;  %v4242_v43 = vpop.eup %4241 }
0x1356   :  { %v2259_v19 = vmul.f32 %v4242_v43, %v4232_v48  ;;  %v4244_v23 = vpop.eup %4243  ;;  %v1920_v48 = vld [vmem:[%s5694_s2 + $0x168] sm:$0xff] }
0x1357   :  { %v2389_v24 = vmul.f32 %v4244_v23, %v4234_v53  ;;  %2763 = vmatpush.msrb.mxu3 %v1920_v48  ;;  %v1917_v53 = vld [vmem:[%s5694_s2 + $0x150] sm:$0xff] }
0x1359   :  { %2764 = vmatpush.msrb.mxu3 %v1919_v49 }
0x135b   :  { %2765 = vmatpush.msrb.mxu3 %v1918_v51 }
0x135d   :  { %2766 = vmatpush.msrb.mxu3 %v1917_v53 }
0x135e   :  { %3980 = vmatmul.msk.f32.vlgmr.msrb.gmra.mxu3 %vm61_vm0, %v4306_v54  ;;  %v5330_v54 = vld [vmem:[%s5694_s2 + $0x1d2] ss:$0 sm:$0xff] }
0x1365   :  { %v2417_v47 = vpop.permute.xlu1 %2416 }
0x1366   :  { %3981 = vmatmul.msk.f32.gmra.mxu3 %vm61_vm0, %v4307_v56 }
0x136d   :  { %v2515_v17 = vpop.xlane.xlu2 %2514 }
0x136e   :  { %4245 = vrcp.f32 %v2515_v17  ;;  %3982 = vmatmul.msk.f32.gmra.mxu3 %vm61_vm0, %v4308_v38 }
0x1374   :  { %v4246_v25 = vpop.eup %4245 }
0x1375   :  { %v2583_v15 = vpop.permute.xlu0 %2582  ;;  %v2519_v26 = vmul.f32 %v4246_v25, %v4238_v2  ;;  %v1913_v2 = vld [vmem:[%s5694_s2 + $0x130] sm:$0xff] }
0x1376   :  { %v2598_v50 = vsel %vm726_vm15, %v2596_v52, %v2583_v15  ;;  %2742 = vmatpush.msra.mxu0 %v1913_v2 }
0x137d   :  { %v2591_v59 = vpop.permute.xlu0 %2590 }
0x137e   :  { %v2600_v61 = vsel %vm729_vm1, %v2598_v50, %v2591_v59 }
0x137f   :  { %3976 = vmatmul.msk.f32.vlgmr.msra.gmra.mxu2 %vm61_vm0, %v2600_v61 }
0x1385   :  { %v2157_v5 = vpop.permute.xlu0 %2156 }
0x1386   :  { %2177 = vmatpush.msra.mxu1 %v2157_v5 }
0x1387   :  { %3957 = vmatmul.msk.f32.vlgmr.msra.gmra.mxu1 %vm184_vm14, %v2129_v36 }
0x138d   :  { %v2287_v18 = vpop.permute.xlu0 %2286 }
0x138e   :  { %2307 = vmatpush.msrb.mxu1 %v2287_v18 }
0x138f   :  { %3963 = vmatmul.msk.f32.vlgmr.msrb.gmra.mxu1 %vm184_vm14, %v2259_v19 }
0x1390   :  { %2437 = vmatpush.msra.mxu1 %v2417_v47 }
0x1395   :  { %v2547_v8 = vpop.permute.xlu0 %2546 }
0x1396   :  { %2567 = vmatpush.msrb.mxu1 %v2547_v8  ;;  %v5264_v8 = vld [vmem:[%s5694_s2 + $0x1db] ss:$0 sm:$0xff] }
0x1397   :  { %3969 = vmatmul.msk.f32.vlgmr.msra.gmra.mxu1 %vm184_vm14, %v2389_v24 }
0x139f   :  { %3975 = vmatmul.msk.f32.vlgmr.msrb.gmra.mxu1 %vm184_vm14, %v2519_v26 }
0x1402   :  { %v2625_v60 = vpop.f32.mrf.mxu2 }
0x1403   :  { %v2631_v28 = vadd.f32 %v2625_v60, %v5021_v46  ;;  %v2768_v60 = vpop.f32.mrf.mxu3 }
0x1404   :  { %v2179_v7 = vpop.f32.mrf.mxu1 }
0x1405   :  { %v5195_v9 = vadd.f32 %v5191_v27, %v2631_v28 }
0x1407   :  { %v2638_v29 = vsel %vm61_vm0, %v5195_v9, 0.0 }
0x1408   :  { %2639 = vadd.xlane.f32.xlu2 %v2638_v29 }
0x140c   :  { %v2309_v30 = vpop.f32.mrf.mxu1 }
0x140d   :  { %2576 = vrot.lane.b32.xlu0 %v2309_v30, %s4349_s18 }
0x1414   :  { %v2439_v32 = vpop.f32.mrf.mxu1 }
0x141c   :  { %v2569_v33 = vpop.f32.mrf.mxu1 }
0x141d   :  { %2592 = vrot.lane.b32.xlu0 %v2569_v33, %s4351_s20 }
0x1420   :  { %2584 = vrot.lane.b32.xlu2 %v2439_v32, %s4350_s19  ;;  %v2771_v32 = vpop.f32.mrf.mxu3 }
0x147b   :  { %v2640_v11 = vpop.xlane.xlu2 %2639 }
0x147c   :  { %v2644_v46 = vmul.f32 %v2640_v11, %v4385_v10 }
0x147e   :  { %v5204_v58 = vsub.f32 %v5195_v9, %v2644_v46 }
0x147f   :  { %v2577_v35 = vpop.permute.xlu0 %2576 }
0x1480   :  { %v2648_v34 = vmul.f32 %v5204_v58, %v5204_v58  ;;  %v2597_v37 = vsel %vm184_vm14, %v2179_v7, %v2577_v35  ;;  %v2774_v35 = vpop.f32.mrf.mxu3 }
0x1482   :  { %v2650_v41 = vsel %vm61_vm0, %v2648_v34, 0.0 }
0x1483   :  { %2651 = vadd.xlane.f32.xlu1 %v2650_v41  ;;  %v2585_v1 = vpop.permute.xlu2 %2584 }
0x1484   :  { %v2599_v39 = vsel %vm726_vm15, %v2597_v37, %v2585_v1 }
0x148f   :  { %v2593_v40 = vpop.permute.xlu0 %2592 }
0x1490   :  { %v2601_v44 = vsel %vm729_vm1, %v2599_v39, %v2593_v40 }
0x1491   :  { %3977 = vmatmul.msk.f32.gmra.mxu2 %vm61_vm0, %v2601_v44 }
0x14f6   :  { %v2652_v31 = vpop.xlane.xlu1 %2651 }
0x14f7   :  { %v2656_v22 = vmul.f32 0.032258064, %v2652_v31 }
0x14f9   :  { %4247 = vrsqrt.f32 %v2656_v22  ;;  %vm2665_vm11 = vcmp.eq.f32.partialorder %v2656_v22, inf  ;;  %v2668_v20 = vand.u32 2147483648, %v2656_v22  ;;  %vm2667_vm12 = vcmp.eq.f32.partialorder %v2656_v22, 0.0 }
0x14ff   :  { %v4248_v42 = vpop.eup %4247 }
0x1500   :  { %v2659_v16 = vmul.f32 %v4248_v42, %v2656_v22 }
0x1502   :  { %v2660_v55 = vmul.f32 %v4248_v42, %v2659_v16 }
0x1504   :  { %v2661_v21 = vmul.f32 0.5, %v2660_v55 }
0x1506   :  { %v2662_v12 = vsub.f32 1.5, %v2661_v21 }
0x1508   :  { %v2663_v13 = vmul.f32 %v4248_v42, %v2662_v12 }
0x150a   :  { %v2664_v14 = vmul.f32 %v2663_v13, %v2656_v22 }
0x150c   :  { %v2666_v15 = vsel %vm2665_vm11, %v2656_v22, %v2664_v14 }
0x150d   :  { %v2669_v57 = vsel %vm2667_vm12, %v2668_v20, %v2666_v15 }
0x150e   :  { %v2682_v52 = vadd.f32 1e-06, %v2669_v57 }
0x1510   :  { %4249 = vrcp.f32 %v2682_v52  ;;  %v2695_v6 = vand.u32 2147483648, %v2682_v52  ;;  %v2693_v19 = vand.u32 2147483647, %v2682_v52  ;;  %vm2689_vm4 = vweird.f32 %v2682_v52 }
0x1512   :  { %v2696_v47 = vor.u32 1.1754944e-38, %v2695_v6  ;;  %vm2694_vm7 = vcmp.eq.f32.partialorder %v2693_v19, 8.507059e+37 }
0x1514   :  { %v2628_v50 = vpop.f32.mrf.mxu2 }
0x1515   :  { %v2632_v59 = vadd.f32 %v2628_v50, %v5026_v62  ;;  %v5258_v62 = vld [vmem:[%s5694_s2 + $0x1da] ss:$0 sm:$0xff] }
0x1516   :  { %v4250_v61 = vpop.eup %4249 }
0x1517   :  { %v5251_v3 = vadd.f32 %v5191_v27, %v2632_v59  ;;  %v2685_v4 = vmul.f32 %v4250_v61, %v2682_v52  ;;  %vm2690_vm13 = vweird.f32 %v4250_v61  ;;  %v4108_v27 = vld [vmem:[%s5694_s2 + $0x1d3] ss:$0 sm:$0xff] }
0x1518   :  { %vm2691_vm5 = vmor %vm2689_vm4, %vm2690_vm13  ;;  %v5272_v28 = vadd.f32 %v4108_v27, %v2768_v60  ;;  %v5287_v33 = vadd.f32 %v4108_v27, %v2771_v32  ;;  %v5304_v1 = vadd.f32 %v4108_v27, %v2774_v35 }
0x1519   :  { %v2641_v36 = vsel %vm61_vm0, %v5251_v3, 0.0  ;;  %v2686_v5 = vsub.f32 1.0, %v2685_v4 }
0x151a   :  { %2642 = vadd.xlane.f32.xlu0 %v2641_v36  ;;  %v5275_v7 = vrot.slane %v5272_v28, 2  ;;  %v5278_v29 = vrot.slane %v5272_v28, 4  ;;  %v5281_v30 = vrot.slane %v5272_v28, 6  ;;  %2787 = vst [vmem:[#allocation1] ss:$4 sm:$0xff] %v5272_v28  ;;  %v5290_v11 = vrot.slane %v5287_v33, 2 }
0x151b   :  { %v2687_v43 = vmul.f32 %v4250_v61, %v2686_v5  ;;  %2795 = vst [vmem:[#allocation1 + $0x20] ss:$4 sm:$0xff] %v5287_v33  ;;  %v5294_v46 = vrot.slane %v5287_v33, 4  ;;  %v5307_v37 = vrot.slane %v5304_v1, 2 }
0x151c   :  { %2789 = vst [vmem:[#allocation1 + $0x1] ss:$4 sm:$0xff] %v5275_v7 }
0x151d   :  { %v2688_v18 = vadd.f32 %v4250_v61, %v2687_v43  ;;  %2791 = vst [vmem:[#allocation1 + $0x2] ss:$4 sm:$0xff] %v5278_v29 }
0x151e   :  { %2793 = vst [vmem:[#allocation1 + $0x3] ss:$4 sm:$0xff] %v5281_v30 }
0x151f   :  { %v2692_v17 = vsel %vm2691_vm5, %v4250_v61, %v2688_v18 }
0x1520   :  { %v2697_v23 = vsel %vm2694_vm7, %v2696_v47, %v2692_v17 }
0x1521   :  { %v2712_v24 = vmul.f32 %v2697_v23, %v5204_v58  ;;  %v5297_v58 = vrot.slane %v5287_v33, 6 }
0x1522   :  { %v2797_v41 = vld.sshfl [vmem:[#allocation1 + $0x20] sm:$0xff pattern:$0x73625140] }
0x1523   :  { %v2715_v25 = vmul.f32 %v5258_v62, %v2712_v24  ;;  %3983 = vmatpush.xpose.msk.msra.mxu1 %vm184_vm14, %v2797_v41  ;;  %2833 = vst [vmem:[#allocation1 + $0x20] ss:$4 sm:$0xff] %v5307_v37 }
0x1525   :  { %v2718_v26 = vadd.f32 %v5264_v8, %v2715_v25  ;;  %v2796_v34 = vld.sshfl [vmem:[#allocation1] sm:$0xff pattern:$0x73625140] }
0x1526   :  { %2825 = vst [vmem:[#allocation1] ss:$4 sm:$0xff] %v5290_v11 }
0x1527   :  { %3978 = vmatmul.msk.f32.vlgmr.msra.gmra.mxu0 %vm61_vm0, %v2718_v26  ;;  %2827 = vst [vmem:[#allocation1 + $0x1] ss:$4 sm:$0xff] %v5294_v46  ;;  %3984 = vmatpush.xpose.msk.msra.mxu1 %vm184_vm14, %v2796_v34 }
0x1528   :  { %2829 = vst [vmem:[#allocation1 + $0x2] ss:$4 sm:$0xff] %v5297_v58 }
0x1529   :  { %2831 = vst [vmem:[#allocation1 + $0x3] ss:$4 sm:$0xff] %v5304_v1 }
0x152a   :  { %v2835_v63 = vld.sshfl [vmem:[#allocation1 + $0x20] sm:$0xff pattern:$0x73625140] }
0x152b   :  { %3986 = vmatpush.xpose.msk.msrb.mxu1 %vm184_vm14, %v2835_v63  ;;  %2893 = vst [vmem:[#allocation1 + $0x20] ss:$4 sm:$0xff] %v5287_v33 }
0x1530   :  { %v2834_v48 = vld.sshfl [vmem:[#allocation1] sm:$0xff pattern:$0x73625140] }
0x1531   :  { %2885 = vst [vmem:[#allocation1] ss:$4 sm:$0xff] %v5272_v28  ;;  %3987 = vmatpush.xpose.msk.msrb.mxu1 %vm184_vm14, %v2834_v48 }
0x1532   :  { %2887 = vst [vmem:[#allocation1 + $0x1] ss:$4 sm:$0xff] %v5275_v7  ;;  %v5348_v38 = vld.sshfl [vmem:[#allocation1 + $0x20] sm:$0xff pattern:$0x73625140] }
0x1533   :  { %2889 = vst [vmem:[#allocation1 + $0x2] ss:$4 sm:$0xff] %v5278_v29 }
0x1534   :  { %2891 = vst [vmem:[#allocation1 + $0x3] ss:$4 sm:$0xff] %v5281_v30 }
0x1535   :  { %2934 = vst [vmem:[#allocation1 + $0x20] ss:$4 sm:$0xff] %v5307_v37 }
0x153b   :  { %v2894_v53 = vld.sshfl [vmem:[#allocation1] sm:$0xff pattern:$0x73625140] }
0x153c   :  { %2926 = vst [vmem:[#allocation1] ss:$4 sm:$0xff] %v5290_v11  ;;  %2896 = vrot.lane.b32.xlu0 %v2894_v53, %s4340_s5  ;;  %v5357_v2 = vld.sshfl [vmem:[#allocation1 + $0x20] sm:$0xff pattern:$0x73625140] }
0x153d   :  { %2928 = vst [vmem:[#allocation1 + $0x1] ss:$4 sm:$0xff] %v5294_v46 }
0x153e   :  { %2930 = vst [vmem:[#allocation1 + $0x2] ss:$4 sm:$0xff] %v5297_v58 }
0x153f   :  { %2932 = vst [vmem:[#allocation1 + $0x3] ss:$4 sm:$0xff] %v5304_v1 }
0x1540   :  { %2977 = vst [vmem:[#allocation1 + $0x20] ss:$4 sm:$0xff] %v5287_v33 }
0x1546   :  { %v5337_v22 = vld.sshfl [vmem:[#allocation1] sm:$0xff pattern:$0x73625140] }
0x1547   :  { %2969 = vst [vmem:[#allocation1] ss:$4 sm:$0xff] %v5272_v28  ;;  %v2979_v16 = vld.sshfl [vmem:[#allocation1 + $0x20] sm:$0xff pattern:$0x73625140] }
0x1548   :  { %2971 = vst [vmem:[#allocation1 + $0x1] ss:$4 sm:$0xff] %v5275_v7  ;;  %2982 = vrot.lane.b32.xlu0 %v2979_v16, %s4339_s4 }
0x1549   :  { %2973 = vst [vmem:[#allocation1 + $0x2] ss:$4 sm:$0xff] %v5278_v29 }
0x154a   :  { %2975 = vst [vmem:[#allocation1 + $0x3] ss:$4 sm:$0xff] %v5281_v30 }
0x154b   :  { %3020 = vst [vmem:[#allocation1 + $0x20] ss:$4 sm:$0xff] %v5307_v37 }
0x1551   :  { %v2978_v0 = vld.sshfl [vmem:[#allocation1] sm:$0xff pattern:$0x73625140] }
0x1552   :  { %3012 = vst [vmem:[#allocation1] ss:$4 sm:$0xff] %v5290_v11  ;;  %2980 = vrot.lane.b32.xlu0 %v2978_v0, %s4339_s4  ;;  %v3022_v21 = vld.sshfl [vmem:[#allocation1 + $0x20] sm:$0xff pattern:$0x73625140] }
0x1553   :  { %3014 = vst [vmem:[#allocation1 + $0x1] ss:$4 sm:$0xff] %v5294_v46 }
0x1554   :  { %3016 = vst [vmem:[#allocation1 + $0x2] ss:$4 sm:$0xff] %v5297_v58 }
0x1555   :  { %3018 = vst [vmem:[#allocation1 + $0x3] ss:$4 sm:$0xff] %v5304_v1 }
0x1556   :  { %3083 = vst [vmem:[#allocation1 + $0x20] ss:$4 sm:$0xff] %v5287_v33 }
0x155c   :  { %v5353_v45 = vld.sshfl [vmem:[#allocation1] sm:$0xff pattern:$0x73625140] }
0x155d   :  { %3075 = vst [vmem:[#allocation1] ss:$4 sm:$0xff] %v5272_v28  ;;  %v5379_v13 = vld.sshfl [vmem:[#allocation1 + $0x20] sm:$0xff pattern:$0x73625140] }
0x155e   :  { %3077 = vst [vmem:[#allocation1 + $0x1] ss:$4 sm:$0xff] %v5275_v7 }
0x155f   :  { %3079 = vst [vmem:[#allocation1 + $0x2] ss:$4 sm:$0xff] %v5278_v29 }
0x1560   :  { %3081 = vst [vmem:[#allocation1 + $0x3] ss:$4 sm:$0xff] %v5281_v30 }
0x1561   :  { %3124 = vst [vmem:[#allocation1 + $0x20] ss:$4 sm:$0xff] %v5307_v37 }
0x1567   :  { %v5362_v42 = vld.sshfl [vmem:[#allocation1] sm:$0xff pattern:$0x73625140] }
0x1568   :  { %3116 = vst [vmem:[#allocation1] ss:$4 sm:$0xff] %v5290_v11  ;;  %v5386_v14 = vld.sshfl [vmem:[#allocation1 + $0x20] sm:$0xff pattern:$0x73625140] }
0x1569   :  { %3118 = vst [vmem:[#allocation1 + $0x1] ss:$4 sm:$0xff] %v5294_v46 }
0x156a   :  { %3120 = vst [vmem:[#allocation1 + $0x2] ss:$4 sm:$0xff] %v5297_v58 }
0x156b   :  { %3122 = vst [vmem:[#allocation1 + $0x3] ss:$4 sm:$0xff] %v5304_v1 }
0x156c   :  { %3167 = vst [vmem:[#allocation1 + $0x20] ss:$4 sm:$0xff] %v5287_v33 }
0x1572   :  { %v5371_v55 = vld.sshfl [vmem:[#allocation1] sm:$0xff pattern:$0x73625140] }
0x1573   :  { %3159 = vst [vmem:[#allocation1] ss:$4 sm:$0xff] %v5272_v28  ;;  %v3169_v15 = vld.sshfl [vmem:[#allocation1 + $0x20] sm:$0xff pattern:$0x73625140] }
0x1574   :  { %3161 = vst [vmem:[#allocation1 + $0x1] ss:$4 sm:$0xff] %v5275_v7  ;;  %3172 = vrot.lane.b32.xlu0 %v3169_v15, %s4342_s7 }
0x1575   :  { %3163 = vst [vmem:[#allocation1 + $0x2] ss:$4 sm:$0xff] %v5278_v29 }
0x1576   :  { %3165 = vst [vmem:[#allocation1 + $0x3] ss:$4 sm:$0xff] %v5281_v30 }
0x1577   :  { %3210 = vst [vmem:[#allocation1 + $0x20] ss:$4 sm:$0xff] %v5307_v37 }
0x157d   :  { %v3168_v12 = vld.sshfl [vmem:[#allocation1] sm:$0xff pattern:$0x73625140] }
0x157e   :  { %3202 = vst [vmem:[#allocation1] ss:$4 sm:$0xff] %v5290_v11  ;;  %v5400_v52 = vld.sshfl [vmem:[#allocation1 + $0x20] sm:$0xff pattern:$0x73625140]  ;;  %3170 = vrot.lane.b32.xlu0 %v3168_v12, %s4342_s7 }
0x157f   :  { %3204 = vst [vmem:[#allocation1 + $0x1] ss:$4 sm:$0xff] %v5294_v46 }
0x1580   :  { %3206 = vst [vmem:[#allocation1 + $0x2] ss:$4 sm:$0xff] %v5297_v58 }
0x1581   :  { %3208 = vst [vmem:[#allocation1 + $0x3] ss:$4 sm:$0xff] %v5304_v1 }
0x1582   :  { %3273 = vst [vmem:[#allocation1 + $0x20] ss:$4 sm:$0xff] %v5287_v33 }
0x1588   :  { %v5389_v20 = vld.sshfl [vmem:[#allocation1] sm:$0xff pattern:$0x73625140] }
0x1589   :  { %3265 = vst [vmem:[#allocation1] ss:$4 sm:$0xff] %v5272_v28  ;;  %v5407_v50 = vld.sshfl [vmem:[#allocation1 + $0x20] sm:$0xff pattern:$0x73625140] }
0x158a   :  { %3267 = vst [vmem:[#allocation1 + $0x1] ss:$4 sm:$0xff] %v5275_v7 }
0x158b   :  { %3269 = vst [vmem:[#allocation1 + $0x2] ss:$4 sm:$0xff] %v5278_v29 }
0x158c   :  { %3271 = vst [vmem:[#allocation1 + $0x3] ss:$4 sm:$0xff] %v5281_v30 }
0x158d   :  { %v2643_v39 = vpop.xlane.xlu0 %2642  ;;  %3314 = vst [vmem:[#allocation1 + $0x20] ss:$4 sm:$0xff] %v5307_v37 }
0x158e   :  { %v2645_v40 = vmul.f32 %v2643_v39, %v4385_v10 }
0x1590   :  { %v5313_v44 = vsub.f32 %v5251_v3, %v2645_v40 }
0x1592   :  { %v2649_v49 = vmul.f32 %v5313_v44, %v5313_v44 }
0x1593   :  { %v5397_v57 = vld.sshfl [vmem:[#allocation1] sm:$0xff pattern:$0x73625140] }
0x1594   :  { %v2653_v51 = vsel %vm61_vm0, %v2649_v49, 0.0  ;;  %3306 = vst [vmem:[#allocation1] ss:$4 sm:$0xff] %v5290_v11  ;;  %v5416_v61 = vld.sshfl [vmem:[#allocation1 + $0x20] sm:$0xff pattern:$0x73625140] }
0x1595   :  { %2654 = vadd.xlane.f32.xlu2 %v2653_v51  ;;  %3308 = vst [vmem:[#allocation1 + $0x1] ss:$4 sm:$0xff] %v5294_v46 }
0x1596   :  { %3310 = vst [vmem:[#allocation1 + $0x2] ss:$4 sm:$0xff] %v5297_v58 }
0x1597   :  { %3312 = vst [vmem:[#allocation1 + $0x3] ss:$4 sm:$0xff] %v5304_v1 }
0x1598   :  { %3357 = vst [vmem:[#allocation1 + $0x20] ss:$4 sm:$0xff] %v5287_v33 }
0x159e   :  { %v5410_v59 = vld.sshfl [vmem:[#allocation1] sm:$0xff pattern:$0x73625140] }
0x159f   :  { %3349 = vst [vmem:[#allocation1] ss:$4 sm:$0xff] %v5272_v28  ;;  %v4079_v6 = vpack.i.bf16 %v5410_v59, %v5397_v57  ;;  %v3359_v43 = vld.sshfl [vmem:[#allocation1 + $0x20] sm:$0xff pattern:$0x73625140] }
0x15a0   :  { %3351 = vst [vmem:[#allocation1 + $0x1] ss:$4 sm:$0xff] %v5275_v7  ;;  %3362 = vrot.lane.b32.xlu0 %v3359_v43, %s4341_s6 }
0x15a1   :  { %3353 = vst [vmem:[#allocation1 + $0x2] ss:$4 sm:$0xff] %v5278_v29 }
0x15a2   :  { %3355 = vst [vmem:[#allocation1 + $0x3] ss:$4 sm:$0xff] %v5281_v30 }
0x15a3   :  { %3400 = vst [vmem:[#allocation1 + $0x20] ss:$4 sm:$0xff] %v5307_v37 }
0x15a4   :  { %v2744_v56 = vpop.f32.mrf.mxu0 }
0x15a5   :  { %v5333_v31 = vadd.f32 %v5330_v54, %v2744_v56 }
0x15a7   :  { %3985 = vmatmul.msk.f32.vlgmr.msra.gmra.mxu1 %vm184_vm14, %v5333_v31 }
0x15a9   :  { %v5419_v5 = vld.sshfl [vmem:[#allocation1] sm:$0xff pattern:$0x73625140] }
0x15aa   :  { %3392 = vst [vmem:[#allocation1] ss:$4 sm:$0xff] %v5290_v11  ;;  %v3402_v23 = vld.sshfl [vmem:[#allocation1 + $0x20] sm:$0xff pattern:$0x73625140] }
0x15ab   :  { %3394 = vst [vmem:[#allocation1 + $0x1] ss:$4 sm:$0xff] %v5294_v46 }
0x15ac   :  { %3396 = vst [vmem:[#allocation1 + $0x2] ss:$4 sm:$0xff] %v5297_v58 }
0x15ad   :  { %3025 = vrot.lane.b32.xlu2 %v3022_v21, %s4339_s4  ;;  %3398 = vst [vmem:[#allocation1 + $0x3] ss:$4 sm:$0xff] %v5304_v1 }
0x15ae   :  { %3463 = vst [vmem:[#allocation1 + $0x20] ss:$4 sm:$0xff] %v5287_v33  ;;  %v2897_v0 = vpop.permute.xlu0 %2896 }
0x15b4   :  { %v3401_v25 = vld.sshfl [vmem:[#allocation1] sm:$0xff pattern:$0x73625140] }
0x15b5   :  { %3455 = vst [vmem:[#allocation1] ss:$4 sm:$0xff] %v5272_v28  ;;  %v5434_v41 = vld.sshfl [vmem:[#allocation1 + $0x20] sm:$0xff pattern:$0x73625140] }
0x15b6   :  { %3457 = vst [vmem:[#allocation1 + $0x1] ss:$4 sm:$0xff] %v5275_v7  ;;  %v5443_v7 = vld [vmem:[%s5693_s1 + $0x10] sm:$0xff] }
0x15b7   :  { %3459 = vst [vmem:[#allocation1 + $0x2] ss:$4 sm:$0xff] %v5278_v29 }
0x15b8   :  { %3461 = vst [vmem:[#allocation1 + $0x3] ss:$4 sm:$0xff] %v5281_v30 }
0x15b9   :  { %3504 = vst [vmem:[#allocation1 + $0x20] ss:$4 sm:$0xff] %v5307_v37 }
0x15bf   :  { %v5437_v28 = vld.sshfl [vmem:[#allocation1] sm:$0xff pattern:$0x73625140] }
0x15c0   :  { %3496 = vst [vmem:[#allocation1] ss:$4 sm:$0xff] %v5290_v11 }
0x15c1   :  { %3498 = vst [vmem:[#allocation1 + $0x1] ss:$4 sm:$0xff] %v5294_v46 }
0x15c2   :  { %3500 = vst [vmem:[#allocation1 + $0x2] ss:$4 sm:$0xff] %v5297_v58 }
0x15c3   :  { %3502 = vst [vmem:[#allocation1 + $0x3] ss:$4 sm:$0xff] %v5304_v1 }
0x1608   :  { %v2655_v4 = vpop.xlane.xlu2 %2654 }
0x1609   :  { %v2657_v36 = vmul.f32 0.032258064, %v2655_v4 }
0x160b   :  { %4251 = vrsqrt.f32 %v2657_v36  ;;  %vm2677_vm8 = vcmp.eq.f32.partialorder %v2657_v36, inf  ;;  %v2680_v60 = vand.u32 2147483648, %v2657_v36  ;;  %vm2679_vm9 = vcmp.eq.f32.partialorder %v2657_v36, 0.0 }
0x1611   :  { %v4252_v19 = vpop.eup %4251 }
0x1612   :  { %v2671_v18 = vmul.f32 %v4252_v19, %v2657_v36 }
0x1614   :  { %v2672_v47 = vmul.f32 %v4252_v19, %v2671_v18 }
0x1616   :  { %v2673_v17 = vmul.f32 0.5, %v2672_v47 }
0x1618   :  { %v2674_v24 = vsub.f32 1.5, %v2673_v17 }
0x161a   :  { %v2675_v26 = vmul.f32 %v4252_v19, %v2674_v24 }
0x161c   :  { %v2676_v27 = vmul.f32 %v2675_v26, %v2657_v36 }
0x161e   :  { %v2678_v32 = vsel %vm2677_vm8, %v2657_v36, %v2676_v27 }
0x161f   :  { %v2681_v34 = vsel %vm2679_vm9, %v2680_v60, %v2678_v32 }
0x1620   :  { %v2683_v35 = vadd.f32 1e-06, %v2681_v34 }
0x1622   :  { %4253 = vrcp.f32 %v2683_v35  ;;  %v2709_v11 = vand.u32 2147483648, %v2683_v35  ;;  %v2707_v49 = vand.u32 2147483647, %v2683_v35  ;;  %vm2703_vm11 = vweird.f32 %v2683_v35 }
0x1624   :  { %v2822_v33 = vpop.f32.mrf.mxu1  ;;  %v2710_v53 = vor.u32 1.1754944e-38, %v2709_v11  ;;  %vm2708_vm13 = vcmp.eq.f32.partialorder %v2707_v49, 8.507059e+37 }
0x1625   :  { %v2823_v29 = vadd.f32 %v5443_v7, %v2822_v33  ;;  %v5512_v33 = vld [vmem:[%s5693_s1 + $0x18] sm:$0xff] }
0x1627   :  { %v2863_v30 = vsel %vm1002_vm3, %v2823_v29, -inf }
0x1628   :  { %v4254_v37 = vpop.eup %4253  ;;  %2864 = vmax.xlane.f32.xlu1 %v2863_v30 }
0x1629   :  { %v2699_v39 = vmul.f32 %v4254_v37, %v2683_v35  ;;  %vm2704_vm10 = vweird.f32 %v4254_v37 }
0x162a   :  { %vm2705_vm12 = vmor %vm2703_vm11, %vm2704_vm10 }
0x162b   :  { %v2700_v40 = vsub.f32 1.0, %v2699_v39 }
0x162d   :  { %v2701_v48 = vmul.f32 %v4254_v37, %v2700_v40 }
0x162f   :  { %v2702_v51 = vadd.f32 %v4254_v37, %v2701_v48 }
0x1631   :  { %v2706_v56 = vsel %vm2705_vm12, %v4254_v37, %v2702_v51 }
0x1632   :  { %v2711_v46 = vsel %vm2708_vm13, %v2710_v53, %v2706_v56 }
0x1633   :  { %v2713_v58 = vmul.f32 %v2711_v46, %v5313_v44  ;;  %v4074_v44 = vpack.i.bf16 %v5371_v55, %v5362_v42 }
0x1635   :  { %v2716_v63 = vmul.f32 %v5258_v62, %v2713_v58  ;;  %v2983_v62 = vpop.permute.xlu0 %2982 }
0x1636   :  { %3993 = vmatpush.xpose.msk.msra.mxu1 %vm184_vm14, %v2983_v62 }
0x1637   :  { %v2719_v1 = vadd.f32 %v5264_v8, %v2716_v63 }
0x1639   :  { %3979 = vmatmul.msk.f32.gmra.mxu0 %vm61_vm0, %v2719_v1 }
0x163d   :  { %v2981_v8 = vpop.permute.xlu0 %2980 }
0x163e   :  { %3994 = vmatpush.xpose.msk.msra.mxu1 %vm184_vm14, %v2981_v8 }
0x1641   :  { %2898 = vrot.lane.b32.xlu1 %v5348_v38, %s4340_s5 }
0x1649   :  { %3023 = vrot.lane.b32.xlu1 %v5353_v45, %s4339_s4 }
0x1651   :  { %3215 = vrot.lane.b32.xlu1 %v5400_v52, %s4342_s7 }
0x1659   :  { %3213 = vrot.lane.b32.xlu1 %v5389_v20, %s4342_s7  ;;  %v3173_v20 = vpop.permute.xlu0 %3172 }
0x1661   :  { %3405 = vrot.lane.b32.xlu1 %v3402_v23, %s4341_s6 }
0x1669   :  { %3403 = vrot.lane.b32.xlu1 %v3401_v25, %s4341_s6 }
0x1671   :  { %3347 = vrot.lane.b32.xlu1 %v5333_v31, %s4341_s6 }
0x1679   :  { %2939 = vrot.lane.b32.xlu1 %v5357_v2, %s4340_s5  ;;  %v3026_v2 = vpop.permute.xlu2 %3025 }
0x1681   :  { %4075 = vrot.lane.b32.xlu1 %v4074_v44, %s4338_s30 }
0x1689   :  { %3129 = vrot.lane.b32.xlu1 %v5386_v14, %s4338_s30  ;;  %v3171_v14 = vpop.permute.xlu0 %3170 }
0x1691   :  { %v3363_v23 = vpop.permute.xlu0 %3362 }
0x169b   :  { %v2865_v38 = vpop.xlane.xlu1 %2864 }
0x169c   :  { %v2869_v45 = vsub.f32 %v2823_v29, %v2865_v38 }
0x169e   :  { %v2871_v16 = vmul.f32 1.442695, %v2869_v45 }
0x16a0   :  { %4255 = vpow2.f32 %v2871_v16 }
0x16a6   :  { %v4256_v21 = vpop.eup %4255 }
0x16a7   :  { %v2875_v12 = vsel %vm1002_vm3, %v4256_v21, 0.0 }
0x16a8   :  { %2876 = vadd.xlane.f32.xlu0 %v2875_v12 }
0x16b3   :  { %v2899_v15 = vpop.permute.xlu1 %2898 }
0x16b4   :  { %3989 = vmatpush.msk.msrb.mxu2 %vm1044_vm2, %v2899_v15 }
0x16b6   :  { %v2747_v52 = vpop.f32.mrf.mxu0  ;;  %2921 = vmatpush.msrb.mxu2 %v2897_v0 }
0x16b7   :  { %v2748_v42 = vadd.f32 %v5330_v54, %v2747_v52 }
0x16b8   :  { %3996 = vmatpush.xpose.msk.msra.mxu2 %vm184_vm14, %v3026_v2 }
0x16b9   :  { %3010 = vrot.lane.b32.xlu2 %v2748_v42, %s4339_s4  ;;  %3988 = vmatmul.msk.f32.vlgmr.msrb.gmra.mxu1 %vm184_vm14, %v2748_v42 }
0x16ba   :  { %4003 = vmatpush.xpose.msk.msrb.mxu1 %vm184_vm14, %v3173_v20 }
0x16bb   :  { %v3024_v55 = vpop.permute.xlu1 %3023 }
0x16bc   :  { %3360 = vrot.lane.b32.xlu0 %v5419_v5, %s4341_s6  ;;  %3997 = vmatpush.xpose.msk.msra.mxu2 %vm184_vm14, %v3024_v55 }
0x16be   :  { %4004 = vmatpush.xpose.msk.msrb.mxu1 %vm184_vm14, %v3171_v14 }
0x16c1   :  { %2967 = vrot.lane.b32.xlu2 %v5333_v31, %s4339_s4 }
0x16c3   :  { %v3216_v54 = vpop.permute.xlu1 %3215 }
0x16c9   :  { %3200 = vrot.lane.b32.xlu2 %v2748_v42, %s4342_s7 }
0x16cb   :  { %v3214_v4 = vpop.permute.xlu1 %3213 }
0x16d1   :  { %3157 = vrot.lane.b32.xlu2 %v5333_v31, %s4342_s7 }
0x16d3   :  { %v3406_v36 = vpop.permute.xlu1 %3405 }
0x16d9   :  { %3390 = vrot.lane.b32.xlu2 %v2748_v42, %s4341_s6 }
0x16db   :  { %v3404_v43 = vpop.permute.xlu1 %3403 }
0x16e3   :  { %v3348_v5 = vpop.permute.xlu1 %3347 }
0x16eb   :  { %v2940_v19 = vpop.permute.xlu1 %2939 }
0x16ec   :  { %3991 = vmatpush.msk.msrb.mxu0 %vm1044_vm2, %v2940_v19 }
0x16f3   :  { %v5493_v18 = vpop.permute.xlu1 %4075 }
0x16f4   :  { %v4078_v17 = vunpack.i.h.bf16 %v5493_v18  ;;  %v4077_v42 = vunpack.i.l.bf16 %v5493_v18 }
0x16fb   :  { %v3130_v47 = vpop.permute.xlu1 %3129 }
0x16fc   :  { %4001 = vmatpush.msk.msra.mxu3 %vm1044_vm2, %v3130_v47 }
0x16fe   :  { %3152 = vmatpush.msra.mxu3 %v4078_v17 }
0x1713   :  { %v3011_v24 = vpop.permute.xlu2 %3010 }
0x171b   :  { %v2968_v25 = vpop.permute.xlu2 %2967  ;;  %v2877_v31 = vpop.xlane.xlu0 %2876 }
0x171c   :  { %4257 = vrcp.f32 %v2877_v31  ;;  %3995 = vmatmul.msk.f32.vlgmr.msra.gmra.mxu1 %vm184_vm14, %v2968_v25 }
0x171d   :  { %4013 = vmatpush.xpose.msk.msra.mxu1 %vm184_vm14, %v3363_v23 }
0x1722   :  { %v4258_v26 = vpop.eup %4257 }
0x1723   :  { %v2883_v27 = vmul.f32 %v4258_v26, %v4256_v21  ;;  %v3201_v60 = vpop.permute.xlu2 %3200 }
0x1725   :  { %3990 = vmatmul.msk.f32.vlgmr.msrb.gmra.mxu2 %vm1002_vm3, %v2883_v27 }
0x1726   :  { %4006 = vmatpush.xpose.msk.msrb.mxu2 %vm184_vm14, %v3216_v54 }
0x172a   :  { %4007 = vmatpush.xpose.msk.msrb.mxu2 %vm184_vm14, %v3214_v4 }
0x172b   :  { %v3158_v32 = vpop.permute.xlu2 %3157 }
0x172c   :  { %4005 = vmatmul.msk.f32.vlgmr.msrb.gmra.mxu1 %vm184_vm14, %v3158_v32 }
0x172d   :  { %3998 = vmatmul.msk.f32.vlgmr.msra.gmra.mxu2 %vm184_vm14, %v3011_v24 }
0x172e   :  { %4016 = vmatpush.xpose.msk.msra.mxu2 %vm184_vm14, %v3406_v36  ;;  %v3361_v34 = vpop.permute.xlu0 %3360 }
0x172f   :  { %4014 = vmatpush.xpose.msk.msra.mxu1 %vm184_vm14, %v3361_v34 }
0x1732   :  { %4017 = vmatpush.xpose.msk.msra.mxu2 %vm184_vm14, %v3404_v43 }
0x1733   :  { %v3391_v37 = vpop.permute.xlu2 %3390 }
0x1734   :  { %4015 = vmatmul.msk.f32.vlgmr.msra.gmra.mxu1 %vm184_vm14, %v3348_v5 }
0x1735   :  { %4008 = vmatmul.msk.f32.vlgmr.msrb.gmra.mxu2 %vm184_vm14, %v3201_v60 }
0x1736   :  { %v2860_v35 = vpop.f32.mrf.mxu1 }
0x1737   :  { %v2861_v29 = vadd.f32 %v5512_v33, %v2860_v35 }
0x1739   :  { %v2866_v30 = vsel %vm1002_vm3, %v2861_v29, -inf }
0x173a   :  { %2867 = vmax.xlane.f32.xlu2 %v2866_v30 }
0x173d   :  { %4018 = vmatmul.msk.f32.vlgmr.msra.gmra.mxu2 %vm184_vm14, %v3391_v37 }
0x1799   :  { %v3007_v39 = vpop.f32.mrf.mxu1 }
0x179a   :  { %v3008_v40 = vadd.f32 %v5443_v7, %v3007_v39 }
0x179c   :  { %v3053_v11 = vsel %vm1002_vm3, %v3008_v40, -inf }
0x179d   :  { %3054 = vmax.xlane.f32.xlu0 %v3053_v11 }
0x17a8   :  { %v5520_v51 = vpop.f32.mrf.mxu2 }
0x17a9   :  { %v3197_v48 = vpop.f32.mrf.mxu1 }
0x17aa   :  { %v3198_v49 = vadd.f32 %v5443_v7, %v3197_v48 }
0x17ac   :  { %v3243_v53 = vsel %vm1002_vm3, %v3198_v49, -inf }
0x17ad   :  { %3244 = vmax.xlane.f32.xlu2 %v3243_v53  ;;  %v2868_v62 = vpop.xlane.xlu2 %2867 }
0x17ae   :  { %v2870_v8 = vsub.f32 %v2861_v29, %v2868_v62 }
0x17b0   :  { %v3050_v63 = vpop.f32.mrf.mxu2  ;;  %v2873_v44 = vmul.f32 1.442695, %v2870_v8  ;;  %v3506_v8 = vld.sshfl [vmem:[#allocation1 + $0x20] sm:$0xff pattern:$0x73625140] }
0x17b1   :  { %2937 = vrot.lane.b32.xlu0 %v5337_v22, %s4340_s5  ;;  %v3387_v56 = vpop.f32.mrf.mxu1  ;;  %v3051_v1 = vadd.f32 %v5512_v33, %v3050_v63 }
0x17b2   :  { %v3388_v46 = vadd.f32 %v5443_v7, %v3387_v56  ;;  %4259 = vpow2.f32 %v2873_v44 }
0x17b3   :  { %v3056_v0 = vsel %vm1002_vm3, %v3051_v1, -inf }
0x17b4   :  { %v3433_v58 = vsel %vm1002_vm3, %v3388_v46, -inf }
0x17b5   :  { %3434 = vmax.xlane.f32.xlu1 %v3433_v58  ;;  %v3505_v58 = vld.sshfl [vmem:[#allocation1] sm:$0xff pattern:$0x73625140] }
0x17b6   :  { %v4084_v63 = vpack.i.bf16 %v3505_v58, %v5437_v28 }
0x17b8   :  { %v4260_v22 = vpop.eup %4259  ;;  %v3240_v36 = vpop.f32.mrf.mxu2 }
0x17b9   :  { %v2878_v7 = vsel %vm1002_vm3, %v4260_v22, 0.0  ;;  %v3241_v43 = vadd.f32 %v5512_v33, %v3240_v36 }
0x17bb   :  { %v3246_v19 = vsel %vm1002_vm3, %v3241_v43, -inf }
0x17bd   :  { %3057 = vmax.xlane.f32.xlu1 %v3056_v0 }
0x17c0   :  { %v3430_v25 = vpop.f32.mrf.mxu2 }
0x17c5   :  { %3088 = vrot.lane.b32.xlu2 %v5379_v13, %s4338_s30 }
0x17d6   :  { %3278 = vrot.lane.b32.xlu1 %v5407_v50, %s4344_s9 }
0x17db   :  { %2879 = vadd.xlane.f32.xlu0 %v2878_v7 }
0x1810   :  { %v3055_v38 = vpop.xlane.xlu0 %3054 }
0x1811   :  { %v3059_v45 = vsub.f32 %v3008_v40, %v3055_v38 }
0x1813   :  { %v3061_v16 = vmul.f32 1.442695, %v3059_v45 }
0x1815   :  { %4261 = vpow2.f32 %v3061_v16 }
0x181b   :  { %v4262_v21 = vpop.eup %4261 }
0x181c   :  { %v3065_v12 = vsel %vm1002_vm3, %v4262_v21, 0.0 }
0x181d   :  { %3066 = vadd.xlane.f32.xlu2 %v3065_v12 }
0x1820   :  { %v3245_v13 = vpop.xlane.xlu2 %3244 }
0x1821   :  { %v3249_v20 = vsub.f32 %v3198_v49, %v3245_v13 }
0x1823   :  { %v3251_v15 = vmul.f32 1.442695, %v3249_v20  ;;  %v2938_v2 = vpop.permute.xlu0 %2937 }
0x1824   :  { %2962 = vmatpush.msrb.mxu0 %v2938_v2 }
0x1825   :  { %4263 = vpow2.f32 %v3251_v15 }
0x1828   :  { %v3089_v52 = vpop.permute.xlu2 %3088  ;;  %v3435_v50 = vpop.xlane.xlu1 %3434 }
0x1829   :  { %v3439_v55 = vsub.f32 %v3388_v46, %v3435_v50  ;;  %3999 = vmatpush.msk.msra.mxu0 %vm1044_vm2, %v3089_v52 }
0x182b   :  { %v4264_v14 = vpop.eup %4263  ;;  %v3441_v54 = vmul.f32 1.442695, %v3439_v55  ;;  %3111 = vmatpush.msra.mxu0 %v4077_v42 }
0x182c   :  { %v3255_v4 = vsel %vm1002_vm3, %v4264_v14, 0.0 }
0x182d   :  { %4265 = vpow2.f32 %v3441_v54  ;;  %3256 = vadd.xlane.f32.xlu0 %v3255_v4 }
0x1830   :  { %v3058_v17 = vpop.xlane.xlu1 %3057 }
0x1831   :  { %v3060_v23 = vsub.f32 %v3051_v1, %v3058_v17  ;;  %v1922_v17 = vld [vmem:[%s5694_s2 + $0x178] sm:$0xff] }
0x1833   :  { %v5539_v5 = vpop.eup %4265  ;;  %v3063_v26 = vmul.f32 1.442695, %v3060_v23  ;;  %v1921_v23 = vld [vmem:[%s5694_s2 + $0x170] sm:$0xff] }
0x1834   :  { %v3445_v18 = vsel %vm1002_vm3, %v5539_v5, 0.0 }
0x1835   :  { %3319 = vrot.lane.b32.xlu2 %v5416_v61, %s4344_s9  ;;  %3247 = vmax.xlane.f32.xlu0 %v3246_v19  ;;  %v3431_v61 = vadd.f32 %v5512_v33, %v3430_v25 }
0x1836   :  { %3446 = vadd.xlane.f32.xlu1 %v3445_v18  ;;  %v1924_v18 = vld [vmem:[%s5694_s2 + $0x188] sm:$0xff] }
0x1837   :  { %v3436_v57 = vsel %vm1002_vm3, %v3431_v61, -inf  ;;  %3585 = vmatpush.msrb.mxu1 %v1924_v18 }
0x1848   :  { %v3279_v27 = vpop.permute.xlu1 %3278 }
0x1849   :  { %4080 = vrot.lane.b32.xlu0 %v4079_v6, %s4344_s9 }
0x184e   :  { %v2880_v47 = vpop.xlane.xlu0 %2879 }
0x184f   :  { %4267 = vrcp.f32 %v2880_v47  ;;  %3468 = vrot.lane.b32.xlu1 %v5434_v41, %s4345_s10  ;;  %v1923_v47 = vld [vmem:[%s5694_s2 + $0x180] sm:$0xff] }
0x1850   :  { %4269 = vpow2.f32 %v3063_v26  ;;  %3586 = vmatpush.msrb.mxu1 %v1923_v47  ;;  %v4112_v47 = vld [vmem:[%s5694_s2 + $0x1dd] ss:$0 sm:$0xff] }
0x1852   :  { %3587 = vmatpush.msrb.mxu1 %v1922_v17 }
0x1854   :  { %3588 = vmatpush.msrb.mxu1 %v1921_v23 }
0x1855   :  { %v4268_v24 = vpop.eup %4267 }
0x1856   :  { %v2884_v31 = vmul.f32 %v4268_v24, %v4260_v22  ;;  %v4270_v59 = vpop.eup %4269 }
0x1857   :  { %v3068_v6 = vsel %vm1002_vm3, %v4270_v59, 0.0 }
0x1858   :  { %3992 = vmatmul.msk.f32.vlgmr.msrb.gmra.mxu0 %vm1002_vm3, %v2884_v31 }
0x1859   :  { %4009 = vmatpush.msk.msrb.mxu0 %vm1044_vm2, %v3279_v27 }
0x185e   :  { %3437 = vmax.xlane.f32.xlu2 %v3436_v57 }
0x1866   :  { %3069 = vadd.xlane.f32.xlu2 %v3068_v6 }
0x1890   :  { %v3067_v41 = vpop.xlane.xlu2 %3066 }
0x1891   :  { %4271 = vrcp.f32 %v3067_v41 }
0x1897   :  { %v4272_v60 = vpop.eup %4271 }
0x1898   :  { %v3073_v32 = vmul.f32 %v4272_v60, %v4262_v21  ;;  %v3320_v34 = vpop.permute.xlu2 %3319 }
0x1899   :  { %4011 = vmatpush.msk.msrb.mxu3 %vm1044_vm2, %v3320_v34 }
0x189a   :  { %4000 = vmatmul.msk.f32.vlgmr.msra.gmra.mxu0 %vm1002_vm3, %v3073_v32 }
0x18a0   :  { %v3257_v35 = vpop.xlane.xlu0 %3256 }
0x18a8   :  { %v3248_v33 = vpop.xlane.xlu0 %3247 }
0x18a9   :  { %v3250_v29 = vsub.f32 %v3241_v43, %v3248_v33  ;;  %v3447_v40 = vpop.xlane.xlu1 %3446 }
0x18ab   :  { %v3253_v30 = vmul.f32 1.442695, %v3250_v29 }
0x18ad   :  { %4273 = vpow2.f32 %v3253_v30 }
0x18ae   :  { %4275 = vrcp.f32 %v3257_v35 }
0x18b3   :  { %v4274_v37 = vpop.eup %4273 }
0x18b4   :  { %v3258_v39 = vsel %vm1002_vm3, %v4274_v37, 0.0  ;;  %v4276_v11 = vpop.eup %4275 }
0x18b5   :  { %3259 = vadd.xlane.f32.xlu2 %v3258_v39  ;;  %v3263_v56 = vmul.f32 %v4276_v11, %v4264_v14 }
0x18bb   :  { %v4081_v48 = vpop.permute.xlu0 %4080 }
0x18bc   :  { %v4083_v49 = vunpack.i.h.bf16 %v4081_v48  ;;  %v4082_v53 = vunpack.i.l.bf16 %v4081_v48 }
0x18be   :  { %3301 = vmatpush.msrb.mxu0 %v4082_v53  ;;  %3342 = vmatpush.msrb.mxu3 %v4083_v49 }
0x18bf   :  { %4010 = vmatmul.msk.f32.vlgmr.msrb.gmra.mxu0 %vm1002_vm3, %v3263_v56 }
0x18c1   :  { %v3469_v46 = vpop.permute.xlu1 %3468 }
0x18c2   :  { %4019 = vmatpush.msk.msra.mxu0 %vm1044_vm2, %v3469_v46 }
0x18cd   :  { %4085 = vrot.lane.b32.xlu2 %v4084_v63, %s4345_s10 }
0x18d1   :  { %v3438_v1 = vpop.xlane.xlu2 %3437 }
0x18d2   :  { %v3440_v0 = vsub.f32 %v3431_v61, %v3438_v1  ;;  %v1928_v1 = vld [vmem:[%s5694_s2 + $0x1a8] sm:$0xff] }
0x18d3   :  { %3704 = vmatpush.msrb.mxu2 %v1928_v1 }
0x18d4   :  { %v3443_v62 = vmul.f32 1.442695, %v3440_v0  ;;  %v1927_v0 = vld [vmem:[%s5694_s2 + $0x1a0] sm:$0xff] }
0x18d5   :  { %3509 = vrot.lane.b32.xlu2 %v3506_v8, %s4345_s10  ;;  %v2964_v28 = vpop.f32.mrf.mxu0  ;;  %3705 = vmatpush.msrb.mxu2 %v1927_v0  ;;  %v1929_v0 = vld [vmem:[%s5694_s2 + $0x1b0] sm:$0xff] }
0x18d6   :  { %4277 = vpow2.f32 %v3443_v62 }
0x18d9   :  { %v3070_v44 = vpop.xlane.xlu2 %3069 }
0x18da   :  { %4279 = vrcp.f32 %v3070_v44 }
0x18db   :  { %4281 = vrcp.f32 %v3447_v40 }
0x18dc   :  { %v4278_v22 = vpop.eup %4277 }
0x18dd   :  { %v3448_v7 = vsel %vm1002_vm3, %v4278_v22, 0.0 }
0x18de   :  { %3449 = vadd.xlane.f32.xlu0 %v3448_v7 }
0x18e0   :  { %v4280_v38 = vpop.eup %4279 }
0x18e1   :  { %v3074_v45 = vmul.f32 %v4280_v38, %v4270_v59  ;;  %v4282_v12 = vpop.eup %4281 }
0x18e2   :  { %v3453_v52 = vmul.f32 %v4282_v12, %v5539_v5 }
0x18e3   :  { %4002 = vmatmul.msk.f32.vlgmr.msra.gmra.mxu3 %vm1002_vm3, %v3074_v45 }
0x1917   :  { %v3113_v16 = vpop.f32.mrf.mxu0 }
0x1918   :  { %3539 = vrot.lane.b32.xlu1 %v3113_v16, %s4349_s18  ;;  %v1926_v16 = vld [vmem:[%s5694_s2 + $0x198] sm:$0xff] }
0x1919   :  { %3706 = vmatpush.msrb.mxu2 %v1926_v16 }
0x1928   :  { %v3260_v21 = vpop.xlane.xlu2 %3259 }
0x1929   :  { %4283 = vrcp.f32 %v3260_v21 }
0x192f   :  { %v4284_v13 = vpop.eup %4283 }
0x1930   :  { %v3264_v20 = vmul.f32 %v4284_v13, %v4274_v37  ;;  %v4086_v15 = vpop.permute.xlu2 %4085  ;;  %v1925_v13 = vld [vmem:[%s5694_s2 + $0x190] sm:$0xff] }
0x1931   :  { %v4087_v2 = vunpack.i.l.bf16 %v4086_v15  ;;  %v4088_v42 = vunpack.i.h.bf16 %v4086_v15  ;;  %3707 = vmatpush.msrb.mxu2 %v1925_v13 }
0x1932   :  { %4012 = vmatmul.msk.f32.vlgmr.msrb.gmra.mxu3 %vm1002_vm3, %v3264_v20 }
0x1933   :  { %3491 = vmatpush.msra.mxu0 %v4087_v2 }
0x1934   :  { %4020 = vmatmul.msk.f32.vlgmr.msra.gmra.mxu0 %vm1002_vm3, %v3453_v52 }
0x1938   :  { %v3510_v50 = vpop.permute.xlu2 %3509 }
0x1939   :  { %4021 = vmatpush.msk.msra.mxu3 %vm1044_vm2, %v3510_v50 }
0x193b   :  { %3532 = vmatpush.msra.mxu3 %v4088_v42 }
0x193c   :  { %v3303_v55 = vpop.f32.mrf.mxu0 }
0x193d   :  { %3547 = vrot.lane.b32.xlu2 %v3303_v55, %s4350_s19 }
0x1951   :  { %v3450_v14 = vpop.xlane.xlu0 %3449 }
0x1952   :  { %4285 = vrcp.f32 %v3450_v14 }
0x1958   :  { %v4286_v54 = vpop.eup %4285 }
0x1959   :  { %v3454_v4 = vmul.f32 %v4286_v54, %v4278_v22 }
0x195b   :  { %4022 = vmatmul.msk.f32.vlgmr.msra.gmra.mxu3 %vm1002_vm3, %v3454_v4 }
0x1966   :  { %v3154_v36 = vpop.f32.mrf.mxu3 }
0x1967   :  { %3541 = vrot.lane.b32.xlu0 %v3154_v36, %s4349_s18 }
0x198a   :  { %v3540_v24 = vpop.permute.xlu1 %3539 }
0x198b   :  { %v3561_v31 = vsel %vm184_vm14, %v5520_v51, %v3540_v24  ;;  %v4110_v51 = vld [vmem:[%s5694_s2 + $0x1d4] ss:$0 sm:$0xff] }
0x1997   :  { %v3548_v25 = vpop.permute.xlu2 %3547 }
0x1998   :  { %v3563_v26 = vsel %vm726_vm15, %v3561_v31, %v3548_v25 }
0x19b1   :  { %v3493_v43 = vpop.f32.mrf.mxu0 }
0x19b2   :  { %3555 = vrot.lane.b32.xlu1 %v3493_v43, %s4351_s20 }
0x19b5   :  { %v3344_v5 = vpop.f32.mrf.mxu3 }
0x19b6   :  { %3549 = vrot.lane.b32.xlu2 %v3344_v5, %s4350_s19  ;;  %v4111_v5 = vld [vmem:[%s5694_s2 + $0x1dc] ss:$0 sm:$0xff] }
0x19d9   :  { %v3542_v57 = vpop.permute.xlu0 %3541 }
0x19da   :  { %v3562_v6 = vsel %vm184_vm14, %v2964_v28, %v3542_v57 }
0x19de   :  { %v3534_v19 = vpop.f32.mrf.mxu3 }
0x19df   :  { %3557 = vrot.lane.b32.xlu1 %v3534_v19, %s4351_s20 }
0x1a10   :  { %v3550_v59 = vpop.permute.xlu2 %3549 }
0x1a11   :  { %v3564_v41 = vsel %vm726_vm15, %v3562_v6, %v3550_v59  ;;  %v1932_v59 = vld [vmem:[%s5694_s2 + $0x1c8] sm:$0xff] }
0x1a12   :  { %4027 = vmatpush.xpose.msk.msrb.mxu0 %vm1858_vm6, %v1932_v59 }
0x1a24   :  { %v3556_v27 = vpop.permute.xlu1 %3555 }
0x1a25   :  { %v3565_v61 = vsel %vm729_vm1, %v3563_v26, %v3556_v27 }
0x1a26   :  { %4023 = vmatmul.msk.f32.vlgmr.msrb.gmra.mxu1 %vm61_vm0, %v3565_v61 }
0x1a51   :  { %v3558_v60 = vpop.permute.xlu1 %3557 }
0x1a52   :  { %v3566_v32 = vsel %vm729_vm1, %v3564_v41, %v3558_v60  ;;  %v1931_v41 = vld [vmem:[%s5694_s2 + $0x1c0] sm:$0xff] }
0x1a53   :  { %4024 = vmatmul.msk.f32.gmra.mxu1 %vm61_vm0, %v3566_v32  ;;  %4028 = vmatpush.xpose.msk.msrb.mxu0 %vm1858_vm6, %v1931_v41 }
0x1aa3   :  { %v3590_v34 = vpop.f32.mrf.mxu1 }
0x1aa4   :  { %v3596_v35 = vadd.f32 %v3590_v34, %v5195_v9 }
0x1aa6   :  { %v5603_v33 = vadd.f32 %v4110_v51, %v3596_v35  ;;  %v1930_v35 = vld [vmem:[%s5694_s2 + $0x1b8] sm:$0xff] }
0x1aa7   :  { %4029 = vmatpush.xpose.msk.msrb.mxu0 %vm1858_vm6, %v1930_v35  ;;  %v4115_v35 = vld [vmem:[%s5694_s2 + $0x1e0] ss:$0 sm:$0xff] }
0x1aa8   :  { %v3603_v29 = vsel %vm61_vm0, %v5603_v33, 0.0 }
0x1aa9   :  { %3604 = vadd.xlane.f32.xlu2 %v3603_v29 }
0x1aab   :  { %4030 = vmatpush.xpose.msk.msrb.mxu0 %vm1858_vm6, %v1929_v0 }
0x1ad0   :  { %v3593_v30 = vpop.f32.mrf.mxu1 }
0x1ad1   :  { %v3597_v37 = vadd.f32 %v3593_v30, %v5251_v3 }
0x1ad3   :  { %v5608_v39 = vadd.f32 %v4110_v51, %v3597_v37 }
0x1ad5   :  { %v3606_v40 = vsel %vm61_vm0, %v5608_v39, 0.0 }
0x1ad6   :  { %3607 = vadd.xlane.f32.xlu1 %v3606_v40 }
0x1b1c   :  { %v3605_v11 = vpop.xlane.xlu2 %3604 }
0x1b1d   :  { %v3609_v48 = vmul.f32 %v3605_v11, %v4385_v10 }
0x1b1f   :  { %v3611_v9 = vsub.f32 %v5603_v33, %v3609_v48 }
0x1b21   :  { %v3613_v49 = vmul.f32 %v3611_v9, %v3611_v9 }
0x1b23   :  { %v3615_v53 = vsel %vm61_vm0, %v3613_v49, 0.0 }
0x1b24   :  { %3616 = vadd.xlane.f32.xlu0 %v3615_v53 }
0x1b49   :  { %v3608_v56 = vpop.xlane.xlu1 %3607 }
0x1b4a   :  { %v3610_v46 = vmul.f32 %v3608_v56, %v4385_v10 }
0x1b4c   :  { %v5617_v3 = vsub.f32 %v5608_v39, %v3610_v46 }
0x1b4e   :  { %v3614_v58 = vmul.f32 %v5617_v3, %v5617_v3 }
0x1b50   :  { %v3618_v63 = vsel %vm61_vm0, %v3614_v58, 0.0 }
0x1b51   :  { %3619 = vadd.xlane.f32.xlu2 %v3618_v63 }
0x1b97   :  { %v3617_v62 = vpop.xlane.xlu0 %3616 }
0x1b98   :  { %v3621_v8 = vmul.f32 0.032258064, %v3617_v62  ;;  %v4113_v62 = vld [vmem:[%s5694_s2 + $0x1d5] ss:$0 sm:$0xff] }
0x1b9a   :  { %4287 = vrsqrt.f32 %v3621_v8  ;;  %vm3630_vm14 = vcmp.eq.f32.partialorder %v3621_v8, inf  ;;  %v3633_v12 = vand.u32 2147483648, %v3621_v8  ;;  %vm3632_vm15 = vcmp.eq.f32.partialorder %v3621_v8, 0.0 }
0x1ba0   :  { %v4288_v44 = vpop.eup %4287 }
0x1ba1   :  { %v3624_v22 = vmul.f32 %v4288_v44, %v3621_v8 }
0x1ba3   :  { %v3625_v7 = vmul.f32 %v4288_v44, %v3624_v22 }
0x1ba5   :  { %v3626_v38 = vmul.f32 0.5, %v3625_v7 }
0x1ba7   :  { %v3627_v45 = vsub.f32 1.5, %v3626_v38 }
0x1ba9   :  { %v3628_v28 = vmul.f32 %v4288_v44, %v3627_v45  ;;  %v4114_v45 = vld [vmem:[%s5694_s2 + $0x1d6] ss:$0 sm:$0xff] }
0x1bab   :  { %v3629_v21 = vmul.f32 %v3628_v28, %v3621_v8 }
0x1bad   :  { %v3631_v20 = vsel %vm3630_vm14, %v3621_v8, %v3629_v21 }
0x1bae   :  { %v3634_v15 = vsel %vm3632_vm15, %v3633_v12, %v3631_v20 }
0x1baf   :  { %v3647_v2 = vadd.f32 1e-06, %v3634_v15 }
0x1bb1   :  { %4289 = vrcp.f32 %v3647_v2  ;;  %v3660_v55 = vand.u32 2147483648, %v3647_v2  ;;  %v3658_v54 = vand.u32 2147483647, %v3647_v2  ;;  %vm3654_vm2 = vweird.f32 %v3647_v2 }
0x1bb3   :  { %v3661_v36 = vor.u32 1.1754944e-38, %v3660_v55  ;;  %vm3659_vm4 = vcmp.eq.f32.partialorder %v3658_v54, 8.507059e+37 }
0x1bb7   :  { %v4290_v52 = vpop.eup %4289 }
0x1bb8   :  { %v3650_v50 = vmul.f32 %v4290_v52, %v3647_v2  ;;  %vm3655_vm1 = vweird.f32 %v4290_v52 }
0x1bb9   :  { %vm3656_vm3 = vmor %vm3654_vm2, %vm3655_vm1 }
0x1bba   :  { %v3651_v42 = vsub.f32 1.0, %v3650_v50 }
0x1bbc   :  { %v3652_v14 = vmul.f32 %v4290_v52, %v3651_v42 }
0x1bbe   :  { %v3653_v4 = vadd.f32 %v4290_v52, %v3652_v14 }
0x1bc0   :  { %v3657_v43 = vsel %vm3656_vm3, %v4290_v52, %v3653_v4 }
0x1bc1   :  { %v3662_v19 = vsel %vm3659_vm4, %v3661_v36, %v3657_v43 }
0x1bc2   :  { %v3677_v18 = vmul.f32 %v3662_v19, %v3611_v9 }
0x1bc4   :  { %v3620_v17 = vpop.xlane.xlu2 %3619  ;;  %v3680_v23 = vmul.f32 %v4111_v5, %v3677_v18 }
0x1bc5   :  { %v3622_v24 = vmul.f32 0.032258064, %v3620_v17 }
0x1bc6   :  { %v3683_v25 = vadd.f32 %v4112_v47, %v3680_v23 }
0x1bc7   :  { %4291 = vrsqrt.f32 %v3622_v24  ;;  %vm3642_vm5 = vcmp.eq.f32.partialorder %v3622_v24, inf  ;;  %v3645_v32 = vand.u32 2147483648, %v3622_v24  ;;  %vm3644_vm7 = vcmp.eq.f32.partialorder %v3622_v24, 0.0 }
0x1bc8   :  { %4025 = vmatmul.msk.f32.vlgmr.msrb.gmra.mxu2 %vm61_vm0, %v3683_v25 }
0x1bcd   :  { %v4292_v31 = vpop.eup %4291 }
0x1bce   :  { %v3636_v26 = vmul.f32 %v4292_v31, %v3622_v24 }
0x1bd0   :  { %v3637_v27 = vmul.f32 %v4292_v31, %v3636_v26 }
0x1bd2   :  { %v3638_v61 = vmul.f32 0.5, %v3637_v27 }
0x1bd4   :  { %v3639_v57 = vsub.f32 1.5, %v3638_v61 }
0x1bd6   :  { %v3640_v6 = vmul.f32 %v4292_v31, %v3639_v57 }
0x1bd8   :  { %v3641_v60 = vmul.f32 %v3640_v6, %v3622_v24 }
0x1bda   :  { %v3643_v51 = vsel %vm3642_vm5, %v3622_v24, %v3641_v60 }
0x1bdb   :  { %v3646_v34 = vsel %vm3644_vm7, %v3645_v32, %v3643_v51 }
0x1bdc   :  { %v3648_v29 = vadd.f32 1e-06, %v3646_v34 }
0x1bde   :  { %4293 = vrcp.f32 %v3648_v29  ;;  %v3674_v11 = vand.u32 2147483648, %v3648_v29  ;;  %v3672_v9 = vand.u32 2147483647, %v3648_v29  ;;  %vm3668_vm9 = vweird.f32 %v3648_v29 }
0x1be0   :  { %v3675_v53 = vor.u32 1.1754944e-38, %v3674_v11  ;;  %vm3673_vm11 = vcmp.eq.f32.partialorder %v3672_v9, 8.507059e+37 }
0x1be4   :  { %v4294_v30 = vpop.eup %4293 }
0x1be5   :  { %v3664_v37 = vmul.f32 %v4294_v30, %v3648_v29  ;;  %vm3669_vm8 = vweird.f32 %v4294_v30 }
0x1be6   :  { %vm3670_vm10 = vmor %vm3668_vm9, %vm3669_vm8 }
0x1be7   :  { %v3665_v40 = vsub.f32 1.0, %v3664_v37  ;;  %v4116_v37 = vld [vmem:[%s5694_s2 + $0x1e1] ss:$0 sm:$0xff] }
0x1be9   :  { %v3666_v48 = vmul.f32 %v4294_v30, %v3665_v40 }
0x1beb   :  { %v3667_v49 = vadd.f32 %v4294_v30, %v3666_v48 }
0x1bed   :  { %v3671_v56 = vsel %vm3670_vm10, %v4294_v30, %v3667_v49 }
0x1bee   :  { %v3676_v46 = vsel %vm3673_vm11, %v3675_v53, %v3671_v56 }
0x1bef   :  { %v3678_v58 = vmul.f32 %v3676_v46, %v5617_v3 }
0x1bf1   :  { %v3681_v63 = vmul.f32 %v4111_v5, %v3678_v58 }
0x1bf3   :  { %v3684_v1 = vadd.f32 %v4112_v47, %v3681_v63 }
0x1bf5   :  { %4026 = vmatmul.msk.f32.gmra.mxu2 %vm61_vm0, %v3684_v1 }
0x1c4b   :  { %v3709_v8 = vpop.f32.mrf.mxu2 }
0x1c4c   :  { %v3710_v44 = vadd.f32 %v4113_v62, %v3709_v8 }
0x1c4e   :  { %v3715_v22 = vmax.f32 %v3710_v44, 0.0 }
0x1c50   :  { %4031 = vmatmul.msk.f32.vlgmr.msrb.gmra.mxu0 %vm1858_vm6, %v3715_v22 }
0x1c78   :  { %v3712_v3 = vpop.f32.mrf.mxu2 }
0x1c79   :  { %v3713_v7 = vadd.f32 %v4113_v62, %v3712_v3 }
0x1c7b   :  { %v3716_v38 = vmax.f32 %v3713_v7, 0.0 }
0x1c7d   :  { %4032 = vmatmul.msk.f32.gmra.mxu0 %vm1858_vm6, %v3716_v38 }
0x1ccd   :  { %v3752_v28 = vpop.f32.mrf.mxu0 }
0x1cce   :  { %v3758_v16 = vadd.f32 %v3752_v28, %v5603_v33 }
0x1cd0   :  { %v3761_v21 = vadd.f32 %v4114_v45, %v3758_v16 }
0x1cd2   :  { %v3765_v12 = vsel %vm61_vm0, %v3761_v21, 0.0 }
0x1cd3   :  { %3766 = vadd.xlane.f32.xlu1 %v3765_v12 }
0x1cfa   :  { %v3755_v13 = vpop.f32.mrf.mxu0 }
0x1cfb   :  { %v3759_v20 = vadd.f32 %v3755_v13, %v5608_v39 }
0x1cfd   :  { %v3762_v15 = vadd.f32 %v4114_v45, %v3759_v20 }
0x1cff   :  { %v3768_v2 = vsel %vm61_vm0, %v3762_v15, 0.0 }
0x1d00   :  { %3769 = vadd.xlane.f32.xlu2 %v3768_v2 }
0x1d46   :  { %v3767_v52 = vpop.xlane.xlu1 %3766 }
0x1d47   :  { %v3771_v50 = vmul.f32 %v3767_v52, %v4385_v10 }
0x1d49   :  { %v3773_v42 = vsub.f32 %v3761_v21, %v3771_v50 }
0x1d4b   :  { %v3775_v55 = vmul.f32 %v3773_v42, %v3773_v42 }
0x1d4d   :  { %v3777_v14 = vsel %vm61_vm0, %v3775_v55, 0.0 }
0x1d4e   :  { %3778 = vadd.xlane.f32.xlu0 %v3777_v14 }
0x1d73   :  { %v3770_v33 = vpop.xlane.xlu2 %3769 }
0x1d74   :  { %v3772_v54 = vmul.f32 %v3770_v33, %v4385_v10 }
0x1d76   :  { %v5674_v4 = vsub.f32 %v3762_v15, %v3772_v54 }
0x1d78   :  { %v3776_v39 = vmul.f32 %v5674_v4, %v5674_v4 }
0x1d7a   :  { %v3780_v36 = vsel %vm61_vm0, %v3776_v39, 0.0 }
0x1d7b   :  { %3781 = vadd.xlane.f32.xlu1 %v3780_v36 }
0x1dc1   :  { %v3779_v43 = vpop.xlane.xlu0 %3778 }
0x1dc2   :  { %v3783_v5 = vmul.f32 0.032258064, %v3779_v43 }
0x1dc4   :  { %4295 = vrsqrt.f32 %v3783_v5  ;;  %vm3792_vm6 = vcmp.eq.f32.partialorder %v3783_v5, inf  ;;  %v3795_v10 = vand.u32 2147483648, %v3783_v5  ;;  %vm3794_vm12 = vcmp.eq.f32.partialorder %v3783_v5, 0.0 }
0x1dca   :  { %v4296_v19 = vpop.eup %4295 }
0x1dcb   :  { %v3786_v18 = vmul.f32 %v4296_v19, %v3783_v5 }
0x1dcd   :  { %v3787_v47 = vmul.f32 %v4296_v19, %v3786_v18 }
0x1dcf   :  { %v3788_v17 = vmul.f32 0.5, %v3787_v47 }
0x1dd1   :  { %v3789_v23 = vsub.f32 1.5, %v3788_v17 }
0x1dd3   :  { %v3790_v24 = vmul.f32 %v4296_v19, %v3789_v23 }
0x1dd5   :  { %v3791_v25 = vmul.f32 %v3790_v24, %v3783_v5 }
0x1dd7   :  { %v3793_v31 = vsel %vm3792_vm6, %v3783_v5, %v3791_v25 }
0x1dd8   :  { %v3796_v26 = vsel %vm3794_vm12, %v3795_v10, %v3793_v31 }
0x1dd9   :  { %v3809_v27 = vadd.f32 1e-06, %v3796_v26 }
0x1ddb   :  { %4297 = vrcp.f32 %v3809_v27  ;;  %v3822_v6 = vand.u32 2147483648, %v3809_v27  ;;  %v3820_v60 = vand.u32 2147483647, %v3809_v27  ;;  %vm3816_vm14 = vweird.f32 %v3809_v27 }
0x1ddd   :  { %v3823_v51 = vor.u32 1.1754944e-38, %v3822_v6  ;;  %vm3821_vm1 = vcmp.eq.f32.partialorder %v3820_v60, 8.507059e+37 }
0x1de1   :  { %v4298_v61 = vpop.eup %4297 }
0x1de2   :  { %v3812_v57 = vmul.f32 %v4298_v61, %v3809_v27  ;;  %vm3817_vm13 = vweird.f32 %v4298_v61 }
0x1de3   :  { %vm3818_vm15 = vmor %vm3816_vm14, %vm3817_vm13 }
0x1de4   :  { %v3813_v59 = vsub.f32 1.0, %v3812_v57 }
0x1de6   :  { %v3814_v41 = vmul.f32 %v4298_v61, %v3813_v59 }
0x1de8   :  { %v3815_v32 = vadd.f32 %v4298_v61, %v3814_v41 }
0x1dea   :  { %v3819_v34 = vsel %vm3818_vm15, %v4298_v61, %v3815_v32 }
0x1deb   :  { %v3824_v29 = vsel %vm3821_vm1, %v3823_v51, %v3819_v34 }
0x1dec   :  { %v3839_v30 = vmul.f32 %v3824_v29, %v3773_v42 }
0x1dee   :  { %v3782_v40 = vpop.xlane.xlu1 %3781  ;;  %v3842_v11 = vmul.f32 %v4115_v35, %v3839_v30 }
0x1def   :  { %v3784_v48 = vmul.f32 0.032258064, %v3782_v40 }
0x1df0   :  { %v3845_v9 = vadd.f32 %v4116_v37, %v3842_v11 }
0x1df1   :  { %4299 = vrsqrt.f32 %v3784_v48  ;;  %vm3804_vm2 = vcmp.eq.f32.partialorder %v3784_v48, inf  ;;  %v3807_v0 = vand.u32 2147483648, %v3784_v48  ;;  %vm3806_vm3 = vcmp.eq.f32.partialorder %v3784_v48, 0.0 }
0x1df2   :  { %3847 = vst.msk [vmem:[#allocation2] sm:$0xff] %vm61_vm0, %v3845_v9 }
0x1df7   :  { %v4300_v49 = vpop.eup %4299 }
0x1df8   :  { %v3798_v53 = vmul.f32 %v4300_v49, %v3784_v48 }
0x1dfa   :  { %v3799_v56 = vmul.f32 %v4300_v49, %v3798_v53 }
0x1dfc   :  { %v3800_v46 = vmul.f32 0.5, %v3799_v56 }
0x1dfe   :  { %v3801_v58 = vsub.f32 1.5, %v3800_v46 }
0x1e00   :  { %v3802_v63 = vmul.f32 %v4300_v49, %v3801_v58 }
0x1e02   :  { %v3803_v1 = vmul.f32 %v3802_v63, %v3784_v48 }
0x1e04   :  { %v3805_v62 = vsel %vm3804_vm2, %v3784_v48, %v3803_v1 }
0x1e05   :  { %v3808_v8 = vsel %vm3806_vm3, %v3807_v0, %v3805_v62 }
0x1e06   :  { %v3810_v44 = vadd.f32 1e-06, %v3808_v8 }
0x1e08   :  { %4301 = vrcp.f32 %v3810_v44  ;;  %v3836_v38 = vand.u32 2147483648, %v3810_v44  ;;  %v3834_v28 = vand.u32 2147483647, %v3810_v44  ;;  %vm3830_vm5 = vweird.f32 %v3810_v44 }
0x1e0a   :  { %v3837_v21 = vor.u32 1.1754944e-38, %v3836_v38  ;;  %vm3835_vm8 = vcmp.eq.f32.partialorder %v3834_v28, 8.507059e+37 }
0x1e0e   :  { %v4302_v22 = vpop.eup %4301 }
0x1e0f   :  { %v3826_v3 = vmul.f32 %v4302_v22, %v3810_v44  ;;  %vm3831_vm4 = vweird.f32 %v4302_v22 }
0x1e10   :  { %vm3832_vm7 = vmor %vm3830_vm5, %vm3831_vm4 }
0x1e11   :  { %v3827_v7 = vsub.f32 1.0, %v3826_v3 }
0x1e13   :  { %v3828_v45 = vmul.f32 %v4302_v22, %v3827_v7 }
0x1e15   :  { %v3829_v16 = vadd.f32 %v4302_v22, %v3828_v45 }
0x1e17   :  { %v3833_v12 = vsel %vm3832_vm7, %v4302_v22, %v3829_v16 }
0x1e18   :  { %v3838_v13 = vsel %vm3835_vm8, %v3837_v21, %v3833_v12 }
0x1e19   :  { %v3840_v20 = vmul.f32 %v3838_v13, %v5674_v4 }
0x1e1b   :  { %v3843_v15 = vmul.f32 %v4115_v35, %v3840_v20 }
0x1e1d   :  { %v3846_v2 = vadd.f32 %v4116_v37, %v3843_v15 }
0x1e1f   :  { %3848 = vst.msk [vmem:[#allocation2 + $0x8] sm:$0xff] %vm61_vm0, %v3846_v2 }
0x1e20   :  { %3861 = dma.vmem_to_hbm [thread:$0]  %s3854_s23, 256, %s3856_s21, [#allocation3], %s4353_s24, %s4353_s24, %s4349_s18  }
0x1e21   :  { %4335 = dma.done.wait [#allocation3], 256  }
0x1e22   :  { %4336 = vsyncadd [#allocation3], 4294967040 }
0x1e23   :  { %3866 = vsyncpa [#allocation3], 1 }

</bundles_post_ra>
